<compile_context>
chip_gen: v5e
topology: v5e:2x2
jax: 0.10.0
libtpu: 0.0.40
codegen_flags: <defaults>
</compile_context>

<pallas_src>
import functools

import numpy as np
import jax
import jax.numpy as jnp
from jax.experimental import pallas as pl
from jax.experimental.pallas import tpu as pltpu


# -----------------------------------------------------------------------------
# Pallas kernel: multi-head window self-attention over W_BLK windows per grid
# step, SwinAttnBlock residual fused into the output write.
#   x_ref    : (W_BLK, N, C)  window tokens (also the shortcut), f32
#   m_ref    : (W_BLK, N, N)  additive attention mask, bf16     [have_mask]
#   wqkv_ref : (C, 3C) bf16   qkv weight, q columns pre-scaled by hd**-0.5
#   bqkv_ref : (1, 3C) f32    qkv bias,   q part pre-scaled
#   wproj_ref: (C, C)  bf16   output-projection weight
#   bproj_ref: (1, C)  f32    output-projection bias
#   o_ref    : (W_BLK, N, C)  attention output + residual
# -----------------------------------------------------------------------------
def _window_attn_kernel(*refs, num_heads, have_mask):
    if have_mask:
        x_ref, m_ref, wqkv_ref, bqkv_ref, wproj_ref, bproj_ref, o_ref = refs
    else:
        x_ref, wqkv_ref, bqkv_ref, wproj_ref, bproj_ref, o_ref = refs

    WB, N, C = x_ref.shape
    hd = C // num_heads

    x_f32 = x_ref[...].astype(jnp.float32)                     # residual path
    x_bf = x_f32.astype(jnp.bfloat16).reshape(WB * N, C)       # MXU inputs

    # qkv projection for every window in the block: one MXU matmul with f32
    # accumulation.  (The attention scale is pre-folded into the q columns.)
    qkv = jnp.dot(x_bf, wqkv_ref[...], preferred_element_type=jnp.float32)
    qkv = qkv + bqkv_ref[...].astype(jnp.float32)
    qkv = qkv.astype(jnp.bfloat16).reshape(WB, N, 3 * C)       # (WB, N, 3C)

    if have_mask:
        mask = m_ref[...].astype(jnp.float32)                  # (WB, N, N)

    # TODO(synk): the per-head lane-slice loop could be replaced by a single
    # dot_general batched over (window, head), but that requires a non-minor
    # (N <-> H) relayout inside the kernel whose Mosaic lowering is fragile at
    # small head_dim; each head below is at least fully batched over all W_BLK
    # windows so the MXU still sees back-to-back matmuls.
    head_outs = []
    for h in range(num_heads):
        qh = qkv[:, :, 0 * C + h * hd:0 * C + (h + 1) * hd]    # (WB, N, hd)
        kh = qkv[:, :, 1 * C + h * hd:1 * C + (h + 1) * hd]
        vh = qkv[:, :, 2 * C + h * hd:2 * C + (h + 1) * hd]
        # Batched over windows; hd contracted on both sides (no explicit k.T).
        s = jnp.einsum('wnd,wmd->wnm', qh, kh,
                       preferred_element_type=jnp.float32)     # (WB, N, N)
        if have_mask:
            s = s + mask
        s = s - jnp.max(s, axis=-1, keepdims=True)
        p = jnp.exp(s)
        inv = pl.reciprocal(jnp.sum(p, axis=-1, keepdims=True), approx=True)
        ctx = jnp.einsum('wnm,wmd->wnd', p.astype(jnp.bfloat16), vh,
                         preferred_element_type=jnp.float32)   # (WB, N, hd)
        head_outs.append(ctx * inv)

    ctx = jnp.concatenate(head_outs, axis=-1)                  # (WB, N, C)
    ctx = ctx.reshape(WB * N, C).astype(jnp.bfloat16)
    out = jnp.dot(ctx, wproj_ref[...], preferred_element_type=jnp.float32)
    out = out + bproj_ref[...].astype(jnp.float32)
    out = out.reshape(WB, N, C) + x_f32          # fused SwinAttnBlock residual
    o_ref[...] = out.astype(o_ref.dtype)
    # NOTE: with C >= 128 (the demo uses C=128) the output stores are fully
    # lane-dense.  TODO(synk): for C < 128 a flattened (W_BLK, N*C) out block
    # would avoid masked vst's but needs an in-kernel sublane->lane relayout.


# -----------------------------------------------------------------------------
# Generation-aware block budget (rows = W_BLK * N) and VMEM limit.
# -----------------------------------------------------------------------------
def _generation_budget():
    try:
        kind = jax.devices()[0].device_kind.lower()
    except Exception:
        kind = ""
    if "v7" in kind:
        # v7x: 64 MiB physical VMEM per TensorCore -> halve the row budget.
        return 1024, 32 * 1024 * 1024
    return 2048, 64 * 1024 * 1024


def _choose_w_blk(num_windows_total, windows_per_image, tokens_per_window,
                  max_rows, need_mask):
    """Largest window-block size that (a) divides the total window count,
    (b) when a mask is needed, either divides or is a multiple of the
    per-image window count (so the mask index_map stays aligned),
    (c) keeps W_BLK*N within the per-generation row budget, and
    (d) leaves at least 2 grid steps so v7x megacore has work to shard."""
    cap = max(1, num_windows_total // 2)
    best = 1
    for wb in range(1, num_windows_total + 1):
        if num_windows_total % wb:
            continue
        if wb > cap:
            continue
        if need_mask and (windows_per_image % wb) and (wb % windows_per_image):
            continue
        if wb * tokens_per_window <= max_rows:
            best = max(best, wb)
    return best


def window_attention_pallas(x_windows, mask, params, num_heads, nW):
    """x_windows: (nWB, N, C) f32; mask: None or (nW, N, N) additive (0/-100);
    params: (wqkv (C,3C) bf16, bqkv (1,3C) f32, wproj (C,C) bf16,
             bproj (1,C) f32) with the attention scale pre-folded into q.
    Returns WindowAttention(x_windows) + x_windows (block residual fused)."""
    nWB, N, C = x_windows.shape
    wqkv, bqkv, wproj, bproj = params
    have_mask = mask is not None

    max_rows, vmem_limit = _generation_budget()
    w_blk = _choose_w_blk(nWB, nW, N, max_rows, have_mask)
    grid = (nWB // w_blk,)

    in_specs = [pl.BlockSpec((w_blk, N, C), lambda i: (i, 0, 0))]
    operands = [x_windows]

    if have_mask:
        mask = mask.astype(jnp.bfloat16)         # 0 / -100 exact in bf16
        if nW % w_blk == 0:
            # Window order is B-major with period nW and w_blk | nW, so grid
            # step i covers mask rows [(i % reps)*w_blk, ...+w_blk); keep the
            # small (nW,N,N) mask un-broadcast in HBM (no batch scaling).
            reps = nW // w_blk
            in_specs.append(pl.BlockSpec(
                (w_blk, N, N), lambda i, reps=reps: (i % reps, 0, 0)))
            operands.append(mask)
        else:
            # w_blk covers whole images: tile the mask once on host to a
            # single resident (w_blk, N, N) block (constant index_map).
            assert w_blk % nW == 0, "mask/window-block misalignment"
            tiled = jnp.tile(mask, (w_blk // nW, 1, 1))
            in_specs.append(pl.BlockSpec((w_blk, N, N), lambda i: (0, 0, 0)))
            operands.append(tiled)

    # Weights/biases as separate resident blocks (constant index_map); keeping
    # wqkv / wproj separate avoids an in-kernel lane slice at a non-128-aligned
    # 3C boundary.
    in_specs += [pl.BlockSpec((C, 3 * C), lambda i: (0, 0)),
                 pl.BlockSpec((1, 3 * C), lambda i: (0, 0)),
                 pl.BlockSpec((C, C), lambda i: (0, 0)),
                 pl.BlockSpec((1, C), lambda i: (0, 0))]
    operands += [wqkv, bqkv, wproj, bproj]

    kernel = functools.partial(_window_attn_kernel, num_heads=num_heads,
                               have_mask=have_mask)
    return pl.pallas_call(
        kernel,
        out_shape=jax.ShapeDtypeStruct((nWB, N, C), x_windows.dtype),
        grid=grid,
        in_specs=in_specs,
        out_specs=pl.BlockSpec((w_blk, N, C), lambda i: (i, 0, 0)),
        compiler_params=pltpu.CompilerParams(
            # Window blocks are independent -> shard across both TensorCores
            # on v7x (grid always has >= 2 steps when nWB >= 2); harmless on
            # single-core v5e/v6e.
            dimension_semantics=("parallel",),
            vmem_limit_bytes=vmem_limit),
    )(*operands)


# -----------------------------------------------------------------------------
# Plain-JAX glue: window partition / reverse, cyclic shift, attention mask.
# TODO(synk): fold partition/reverse into the pallas_call BlockSpecs (grid over
# (B, H/ws)) to remove the two full-tensor HBM permutation passes per block.
# -----------------------------------------------------------------------------
def window_partition(x, ws):
    B, H, W, C = x.shape
    x = x.reshape(B, H // ws, ws, W // ws, ws, C)
    return x.transpose(0, 1, 3, 2, 4, 5).reshape(-1, ws, ws, C)


def window_reverse(windows, ws, H, W):
    B = windows.shape[0] // ((H // ws) * (W // ws))
    x = windows.reshape(B, H // ws, W // ws, ws, ws, -1)
    return x.transpose(0, 1, 3, 2, 4, 5).reshape(B, H, W, -1)


def calculate_mask(H, W, ws, shift):
    img_mask = np.zeros((1, H, W, 1), np.float32)
    h_slices = (slice(0, -ws), slice(-ws, -shift), slice(-shift, None))
    w_slices = (slice(0, -ws), slice(-ws, -shift), slice(-shift, None))
    cnt = 0
    for h in h_slices:
        for w in w_slices:
            img_mask[:, h, w, :] = cnt
            cnt += 1
    mw = img_mask.reshape(1, H // ws, ws, W // ws, ws, 1)
    mw = mw.transpose(0, 1, 3, 2, 4, 5).reshape(-1, ws * ws)
    attn_mask = mw[:, None, :] - mw[:, :, None]
    attn_mask = np.where(attn_mask != 0, -100.0, 0.0).astype(np.float32)
    return jnp.asarray(attn_mask)                         # (nW, N, N)


def swin_attn_block(x, x_size, params, window_size, shift_size, num_heads):
    H, W = x_size
    B, L, C = x.shape
    if min(H, W) <= window_size:
        shift_size = 0
        window_size = min(H, W)
    ws = window_size
    assert H % ws == 0 and W % ws == 0, "H, W must be multiples of window_size"

    xh = x.reshape(B, H, W, C)
    if shift_size > 0:
        xh = jnp.roll(xh, shift=(-shift_size, -shift_size), axis=(1, 2))

    N = ws * ws
    nW = (H // ws) * (W // ws)
    x_windows = window_partition(xh, ws).reshape(-1, N, C)

    mask = calculate_mask(H, W, ws, shift_size) if shift_size > 0 else None

    # Kernel returns attention + residual; since roll/partition are pure token
    # permutations, un-permuting below yields exactly shortcut + attn.
    attn_windows = window_attention_pallas(x_windows, mask, params,
                                           num_heads, nW)

    attn_windows = attn_windows.reshape(-1, ws, ws, C)
    xh = window_reverse(attn_windows, ws, H, W)
    if shift_size > 0:
        xh = jnp.roll(xh, shift=(shift_size, shift_size), axis=(1, 2))
    return xh.reshape(B, H * W, C)


def rstb_forward(x, x_size, block_params, window_size, num_heads):
    out = x
    for i, params in enumerate(block_params):
        shift = 0 if i % 2 == 0 else window_size // 2
        x = swin_attn_block(x, x_size, params, window_size, shift, num_heads)
    return x + out


# -----------------------------------------------------------------------------
# Synthetic parameter init (mirrors nn.Linear shapes) + host-side preparation:
# fold the attention scale into q and cast weights to bf16 for the MXU.
# -----------------------------------------------------------------------------
def init_block_params(key, dim):
    k1, k2, k3, k4 = jax.random.split(key, 4)
    wqkv = 0.02 * jax.random.normal(k1, (dim, 3 * dim), jnp.float32)
    bqkv = 0.02 * jax.random.normal(k2, (1, 3 * dim), jnp.float32)
    wproj = 0.02 * jax.random.normal(k3, (dim, dim), jnp.float32)
    bproj = 0.02 * jax.random.normal(k4, (1, dim), jnp.float32)
    return wqkv, bqkv, wproj, bproj


def prepare_attn_params(wqkv, bqkv, wproj, bproj, num_heads):
    """Fold head_dim**-0.5 into the q columns (removes the in-kernel scale
    multiply) and cast the weight matrices to bf16 (native MXU input dtype);
    biases stay f32 since they are added to f32 accumulators."""
    C = wproj.shape[0]
    scale = float((C // num_heads) ** -0.5)
    wqkv = wqkv.at[:, :C].multiply(scale)
    bqkv = bqkv.at[:, :C].multiply(scale)
    return (wqkv.astype(jnp.bfloat16), bqkv.astype(jnp.float32),
            wproj.astype(jnp.bfloat16), bproj.astype(jnp.float32))


# -----------------------------------------------------------------------------
# Pure-JAX f32 reference (mirrors the PyTorch module) for a tolerance check.
# -----------------------------------------------------------------------------
def rstb_reference(x, x_size, raw_params, window_size, num_heads):
    H, W = x_size
    B, L, C = x.shape
    out0 = x
    for i, (wqkv, bqkv, wproj, bproj) in enumerate(raw_params):
        shift = 0 if i % 2 == 0 else window_size // 2
        ws = window_size
        if min(H, W) <= ws:
            shift, ws = 0, min(H, W)
        N = ws * ws
        hd = C // num_heads
        shortcut = x
        xh = x.reshape(B, H, W, C)
        if shift > 0:
            xh = jnp.roll(xh, (-shift, -shift), (1, 2))
        xw = window_partition(xh, ws).reshape(-1, N, C)
        Bn = xw.shape[0]
        qkv = (xw @ wqkv + bqkv).reshape(Bn, N, 3, num_heads, hd)
        qkv = qkv.transpose(2, 0, 3, 1, 4)
        q, k, v = qkv[0] * (hd ** -0.5), qkv[1], qkv[2]
        attn = q @ jnp.swapaxes(k, -2, -1)
        if shift > 0:
            m = calculate_mask(H, W, ws, shift)
            nW = m.shape[0]
            attn = attn.reshape(Bn // nW, nW, num_heads, N, N) + m[None, :, None]
            attn = attn.reshape(Bn, num_heads, N, N)
        attn = jax.nn.softmax(attn, axis=-1)
        o = (attn @ v).transpose(0, 2, 1, 3).reshape(Bn, N, C)
        o = o @ wproj + bproj
        xh = window_reverse(o.reshape(-1, ws, ws, C), ws, H, W)
        if shift > 0:
            xh = jnp.roll(xh, (shift, shift), (1, 2))
        x = shortcut + xh.reshape(B, H * W, C)
    return x + out0


if __name__ == "__main__":
    # Small Light-RSTB config: dim=128, input_resolution=(8, 8), depth=2,
    # num_heads=4, window_size=4 (block 0: shift=0, block 1: shift=2).
    B, H, W, C = 2, 8, 8, 128
    depth, num_heads, window_size = 2, 4, 4
    x_size = (H, W)

    key = jax.random.PRNGKey(0)
    kx, *kblocks = jax.random.split(key, depth + 1)
    x = jax.random.normal(kx, (B, H * W, C), jnp.float32)
    raw_params = [init_block_params(k, C) for k in kblocks]
    block_params = [prepare_attn_params(*p, num_heads=num_heads)
                    for p in raw_params]

    fwd = jax.jit(functools.partial(rstb_forward, x_size=x_size,
                                    window_size=window_size,
                                    num_heads=num_heads))
    y = jax.block_until_ready(fwd(x, block_params=block_params))
    assert y.shape == (B, H * W, C)
    assert bool(jnp.all(jnp.isfinite(y)))

    # Loose tolerance: bf16 MXU inputs + approx reciprocal vs f32 reference.
    y_ref = rstb_reference(x, x_size, raw_params, window_size, num_heads)
    max_err = float(jnp.max(jnp.abs(y - y_ref)))
    assert max_err < 0.1, f"max abs error {max_err}"
    print("KERNEL_OK")
</pallas_src>

<mosaic_0001>
module attributes {stable_mosaic.version = 11 : i64} {
  func.func @_window_attn_kernel(%arg0: i32, %arg1: memref<4x16x128xf32, #tpu.memory_space<vmem>>, %arg2: memref<128x384xbf16, #tpu.memory_space<vmem>>, %arg3: memref<1x384xf32, #tpu.memory_space<vmem>>, %arg4: memref<128x128xbf16, #tpu.memory_space<vmem>>, %arg5: memref<1x128xf32, #tpu.memory_space<vmem>>, %arg6: memref<4x16x128xf32, #tpu.memory_space<vmem>>) attributes {dimension_semantics = [#tpu.dimension_semantics<parallel>], iteration_bounds = array<i64: 2>, scalar_prefetch = 0 : i64, scratch_operands = 0 : i64, tpu.core_type = #tpu.core_type<tc>, window_params = [{transform_indices = @transform_0, window_bounds = array<i64: 4, 16, 128>}, {pipeline_mode = #tpu.pipeline_mode<synchronous>, transform_indices = @transform_1, window_bounds = array<i64: 128, 384>}, {pipeline_mode = #tpu.pipeline_mode<synchronous>, transform_indices = @transform_2, window_bounds = array<i64: 1, 384>}, {pipeline_mode = #tpu.pipeline_mode<synchronous>, transform_indices = @transform_3, window_bounds = array<i64: 128, 128>}, {pipeline_mode = #tpu.pipeline_mode<synchronous>, transform_indices = @transform_4, window_bounds = array<i64: 1, 128>}, {transform_indices = @transform_5, window_bounds = array<i64: 4, 16, 128>}]} {
    %c0 = arith.constant 0 : index
    %c0_0 = arith.constant 0 : index
    %c0_1 = arith.constant 0 : index
    %0 = vector.load %arg1[%c0, %c0_0, %c0_1] : memref<4x16x128xf32, #tpu.memory_space<vmem>>, vector<4x16x128xf32>
    %1 = arith.truncf %0 : vector<4x16x128xf32> to vector<4x16x128xbf16>
    %2 = vector.shape_cast %1 : vector<4x16x128xbf16> to vector<64x128xbf16>
    %c0_2 = arith.constant 0 : index
    %c0_3 = arith.constant 0 : index
    %3 = vector.load %arg2[%c0_2, %c0_3] : memref<128x384xbf16, #tpu.memory_space<vmem>>, vector<128x384xbf16>
    %cst = arith.constant dense<0.000000e+00> : vector<64x384xf32>
    %4 = tpu.matmul %2, %3, %cst {dimension_numbers = #tpu.dot_dimension_numbers<[1], [0], [0], [1], [0, 0, 1, 1], [], []>} : vector<64x128xbf16>, vector<128x384xbf16>, vector<64x384xf32> -> vector<64x384xf32>
    %c0_4 = arith.constant 0 : index
    %c0_5 = arith.constant 0 : index
    %5 = vector.load %arg3[%c0_4, %c0_5] : memref<1x384xf32, #tpu.memory_space<vmem>>, vector<1x384xf32>
    %6 = vector.broadcast %5 : vector<1x384xf32> to vector<64x384xf32>
    %7 = arith.addf %4, %6 : vector<64x384xf32>
    %8 = arith.truncf %7 : vector<64x384xf32> to vector<64x384xbf16>
    %9 = vector.shape_cast %8 : vector<64x384xbf16> to vector<4x16x384xbf16>
    %10 = vector.extract_strided_slice %9 {offsets = [0, 0, 0], sizes = [4, 16, 32], strides = [1, 1, 1]} : vector<4x16x384xbf16> to vector<4x16x32xbf16>
    %11 = vector.extract_strided_slice %9 {offsets = [0, 0, 128], sizes = [4, 16, 32], strides = [1, 1, 1]} : vector<4x16x384xbf16> to vector<4x16x32xbf16>
    %12 = vector.extract_strided_slice %9 {offsets = [0, 0, 256], sizes = [4, 16, 32], strides = [1, 1, 1]} : vector<4x16x384xbf16> to vector<4x16x32xbf16>
    "tpu.trace_start"() <{level = 10 : i32, message = "wnd,wmd->wnm"}> : () -> ()
    %cst_6 = arith.constant dense<0.000000e+00> : vector<4x16x16xf32>
    %13 = tpu.matmul %10, %11, %cst_6 {dimension_numbers = #tpu.dot_dimension_numbers<[2], [2], [1], [1], [0, 0, 0, 1, 1, 1], [0], [0]>} : vector<4x16x32xbf16>, vector<4x16x32xbf16>, vector<4x16x16xf32> -> vector<4x16x16xf32>
    "tpu.trace_stop"() : () -> ()
    %cst_7 = arith.constant dense<0xFF800000> : vector<4x16xf32>
    %14 = vector.multi_reduction <maximumf>, %13, %cst_7 [2] : vector<4x16x16xf32> to vector<4x16xf32>
    %15 = vector.shape_cast %14 : vector<4x16xf32> to vector<4x16x1xf32>
    %16 = vector.broadcast %15 : vector<4x16x1xf32> to vector<4x16x16xf32>
    %17 = arith.subf %13, %16 : vector<4x16x16xf32>
    %18 = math.exp %17 : vector<4x16x16xf32>
    %cst_8 = arith.constant dense<0.000000e+00> : vector<4x16xf32>
    %19 = vector.multi_reduction <add>, %18, %cst_8 [2] : vector<4x16x16xf32> to vector<4x16xf32>
    %20 = vector.shape_cast %19 : vector<4x16xf32> to vector<4x16x1xf32>
    %21 = tpu.reciprocal %20 {approx = true} : vector<4x16x1xf32> -> vector<4x16x1xf32>
    %22 = arith.truncf %18 : vector<4x16x16xf32> to vector<4x16x16xbf16>
    "tpu.trace_start"() <{level = 10 : i32, message = "wnm,wmd->wnd"}> : () -> ()
    %cst_9 = arith.constant dense<0.000000e+00> : vector<4x16x32xf32>
    %23 = tpu.matmul %22, %12, %cst_9 {dimension_numbers = #tpu.dot_dimension_numbers<[2], [1], [1], [2], [0, 0, 0, 1, 1, 2], [0], [0]>} : vector<4x16x16xbf16>, vector<4x16x32xbf16>, vector<4x16x32xf32> -> vector<4x16x32xf32>
    "tpu.trace_stop"() : () -> ()
    %24 = vector.broadcast %21 : vector<4x16x1xf32> to vector<4x16x32xf32>
    %25 = arith.mulf %23, %24 : vector<4x16x32xf32>
    %26 = vector.extract_strided_slice %9 {offsets = [0, 0, 32], sizes = [4, 16, 32], strides = [1, 1, 1]} : vector<4x16x384xbf16> to vector<4x16x32xbf16>
    %27 = vector.extract_strided_slice %9 {offsets = [0, 0, 160], sizes = [4, 16, 32], strides = [1, 1, 1]} : vector<4x16x384xbf16> to vector<4x16x32xbf16>
    %28 = vector.extract_strided_slice %9 {offsets = [0, 0, 288], sizes = [4, 16, 32], strides = [1, 1, 1]} : vector<4x16x384xbf16> to vector<4x16x32xbf16>
    "tpu.trace_start"() <{level = 10 : i32, message = "wnd,wmd->wnm"}> : () -> ()
    %cst_10 = arith.constant dense<0.000000e+00> : vector<4x16x16xf32>
    %29 = tpu.matmul %26, %27, %cst_10 {dimension_numbers = #tpu.dot_dimension_numbers<[2], [2], [1], [1], [0, 0, 0, 1, 1, 1], [0], [0]>} : vector<4x16x32xbf16>, vector<4x16x32xbf16>, vector<4x16x16xf32> -> vector<4x16x16xf32>
    "tpu.trace_stop"() : () -> ()
    %cst_11 = arith.constant dense<0xFF800000> : vector<4x16xf32>
    %30 = vector.multi_reduction <maximumf>, %29, %cst_11 [2] : vector<4x16x16xf32> to vector<4x16xf32>
    %31 = vector.shape_cast %30 : vector<4x16xf32> to vector<4x16x1xf32>
    %32 = vector.broadcast %31 : vector<4x16x1xf32> to vector<4x16x16xf32>
    %33 = arith.subf %29, %32 : vector<4x16x16xf32>
    %34 = math.exp %33 : vector<4x16x16xf32>
    %cst_12 = arith.constant dense<0.000000e+00> : vector<4x16xf32>
    %35 = vector.multi_reduction <add>, %34, %cst_12 [2] : vector<4x16x16xf32> to vector<4x16xf32>
    %36 = vector.shape_cast %35 : vector<4x16xf32> to vector<4x16x1xf32>
    %37 = tpu.reciprocal %36 {approx = true} : vector<4x16x1xf32> -> vector<4x16x1xf32>
    %38 = arith.truncf %34 : vector<4x16x16xf32> to vector<4x16x16xbf16>
    "tpu.trace_start"() <{level = 10 : i32, message = "wnm,wmd->wnd"}> : () -> ()
    %cst_13 = arith.constant dense<0.000000e+00> : vector<4x16x32xf32>
    %39 = tpu.matmul %38, %28, %cst_13 {dimension_numbers = #tpu.dot_dimension_numbers<[2], [1], [1], [2], [0, 0, 0, 1, 1, 2], [0], [0]>} : vector<4x16x16xbf16>, vector<4x16x32xbf16>, vector<4x16x32xf32> -> vector<4x16x32xf32>
    "tpu.trace_stop"() : () -> ()
    %40 = vector.broadcast %37 : vector<4x16x1xf32> to vector<4x16x32xf32>
    %41 = arith.mulf %39, %40 : vector<4x16x32xf32>
    %42 = vector.extract_strided_slice %9 {offsets = [0, 0, 64], sizes = [4, 16, 32], strides = [1, 1, 1]} : vector<4x16x384xbf16> to vector<4x16x32xbf16>
    %43 = vector.extract_strided_slice %9 {offsets = [0, 0, 192], sizes = [4, 16, 32], strides = [1, 1, 1]} : vector<4x16x384xbf16> to vector<4x16x32xbf16>
    %44 = vector.extract_strided_slice %9 {offsets = [0, 0, 320], sizes = [4, 16, 32], strides = [1, 1, 1]} : vector<4x16x384xbf16> to vector<4x16x32xbf16>
    "tpu.trace_start"() <{level = 10 : i32, message = "wnd,wmd->wnm"}> : () -> ()
    %cst_14 = arith.constant dense<0.000000e+00> : vector<4x16x16xf32>
    %45 = tpu.matmul %42, %43, %cst_14 {dimension_numbers = #tpu.dot_dimension_numbers<[2], [2], [1], [1], [0, 0, 0, 1, 1, 1], [0], [0]>} : vector<4x16x32xbf16>, vector<4x16x32xbf16>, vector<4x16x16xf32> -> vector<4x16x16xf32>
    "tpu.trace_stop"() : () -> ()
    %cst_15 = arith.constant dense<0xFF800000> : vector<4x16xf32>
    %46 = vector.multi_reduction <maximumf>, %45, %cst_15 [2] : vector<4x16x16xf32> to vector<4x16xf32>
    %47 = vector.shape_cast %46 : vector<4x16xf32> to vector<4x16x1xf32>
    %48 = vector.broadcast %47 : vector<4x16x1xf32> to vector<4x16x16xf32>
    %49 = arith.subf %45, %48 : vector<4x16x16xf32>
    %50 = math.exp %49 : vector<4x16x16xf32>
    %cst_16 = arith.constant dense<0.000000e+00> : vector<4x16xf32>
    %51 = vector.multi_reduction <add>, %50, %cst_16 [2] : vector<4x16x16xf32> to vector<4x16xf32>
    %52 = vector.shape_cast %51 : vector<4x16xf32> to vector<4x16x1xf32>
    %53 = tpu.reciprocal %52 {approx = true} : vector<4x16x1xf32> -> vector<4x16x1xf32>
    %54 = arith.truncf %50 : vector<4x16x16xf32> to vector<4x16x16xbf16>
    "tpu.trace_start"() <{level = 10 : i32, message = "wnm,wmd->wnd"}> : () -> ()
    %cst_17 = arith.constant dense<0.000000e+00> : vector<4x16x32xf32>
    %55 = tpu.matmul %54, %44, %cst_17 {dimension_numbers = #tpu.dot_dimension_numbers<[2], [1], [1], [2], [0, 0, 0, 1, 1, 2], [0], [0]>} : vector<4x16x16xbf16>, vector<4x16x32xbf16>, vector<4x16x32xf32> -> vector<4x16x32xf32>
    "tpu.trace_stop"() : () -> ()
    %56 = vector.broadcast %53 : vector<4x16x1xf32> to vector<4x16x32xf32>
    %57 = arith.mulf %55, %56 : vector<4x16x32xf32>
    %58 = vector.extract_strided_slice %9 {offsets = [0, 0, 96], sizes = [4, 16, 32], strides = [1, 1, 1]} : vector<4x16x384xbf16> to vector<4x16x32xbf16>
    %59 = vector.extract_strided_slice %9 {offsets = [0, 0, 224], sizes = [4, 16, 32], strides = [1, 1, 1]} : vector<4x16x384xbf16> to vector<4x16x32xbf16>
    %60 = vector.extract_strided_slice %9 {offsets = [0, 0, 352], sizes = [4, 16, 32], strides = [1, 1, 1]} : vector<4x16x384xbf16> to vector<4x16x32xbf16>
    "tpu.trace_start"() <{level = 10 : i32, message = "wnd,wmd->wnm"}> : () -> ()
    %cst_18 = arith.constant dense<0.000000e+00> : vector<4x16x16xf32>
    %61 = tpu.matmul %58, %59, %cst_18 {dimension_numbers = #tpu.dot_dimension_numbers<[2], [2], [1], [1], [0, 0, 0, 1, 1, 1], [0], [0]>} : vector<4x16x32xbf16>, vector<4x16x32xbf16>, vector<4x16x16xf32> -> vector<4x16x16xf32>
    "tpu.trace_stop"() : () -> ()
    %cst_19 = arith.constant dense<0xFF800000> : vector<4x16xf32>
    %62 = vector.multi_reduction <maximumf>, %61, %cst_19 [2] : vector<4x16x16xf32> to vector<4x16xf32>
    %63 = vector.shape_cast %62 : vector<4x16xf32> to vector<4x16x1xf32>
    %64 = vector.broadcast %63 : vector<4x16x1xf32> to vector<4x16x16xf32>
    %65 = arith.subf %61, %64 : vector<4x16x16xf32>
    %66 = math.exp %65 : vector<4x16x16xf32>
    %cst_20 = arith.constant dense<0.000000e+00> : vector<4x16xf32>
    %67 = vector.multi_reduction <add>, %66, %cst_20 [2] : vector<4x16x16xf32> to vector<4x16xf32>
    %68 = vector.shape_cast %67 : vector<4x16xf32> to vector<4x16x1xf32>
    %69 = tpu.reciprocal %68 {approx = true} : vector<4x16x1xf32> -> vector<4x16x1xf32>
    %70 = arith.truncf %66 : vector<4x16x16xf32> to vector<4x16x16xbf16>
    "tpu.trace_start"() <{level = 10 : i32, message = "wnm,wmd->wnd"}> : () -> ()
    %cst_21 = arith.constant dense<0.000000e+00> : vector<4x16x32xf32>
    %71 = tpu.matmul %70, %60, %cst_21 {dimension_numbers = #tpu.dot_dimension_numbers<[2], [1], [1], [2], [0, 0, 0, 1, 1, 2], [0], [0]>} : vector<4x16x16xbf16>, vector<4x16x32xbf16>, vector<4x16x32xf32> -> vector<4x16x32xf32>
    "tpu.trace_stop"() : () -> ()
    %72 = vector.broadcast %69 : vector<4x16x1xf32> to vector<4x16x32xf32>
    %73 = arith.mulf %71, %72 : vector<4x16x32xf32>
    %74 = tpu.concatenate %25, %41, %57, %73 in 2 : vector<4x16x32xf32>, vector<4x16x32xf32>, vector<4x16x32xf32>, vector<4x16x32xf32> -> vector<4x16x128xf32>
    %75 = vector.shape_cast %74 : vector<4x16x128xf32> to vector<64x128xf32>
    %76 = arith.truncf %75 : vector<64x128xf32> to vector<64x128xbf16>
    %c0_22 = arith.constant 0 : index
    %c0_23 = arith.constant 0 : index
    %77 = vector.load %arg4[%c0_22, %c0_23] : memref<128x128xbf16, #tpu.memory_space<vmem>>, vector<128x128xbf16>
    %cst_24 = arith.constant dense<0.000000e+00> : vector<64x128xf32>
    %78 = tpu.matmul %76, %77, %cst_24 {dimension_numbers = #tpu.dot_dimension_numbers<[1], [0], [0], [1], [0, 0, 1, 1], [], []>} : vector<64x128xbf16>, vector<128x128xbf16>, vector<64x128xf32> -> vector<64x128xf32>
    %c0_25 = arith.constant 0 : index
    %c0_26 = arith.constant 0 : index
    %79 = vector.load %arg5[%c0_25, %c0_26] : memref<1x128xf32, #tpu.memory_space<vmem>>, vector<1x128xf32>
    %80 = vector.broadcast %79 : vector<1x128xf32> to vector<64x128xf32>
    %81 = arith.addf %78, %80 : vector<64x128xf32>
    %82 = vector.shape_cast %81 : vector<64x128xf32> to vector<4x16x128xf32>
    %83 = arith.addf %82, %0 : vector<4x16x128xf32>
    %c0_27 = arith.constant 0 : index
    %c0_28 = arith.constant 0 : index
    %c0_29 = arith.constant 0 : index
    %84 = vector.load %arg6[%c0_27, %c0_28, %c0_29] : memref<4x16x128xf32, #tpu.memory_space<vmem>>, vector<4x16x128xf32>
    tpu.vector_store %arg6[%c0_27, %c0_28, %c0_29], %83 {strides = array<i32>} : memref<4x16x128xf32, #tpu.memory_space<vmem>>, vector<4x16x128xf32>,
    return
  }
  func.func @transform_0(%arg0: i32) -> (i32, i32, i32) {
    %c0_i32 = arith.constant 0 : i32
    %c0_i32_0 = arith.constant 0 : i32
    %c0_i32_1 = arith.constant 0 : i32
    return %arg0, %c0_i32, %c0_i32_0 : i32, i32, i32
  }
  func.func @transform_1(%arg0: i32) -> (i32, i32) {
    %c0_i32 = arith.constant 0 : i32
    %c0_i32_0 = arith.constant 0 : i32
    %c0_i32_1 = arith.constant 0 : i32
    return %c0_i32, %c0_i32_0 : i32, i32
  }
  func.func @transform_2(%arg0: i32) -> (i32, i32) {
    %c0_i32 = arith.constant 0 : i32
    %c0_i32_0 = arith.constant 0 : i32
    %c0_i32_1 = arith.constant 0 : i32
    return %c0_i32, %c0_i32_0 : i32, i32
  }
  func.func @transform_3(%arg0: i32) -> (i32, i32) {
    %c0_i32 = arith.constant 0 : i32
    %c0_i32_0 = arith.constant 0 : i32
    %c0_i32_1 = arith.constant 0 : i32
    return %c0_i32, %c0_i32_0 : i32, i32
  }
  func.func @transform_4(%arg0: i32) -> (i32, i32) {
    %c0_i32 = arith.constant 0 : i32
    %c0_i32_0 = arith.constant 0 : i32
    %c0_i32_1 = arith.constant 0 : i32
    return %c0_i32, %c0_i32_0 : i32, i32
  }
  func.func @transform_5(%arg0: i32) -> (i32, i32, i32) {
    %c0_i32 = arith.constant 0 : i32
    %c0_i32_0 = arith.constant 0 : i32
    %c0_i32_1 = arith.constant 0 : i32
    return %arg0, %c0_i32, %c0_i32_0 : i32, i32, i32
  }
}

module attributes {stable_mosaic.version = 11 : i64} {
  func.func @_window_attn_kernel(%arg0: i32, %arg1: memref<4x16x128xf32, #tpu.memory_space<vmem>>, %arg2: memref<4x16x16xbf16, #tpu.memory_space<vmem>>, %arg3: memref<128x384xbf16, #tpu.memory_space<vmem>>, %arg4: memref<1x384xf32, #tpu.memory_space<vmem>>, %arg5: memref<128x128xbf16, #tpu.memory_space<vmem>>, %arg6: memref<1x128xf32, #tpu.memory_space<vmem>>, %arg7: memref<4x16x128xf32, #tpu.memory_space<vmem>>) attributes {dimension_semantics = [#tpu.dimension_semantics<parallel>], iteration_bounds = array<i64: 2>, scalar_prefetch = 0 : i64, scratch_operands = 0 : i64, tpu.core_type = #tpu.core_type<tc>, window_params = [{transform_indices = @transform_0, window_bounds = array<i64: 4, 16, 128>}, {transform_indices = @transform_1, window_bounds = array<i64: 4, 16, 16>}, {pipeline_mode = #tpu.pipeline_mode<synchronous>, transform_indices = @transform_2, window_bounds = array<i64: 128, 384>}, {pipeline_mode = #tpu.pipeline_mode<synchronous>, transform_indices = @transform_3, window_bounds = array<i64: 1, 384>}, {pipeline_mode = #tpu.pipeline_mode<synchronous>, transform_indices = @transform_4, window_bounds = array<i64: 128, 128>}, {pipeline_mode = #tpu.pipeline_mode<synchronous>, transform_indices = @transform_5, window_bounds = array<i64: 1, 128>}, {transform_indices = @transform_6, window_bounds = array<i64: 4, 16, 128>}]} {
    %c0 = arith.constant 0 : index
    %c0_0 = arith.constant 0 : index
    %c0_1 = arith.constant 0 : index
    %0 = vector.load %arg1[%c0, %c0_0, %c0_1] : memref<4x16x128xf32, #tpu.memory_space<vmem>>, vector<4x16x128xf32>
    %1 = arith.truncf %0 : vector<4x16x128xf32> to vector<4x16x128xbf16>
    %2 = vector.shape_cast %1 : vector<4x16x128xbf16> to vector<64x128xbf16>
    %c0_2 = arith.constant 0 : index
    %c0_3 = arith.constant 0 : index
    %3 = vector.load %arg3[%c0_2, %c0_3] : memref<128x384xbf16, #tpu.memory_space<vmem>>, vector<128x384xbf16>
    %cst = arith.constant dense<0.000000e+00> : vector<64x384xf32>
    %4 = tpu.matmul %2, %3, %cst {dimension_numbers = #tpu.dot_dimension_numbers<[1], [0], [0], [1], [0, 0, 1, 1], [], []>} : vector<64x128xbf16>, vector<128x384xbf16>, vector<64x384xf32> -> vector<64x384xf32>
    %c0_4 = arith.constant 0 : index
    %c0_5 = arith.constant 0 : index
    %5 = vector.load %arg4[%c0_4, %c0_5] : memref<1x384xf32, #tpu.memory_space<vmem>>, vector<1x384xf32>
    %6 = vector.broadcast %5 : vector<1x384xf32> to vector<64x384xf32>
    %7 = arith.addf %4, %6 : vector<64x384xf32>
    %8 = arith.truncf %7 : vector<64x384xf32> to vector<64x384xbf16>
    %9 = vector.shape_cast %8 : vector<64x384xbf16> to vector<4x16x384xbf16>
    %c0_6 = arith.constant 0 : index
    %c0_7 = arith.constant 0 : index
    %c0_8 = arith.constant 0 : index
    %10 = vector.load %arg2[%c0_6, %c0_7, %c0_8] : memref<4x16x16xbf16, #tpu.memory_space<vmem>>, vector<4x16x16xbf16>
    %11 = arith.extf %10 : vector<4x16x16xbf16> to vector<4x16x16xf32>
    %12 = vector.extract_strided_slice %9 {offsets = [0, 0, 0], sizes = [4, 16, 32], strides = [1, 1, 1]} : vector<4x16x384xbf16> to vector<4x16x32xbf16>
    %13 = vector.extract_strided_slice %9 {offsets = [0, 0, 128], sizes = [4, 16, 32], strides = [1, 1, 1]} : vector<4x16x384xbf16> to vector<4x16x32xbf16>
    %14 = vector.extract_strided_slice %9 {offsets = [0, 0, 256], sizes = [4, 16, 32], strides = [1, 1, 1]} : vector<4x16x384xbf16> to vector<4x16x32xbf16>
    "tpu.trace_start"() <{level = 10 : i32, message = "wnd,wmd->wnm"}> : () -> ()
    %cst_9 = arith.constant dense<0.000000e+00> : vector<4x16x16xf32>
    %15 = tpu.matmul %12, %13, %cst_9 {dimension_numbers = #tpu.dot_dimension_numbers<[2], [2], [1], [1], [0, 0, 0, 1, 1, 1], [0], [0]>} : vector<4x16x32xbf16>, vector<4x16x32xbf16>, vector<4x16x16xf32> -> vector<4x16x16xf32>
    "tpu.trace_stop"() : () -> ()
    %16 = arith.addf %15, %11 : vector<4x16x16xf32>
    %cst_10 = arith.constant dense<0xFF800000> : vector<4x16xf32>
    %17 = vector.multi_reduction <maximumf>, %16, %cst_10 [2] : vector<4x16x16xf32> to vector<4x16xf32>
    %18 = vector.shape_cast %17 : vector<4x16xf32> to vector<4x16x1xf32>
    %19 = vector.broadcast %18 : vector<4x16x1xf32> to vector<4x16x16xf32>
    %20 = arith.subf %16, %19 : vector<4x16x16xf32>
    %21 = math.exp %20 : vector<4x16x16xf32>
    %cst_11 = arith.constant dense<0.000000e+00> : vector<4x16xf32>
    %22 = vector.multi_reduction <add>, %21, %cst_11 [2] : vector<4x16x16xf32> to vector<4x16xf32>
    %23 = vector.shape_cast %22 : vector<4x16xf32> to vector<4x16x1xf32>
    %24 = tpu.reciprocal %23 {approx = true} : vector<4x16x1xf32> -> vector<4x16x1xf32>
    %25 = arith.truncf %21 : vector<4x16x16xf32> to vector<4x16x16xbf16>
    "tpu.trace_start"() <{level = 10 : i32, message = "wnm,wmd->wnd"}> : () -> ()
    %cst_12 = arith.constant dense<0.000000e+00> : vector<4x16x32xf32>
    %26 = tpu.matmul %25, %14, %cst_12 {dimension_numbers = #tpu.dot_dimension_numbers<[2], [1], [1], [2], [0, 0, 0, 1, 1, 2], [0], [0]>} : vector<4x16x16xbf16>, vector<4x16x32xbf16>, vector<4x16x32xf32> -> vector<4x16x32xf32>
    "tpu.trace_stop"() : () -> ()
    %27 = vector.broadcast %24 : vector<4x16x1xf32> to vector<4x16x32xf32>
    %28 = arith.mulf %26, %27 : vector<4x16x32xf32>
    %29 = vector.extract_strided_slice %9 {offsets = [0, 0, 32], sizes = [4, 16, 32], strides = [1, 1, 1]} : vector<4x16x384xbf16> to vector<4x16x32xbf16>
    %30 = vector.extract_strided_slice %9 {offsets = [0, 0, 160], sizes = [4, 16, 32], strides = [1, 1, 1]} : vector<4x16x384xbf16> to vector<4x16x32xbf16>
    %31 = vector.extract_strided_slice %9 {offsets = [0, 0, 288], sizes = [4, 16, 32], strides = [1, 1, 1]} : vector<4x16x384xbf16> to vector<4x16x32xbf16>
    "tpu.trace_start"() <{level = 10 : i32, message = "wnd,wmd->wnm"}> : () -> ()
    %cst_13 = arith.constant dense<0.000000e+00> : vector<4x16x16xf32>
    %32 = tpu.matmul %29, %30, %cst_13 {dimension_numbers = #tpu.dot_dimension_numbers<[2], [2], [1], [1], [0, 0, 0, 1, 1, 1], [0], [0]>} : vector<4x16x32xbf16>, vector<4x16x32xbf16>, vector<4x16x16xf32> -> vector<4x16x16xf32>
    "tpu.trace_stop"() : () -> ()
    %33 = arith.addf %32, %11 : vector<4x16x16xf32>
    %cst_14 = arith.constant dense<0xFF800000> : vector<4x16xf32>
    %34 = vector.multi_reduction <maximumf>, %33, %cst_14 [2] : vector<4x16x16xf32> to vector<4x16xf32>
    %35 = vector.shape_cast %34 : vector<4x16xf32> to vector<4x16x1xf32>
    %36 = vector.broadcast %35 : vector<4x16x1xf32> to vector<4x16x16xf32>
    %37 = arith.subf %33, %36 : vector<4x16x16xf32>
    %38 = math.exp %37 : vector<4x16x16xf32>
    %cst_15 = arith.constant dense<0.000000e+00> : vector<4x16xf32>
    %39 = vector.multi_reduction <add>, %38, %cst_15 [2] : vector<4x16x16xf32> to vector<4x16xf32>
    %40 = vector.shape_cast %39 : vector<4x16xf32> to vector<4x16x1xf32>
    %41 = tpu.reciprocal %40 {approx = true} : vector<4x16x1xf32> -> vector<4x16x1xf32>
    %42 = arith.truncf %38 : vector<4x16x16xf32> to vector<4x16x16xbf16>
    "tpu.trace_start"() <{level = 10 : i32, message = "wnm,wmd->wnd"}> : () -> ()
    %cst_16 = arith.constant dense<0.000000e+00> : vector<4x16x32xf32>
    %43 = tpu.matmul %42, %31, %cst_16 {dimension_numbers = #tpu.dot_dimension_numbers<[2], [1], [1], [2], [0, 0, 0, 1, 1, 2], [0], [0]>} : vector<4x16x16xbf16>, vector<4x16x32xbf16>, vector<4x16x32xf32> -> vector<4x16x32xf32>
    "tpu.trace_stop"() : () -> ()
    %44 = vector.broadcast %41 : vector<4x16x1xf32> to vector<4x16x32xf32>
    %45 = arith.mulf %43, %44 : vector<4x16x32xf32>
    %46 = vector.extract_strided_slice %9 {offsets = [0, 0, 64], sizes = [4, 16, 32], strides = [1, 1, 1]} : vector<4x16x384xbf16> to vector<4x16x32xbf16>
    %47 = vector.extract_strided_slice %9 {offsets = [0, 0, 192], sizes = [4, 16, 32], strides = [1, 1, 1]} : vector<4x16x384xbf16> to vector<4x16x32xbf16>
    %48 = vector.extract_strided_slice %9 {offsets = [0, 0, 320], sizes = [4, 16, 32], strides = [1, 1, 1]} : vector<4x16x384xbf16> to vector<4x16x32xbf16>
    "tpu.trace_start"() <{level = 10 : i32, message = "wnd,wmd->wnm"}> : () -> ()
    %cst_17 = arith.constant dense<0.000000e+00> : vector<4x16x16xf32>
    %49 = tpu.matmul %46, %47, %cst_17 {dimension_numbers = #tpu.dot_dimension_numbers<[2], [2], [1], [1], [0, 0, 0, 1, 1, 1], [0], [0]>} : vector<4x16x32xbf16>, vector<4x16x32xbf16>, vector<4x16x16xf32> -> vector<4x16x16xf32>
    "tpu.trace_stop"() : () -> ()
    %50 = arith.addf %49, %11 : vector<4x16x16xf32>
    %cst_18 = arith.constant dense<0xFF800000> : vector<4x16xf32>
    %51 = vector.multi_reduction <maximumf>, %50, %cst_18 [2] : vector<4x16x16xf32> to vector<4x16xf32>
    %52 = vector.shape_cast %51 : vector<4x16xf32> to vector<4x16x1xf32>
    %53 = vector.broadcast %52 : vector<4x16x1xf32> to vector<4x16x16xf32>
    %54 = arith.subf %50, %53 : vector<4x16x16xf32>
    %55 = math.exp %54 : vector<4x16x16xf32>
    %cst_19 = arith.constant dense<0.000000e+00> : vector<4x16xf32>
    %56 = vector.multi_reduction <add>, %55, %cst_19 [2] : vector<4x16x16xf32> to vector<4x16xf32>
    %57 = vector.shape_cast %56 : vector<4x16xf32> to vector<4x16x1xf32>
    %58 = tpu.reciprocal %57 {approx = true} : vector<4x16x1xf32> -> vector<4x16x1xf32>
    %59 = arith.truncf %55 : vector<4x16x16xf32> to vector<4x16x16xbf16>
    "tpu.trace_start"() <{level = 10 : i32, message = "wnm,wmd->wnd"}> : () -> ()
    %cst_20 = arith.constant dense<0.000000e+00> : vector<4x16x32xf32>
    %60 = tpu.matmul %59, %48, %cst_20 {dimension_numbers = #tpu.dot_dimension_numbers<[2], [1], [1], [2], [0, 0, 0, 1, 1, 2], [0], [0]>} : vector<4x16x16xbf16>, vector<4x16x32xbf16>, vector<4x16x32xf32> -> vector<4x16x32xf32>
    "tpu.trace_stop"() : () -> ()
    %61 = vector.broadcast %58 : vector<4x16x1xf32> to vector<4x16x32xf32>
    %62 = arith.mulf %60, %61 : vector<4x16x32xf32>
    %63 = vector.extract_strided_slice %9 {offsets = [0, 0, 96], sizes = [4, 16, 32], strides = [1, 1, 1]} : vector<4x16x384xbf16> to vector<4x16x32xbf16>
    %64 = vector.extract_strided_slice %9 {offsets = [0, 0, 224], sizes = [4, 16, 32], strides = [1, 1, 1]} : vector<4x16x384xbf16> to vector<4x16x32xbf16>
    %65 = vector.extract_strided_slice %9 {offsets = [0, 0, 352], sizes = [4, 16, 32], strides = [1, 1, 1]} : vector<4x16x384xbf16> to vector<4x16x32xbf16>
    "tpu.trace_start"() <{level = 10 : i32, message = "wnd,wmd->wnm"}> : () -> ()
    %cst_21 = arith.constant dense<0.000000e+00> : vector<4x16x16xf32>
    %66 = tpu.matmul %63, %64, %cst_21 {dimension_numbers = #tpu.dot_dimension_numbers<[2], [2], [1], [1], [0, 0, 0, 1, 1, 1], [0], [0]>} : vector<4x16x32xbf16>, vector<4x16x32xbf16>, vector<4x16x16xf32> -> vector<4x16x16xf32>
    "tpu.trace_stop"() : () -> ()
    %67 = arith.addf %66, %11 : vector<4x16x16xf32>
    %cst_22 = arith.constant dense<0xFF800000> : vector<4x16xf32>
    %68 = vector.multi_reduction <maximumf>, %67, %cst_22 [2] : vector<4x16x16xf32> to vector<4x16xf32>
    %69 = vector.shape_cast %68 : vector<4x16xf32> to vector<4x16x1xf32>
    %70 = vector.broadcast %69 : vector<4x16x1xf32> to vector<4x16x16xf32>
    %71 = arith.subf %67, %70 : vector<4x16x16xf32>
    %72 = math.exp %71 : vector<4x16x16xf32>
    %cst_23 = arith.constant dense<0.000000e+00> : vector<4x16xf32>
    %73 = vector.multi_reduction <add>, %72, %cst_23 [2] : vector<4x16x16xf32> to vector<4x16xf32>
    %74 = vector.shape_cast %73 : vector<4x16xf32> to vector<4x16x1xf32>
    %75 = tpu.reciprocal %74 {approx = true} : vector<4x16x1xf32> -> vector<4x16x1xf32>
    %76 = arith.truncf %72 : vector<4x16x16xf32> to vector<4x16x16xbf16>
    "tpu.trace_start"() <{level = 10 : i32, message = "wnm,wmd->wnd"}> : () -> ()
    %cst_24 = arith.constant dense<0.000000e+00> : vector<4x16x32xf32>
    %77 = tpu.matmul %76, %65, %cst_24 {dimension_numbers = #tpu.dot_dimension_numbers<[2], [1], [1], [2], [0, 0, 0, 1, 1, 2], [0], [0]>} : vector<4x16x16xbf16>, vector<4x16x32xbf16>, vector<4x16x32xf32> -> vector<4x16x32xf32>
    "tpu.trace_stop"() : () -> ()
    %78 = vector.broadcast %75 : vector<4x16x1xf32> to vector<4x16x32xf32>
    %79 = arith.mulf %77, %78 : vector<4x16x32xf32>
    %80 = tpu.concatenate %28, %45, %62, %79 in 2 : vector<4x16x32xf32>, vector<4x16x32xf32>, vector<4x16x32xf32>, vector<4x16x32xf32> -> vector<4x16x128xf32>
    %81 = vector.shape_cast %80 : vector<4x16x128xf32> to vector<64x128xf32>
    %82 = arith.truncf %81 : vector<64x128xf32> to vector<64x128xbf16>
    %c0_25 = arith.constant 0 : index
    %c0_26 = arith.constant 0 : index
    %83 = vector.load %arg5[%c0_25, %c0_26] : memref<128x128xbf16, #tpu.memory_space<vmem>>, vector<128x128xbf16>
    %cst_27 = arith.constant dense<0.000000e+00> : vector<64x128xf32>
    %84 = tpu.matmul %82, %83, %cst_27 {dimension_numbers = #tpu.dot_dimension_numbers<[1], [0], [0], [1], [0, 0, 1, 1], [], []>} : vector<64x128xbf16>, vector<128x128xbf16>, vector<64x128xf32> -> vector<64x128xf32>
    %c0_28 = arith.constant 0 : index
    %c0_29 = arith.constant 0 : index
    %85 = vector.load %arg6[%c0_28, %c0_29] : memref<1x128xf32, #tpu.memory_space<vmem>>, vector<1x128xf32>
    %86 = vector.broadcast %85 : vector<1x128xf32> to vector<64x128xf32>
    %87 = arith.addf %84, %86 : vector<64x128xf32>
    %88 = vector.shape_cast %87 : vector<64x128xf32> to vector<4x16x128xf32>
    %89 = arith.addf %88, %0 : vector<4x16x128xf32>
    %c0_30 = arith.constant 0 : index
    %c0_31 = arith.constant 0 : index
    %c0_32 = arith.constant 0 : index
    %90 = vector.load %arg7[%c0_30, %c0_31, %c0_32] : memref<4x16x128xf32, #tpu.memory_space<vmem>>, vector<4x16x128xf32>
    tpu.vector_store %arg7[%c0_30, %c0_31, %c0_32], %89 {strides = array<i32>} : memref<4x16x128xf32, #tpu.memory_space<vmem>>, vector<4x16x128xf32>,
    return
  }
  func.func @transform_0(%arg0: i32) -> (i32, i32, i32) {
    %c0_i32 = arith.constant 0 : i32
    %c0_i32_0 = arith.constant 0 : i32
    %c0_i32_1 = arith.constant 0 : i32
    return %arg0, %c0_i32, %c0_i32_0 : i32, i32, i32
  }
  func.func @transform_1(%arg0: i32) -> (i32, i32, i32) {
    %c1_i32 = arith.constant 1 : i32
    %c0_i32 = arith.constant 0 : i32
    %0 = arith.cmpi eq, %c1_i32, %c0_i32 : i32
    %c1_i32_0 = arith.constant 1 : i32
    %1 = arith.select %0, %c1_i32_0, %c1_i32 : i32
    %2 = arith.remsi %arg0, %1 : i32
    %c0_i32_1 = arith.constant 0 : i32
    %3 = arith.cmpi ne, %2, %c0_i32_1 : i32
    %c0_i32_2 = arith.constant 0 : i32
    %4 = arith.cmpi slt, %2, %c0_i32_2 : i32
    %c0_i32_3 = arith.constant 0 : i32
    %5 = arith.cmpi slt, %1, %c0_i32_3 : i32
    %6 = arith.xori %4, %5 : i1
    %7 = arith.andi %6, %3 : i1
    %8 = arith.addi %2, %1 : i32
    %9 = arith.select %7, %8, %2 : i32
    %c0_i32_4 = arith.constant 0 : i32
    %c0_i32_5 = arith.constant 0 : i32
    %c0_i32_6 = arith.constant 0 : i32
    return %9, %c0_i32_4, %c0_i32_5 : i32, i32, i32
  }
  func.func @transform_2(%arg0: i32) -> (i32, i32) {
    %c0_i32 = arith.constant 0 : i32
    %c0_i32_0 = arith.constant 0 : i32
    %c0_i32_1 = arith.constant 0 : i32
    return %c0_i32, %c0_i32_0 : i32, i32
  }
  func.func @transform_3(%arg0: i32) -> (i32, i32) {
    %c0_i32 = arith.constant 0 : i32
    %c0_i32_0 = arith.constant 0 : i32
    %c0_i32_1 = arith.constant 0 : i32
    return %c0_i32, %c0_i32_0 : i32, i32
  }
  func.func @transform_4(%arg0: i32) -> (i32, i32) {
    %c0_i32 = arith.constant 0 : i32
    %c0_i32_0 = arith.constant 0 : i32
    %c0_i32_1 = arith.constant 0 : i32
    return %c0_i32, %c0_i32_0 : i32, i32
  }
  func.func @transform_5(%arg0: i32) -> (i32, i32) {
    %c0_i32 = arith.constant 0 : i32
    %c0_i32_0 = arith.constant 0 : i32
    %c0_i32_1 = arith.constant 0 : i32
    return %c0_i32, %c0_i32_0 : i32, i32
  }
  func.func @transform_6(%arg0: i32) -> (i32, i32, i32) {
    %c0_i32 = arith.constant 0 : i32
    %c0_i32_0 = arith.constant 0 : i32
    %c0_i32_1 = arith.constant 0 : i32
    return %arg0, %c0_i32, %c0_i32_0 : i32, i32, i32
  }
}

</mosaic_0001>

<bundles_post_ra>
// kernel: rstb_forward.2
= control target key start
LH: loop header
LB: loop body
LE: loop exit
PB: predicated region body
PF: predicated region fallthrough
CT: control target
= control target key end

     0   :  { %10 = vsyncpa [#allocation3], 0  ;;  %s2671_s18 = smov 0   ;;  %s3540_s0 = inlined_call_operand.vmem [shape: f32[8,16,128], index: 0, kind: input, shape index: {}]   ;;  %s3541_s1 = inlined_call_operand.vmem [shape: bf16[128,384], index: 1, kind: input, shape index: {}]   ;;  %s3542_s2 = inlined_call_operand.hbm [shape: f32[1,384], index: 2, kind: input, shape index: {}]   ;;  %s3543_s3 = inlined_call_operand.vmem [shape: bf16[128,128], index: 3, kind: input, shape index: {}]   ;;  %s3544_s4 = inlined_call_operand.vmem [shape: f32[1,128], index: 4, kind: input, shape index: {}]   ;;  %s3545_s5 = inlined_call_operand.vmem [shape: f32[8,16,128], index: 5, kind: output, shape index: {}]  }
   0x1 LB: > { %s2159_s19 = sadd.s32 4294967295, %s2635_s18   ;;  %p2161_p0 = scmp.ge.s32.totalorder %s2635_s18, 1  ;;  %s2635_s18 = sphi %s2671_s18, %s16_s18  }
   0x2   : > { %p157_p1 = scmp.lt.s32.totalorder %s2635_s18, 3  ;;  %s172_s22 = sshll.u32 %s3542_s2, 4  ;;  %s173_s22 = int_to_ptr.hbm [resolvable:$true] %s172_s22 }
   0x3   : > { %p2384_p3 = scmp.eq.s32.totalorder %s2159_s19, 0  ;;  %s2637_s23 = smov [#allocation2]  }
   0x4   : > { %p158_p2 = pnand %p2161_p0, %p157_p1  ;;  %s174_s24 = sshll.u32 %s2637_s23, 4  ;;  %s175_s24 = int_to_ptr.vmem [resolvable:$true] %s174_s24 }
   0x6   : > { %p2380_p4 = pneg %p158_p2  ;;  %203 = sbr.rel (%p158_p2) target bundleno = 2016 (0x7e0), region = 40 }
   0x8   : > { %p2381_p5 = pnand %p2384_p3, %p2380_p4 }
   0xa   : > { %2383 = dma.hbm_to_vmem [thread:$0]  (!%p2381_p5), %s173_s22, 48, %s175_s24, [#allocation3]  }
   0xb   : > { %2630 = dma.done.wait (%p2384_p3), [#allocation3], 48  }
   0xc   : > { %2632 = vsyncadd (%p2384_p3), [#allocation3], 4294967248  ;;  %v2258_v0 = vld [vmem:[%s3541_s1 + $0xa8] sm:$0xf]  ;;  %v2358_v1 = vld [vmem:[%s3541_s1 + $0xb0] sm:$0xf0] }
   0xd   : > { %v2357_v2 = vld [vmem:[%s3541_s1 + $0xac] sm:$0xf]  ;;  %v2259_v3 = vor.u32 %v2358_v1, %v2258_v0  ;;  %v2260_v4 = vld [vmem:[%s3541_s1 + $0xb4] sm:$0xf0]  ;;  %v2246_v5 = vld [vmem:[%s3541_s1 + $0x90] sm:$0xf] }
   0xe   : > { %v2355_v6 = vld [vmem:[%s3541_s1 + $0x98] sm:$0xf0]  ;;  %v2263_v7 = vor.u32 %v2357_v2, %v2260_v4  ;;  %v2354_v8 = vld [vmem:[%s3541_s1 + $0x94] sm:$0xf]  ;;  %v2248_v9 = vld [vmem:[%s3541_s1 + $0x9c] sm:$0xf0] }
   0xf   : > { %s2166_s16 = sshll.u32 %s2159_s19, 2  ;;  %457 = vmatpush.bf16.msra.mxu0 %v2259_v3  ;;  %v2247_v10 = vor.u32 %v2355_v6, %v2246_v5  ;;  %v2251_v11 = vor.u32 %v2354_v8, %v2248_v9  ;;  %v2234_v12 = vld [vmem:[%s3541_s1 + $0x78] sm:$0xf]  ;;  %v2352_v13 = vld [vmem:[%s3541_s1 + $0x80] sm:$0xf0]  ;;  %s2638_s12 = smov 96  }
  0x10   : > { %486 = vmatpush.bf16.msra.mxu1 %v2263_v7  ;;  %v2351_v14 = vld [vmem:[%s3541_s1 + $0x7c] sm:$0xf]  ;;  %v2236_v15 = vld [vmem:[%s3541_s1 + $0x84] sm:$0xf0]  ;;  %p235_p6 = scmp.lt.s32.totalorder %s2166_s16, 7  ;;  %v2235_v16 = vor.u32 %v2352_v13, %v2234_v12  ;;  %vm570_vm0 = vcmask 261120  }
  0x11   : > { %v2239_v17 = vor.u32 %v2351_v14, %v2236_v15  ;;  %v2222_v18 = vld [vmem:[%s3541_s1 + $0x60] sm:$0xf]  ;;  %v2349_v19 = vld [vmem:[%s3541_s1 + $0x68] sm:$0xf0]  ;;  %v2348_v20 = vld [vmem:[%s3541_s1 + $0x64] sm:$0xf] }
  0x12   : > { %v2224_v21 = vld [vmem:[%s3541_s1 + $0x6c] sm:$0xf0]  ;;  %s3547_s16 = smov (!%p235_p6, %s2166_s16), 7  ;;  %v2223_v22 = vor.u32 %v2349_v19, %v2222_v18  ;;  %v2210_v24 = vld [vmem:[%s3541_s1 + $0x48] sm:$0xf]  ;;  %vm681_vm1 = vcmask 130048  }
  0x13   : > { %458 = vmatpush.bf16.msra.mxu0 %v2247_v10  ;;  %v2227_v23 = vor.u32 %v2348_v20, %v2224_v21  ;;  %v2346_v25 = vld [vmem:[%s3541_s1 + $0x50] sm:$0xf0]  ;;  %v2345_v26 = vld [vmem:[%s3541_s1 + $0x4c] sm:$0xf]  ;;  %v2212_v27 = vld [vmem:[%s3541_s1 + $0x54] sm:$0xf0] }
  0x14   : > { %487 = vmatpush.bf16.msra.mxu1 %v2251_v11  ;;  %s2334_s20 = sshll.u32 %s3547_s16, 4  ;;  %v2211_v28 = vor.u32 %v2346_v25, %v2210_v24  ;;  %v2215_v29 = vor.u32 %v2345_v26, %v2212_v27  ;;  %v2198_v30 = vld [vmem:[%s3541_s1 + $0x30] sm:$0xf]  ;;  %v2343_v31 = vld [vmem:[%s3541_s1 + $0x38] sm:$0xf0]  ;;  %s2639_s13 = smov 64  }
  0x15   : > { %s2756_s19 = scalar_lea.vmem %s3540_s0, %s2334_s20  ;;  %v2342_v32 = vld [vmem:[%s3541_s1 + $0x34] sm:$0xf]  ;;  %v2200_v33 = vld [vmem:[%s3541_s1 + $0x3c] sm:$0xf0]  ;;  %v2199_v34 = vor.u32 %v2343_v31, %v2198_v30  ;;  %v2186_v38 = vld [vmem:[%s3541_s1 + $0x18] sm:$0xf] }
  0x16   : > { %v249_v35 = vld [vmem:[%s2756_s19] sm:$0xff]  ;;  %v250_v36 = vld [vmem:[%s2756_s19 + $0x8] sm:$0xff]  ;;  %v2203_v37 = vor.u32 %v2342_v32, %v2200_v33  ;;  %v2339_v40 = vld [vmem:[%s3541_s1 + $0x1c] sm:$0xf]  ;;  %s2640_s14 = smov 32   ;;  %vm1954_vm2 = vcmask 523264  }
  0x17   : > { %459 = vmatpush.bf16.msra.mxu0 %v2235_v16  ;;  %v2340_v39 = vld [vmem:[%s3541_s1 + $0x20] sm:$0xf0]  ;;  %v2188_v41 = vld [vmem:[%s3541_s1 + $0x24] sm:$0xf0]  ;;  %v257_v42 = vpack.c.bf16 %v249_v35, %v249_v35  ;;  %v258_v43 = vpack.c.bf16 %v250_v36, %v250_v36  ;;  %v2174_v46 = vld [vmem:[%s3541_s1] sm:$0xf] }
  0x18   : > { %488 = vmatpush.bf16.msra.mxu1 %v2239_v17  ;;  %v2187_v44 = vor.u32 %v2340_v39, %v2186_v38  ;;  %v2191_v45 = vor.u32 %v2339_v40, %v2188_v41  ;;  %v2337_v47 = vld [vmem:[%s3541_s1 + $0x8] sm:$0xf0]  ;;  %v2336_v48 = vld [vmem:[%s3541_s1 + $0x4] sm:$0xf]  ;;  %v2176_v49 = vld [vmem:[%s3541_s1 + $0xc] sm:$0xf0] }
  0x19   : > { %v313_v50 = vunpack.c.l.b16 %v257_v42  ;;  %v314_v51 = vunpack.c.l.b16 %v258_v43  ;;  %v2175_v52 = vor.u32 %v2337_v47, %v2174_v46  ;;  %v2179_v53 = vor.u32 %v2336_v48, %v2176_v49  ;;  %v2266_v55 = vld [vmem:[%s3541_s1 + $0xb0] sm:$0xf]  ;;  %v2359_v56 = vld [vmem:[%s3541_s1 + $0xb8] sm:$0xf0]  ;;  %v2254_v60 = vld [vmem:[%s3541_s1 + $0x98] sm:$0xf] }
  0x1a   : > { %v2267_v57 = vor.u32 %v2359_v56, %v2266_v55  ;;  %v251_v58 = vld [vmem:[%s2756_s19 + $0x10] sm:$0xff]  ;;  %v252_v59 = vld [vmem:[%s2756_s19 + $0x18] sm:$0xff]  ;;  %v2356_v61 = vld [vmem:[%s3541_s1 + $0xa0] sm:$0xf0]  ;;  %vm1963_vm3 = vcmask 785408  }
  0x1b   : > { %460 = vmatpush.bf16.msra.mxu0 %v2223_v22  ;;  %v321_v54 = vpack.c.b16 %v314_v51, %v313_v50  ;;  %v2255_v62 = vor.u32 %v2356_v61, %v2254_v60  ;;  %v2242_v63 = vld [vmem:[%s3541_s1 + $0x80] sm:$0xf]  ;;  %v2353_v0 = vld [vmem:[%s3541_s1 + $0x88] sm:$0xf0]  ;;  %v259_v1 = vpack.c.bf16 %v251_v58, %v251_v58  ;;  %v260_v2 = vpack.c.bf16 %v252_v59, %v252_v59  ;;  %v2230_v4 = vld [vmem:[%s3541_s1 + $0x68] sm:$0xf] }
  0x1c   : > { %489 = vmatpush.bf16.msra.mxu1 %v2227_v23  ;;  %515 = vmatpush.bf16.msra.mxu2 %v2267_v57  ;;  %v2243_v3 = vor.u32 %v2353_v0, %v2242_v63  ;;  %v2350_v5 = vld [vmem:[%s3541_s1 + $0x70] sm:$0xf0]  ;;  %v2218_v10 = vld [vmem:[%s3541_s1 + $0x50] sm:$0xf]  ;;  %v2347_v11 = vld [vmem:[%s3541_s1 + $0x58] sm:$0xf0] }
  0x1d   : > { %v315_v6 = vunpack.c.l.b16 %v259_v1  ;;  %v316_v7 = vunpack.c.l.b16 %v260_v2  ;;  %v2231_v8 = vor.u32 %v2350_v5, %v2230_v4  ;;  %v2219_v12 = vor.u32 %v2347_v11, %v2218_v10  ;;  %v253_v13 = vld [vmem:[%s2756_s19 + $0x20] sm:$0xff]  ;;  %v254_v14 = vld [vmem:[%s2756_s19 + $0x28] sm:$0xff]  ;;  %v2206_v15 = vld [vmem:[%s3541_s1 + $0x38] sm:$0xf] }
  0x1e   : > { %v2344_v16 = vld [vmem:[%s3541_s1 + $0x40] sm:$0xf0]  ;;  %v2194_v18 = vld [vmem:[%s3541_s1 + $0x20] sm:$0xf]  ;;  %v2341_v19 = vld [vmem:[%s3541_s1 + $0x28] sm:$0xf0]  ;;  %v261_v20 = vpack.c.bf16 %v253_v13, %v253_v13  ;;  %v262_v21 = vpack.c.bf16 %v254_v14, %v254_v14 }
  0x1f   : > { %461 = vmatpush.bf16.msra.mxu0 %v2211_v28  ;;  %v322_v9 = vpack.c.b16 %v316_v7, %v315_v6  ;;  %v2207_v17 = vor.u32 %v2344_v16, %v2206_v15  ;;  %v2195_v22 = vor.u32 %v2341_v19, %v2194_v18  ;;  %v2182_v23 = vld [vmem:[%s3541_s1 + $0x8] sm:$0xf]  ;;  %v2338_v24 = vld [vmem:[%s3541_s1 + $0x10] sm:$0xf0]  ;;  %v256_v30 = vld [vmem:[%s2756_s19 + $0x38] sm:$0xff] }
  0x20   : > { %490 = vmatpush.bf16.msra.mxu1 %v2215_v29  ;;  %516 = vmatpush.bf16.msra.mxu2 %v2255_v62  ;;  %v317_v25 = vunpack.c.l.b16 %v261_v20  ;;  %v318_v26 = vunpack.c.l.b16 %v262_v21  ;;  %v2183_v27 = vor.u32 %v2338_v24, %v2182_v23  ;;  %v255_v29 = vld [vmem:[%s2756_s19 + $0x30] sm:$0xff]  ;;  %v264_v32 = vpack.c.bf16 %v256_v30, %v256_v30  ;;  %v2844_v36 = vld [vmem:[#allocation2] sm:$0x7] }
  0x21   : > { %v263_v31 = vpack.c.bf16 %v255_v29, %v255_v29  ;;  %v2850_v38 = vperm.slane %v2844_v36, 1 }
  0x22   : > { %v323_v28 = vpack.c.b16 %v318_v26, %v317_v25 }
  0x23   : > { %462 = vmatpush.bf16.msra.mxu0 %v2199_v34  ;;  %v319_v33 = vunpack.c.l.b16 %v263_v31  ;;  %v320_v34 = vunpack.c.l.b16 %v264_v32 }
  0x24   : > { %491 = vmatpush.bf16.msra.mxu1 %v2203_v37  ;;  %517 = vmatpush.bf16.msra.mxu2 %v2243_v3  ;;  %v2847_v37 = vperm.slane %v2844_v36, 0 }
  0x25   : > { %v324_v35 = vpack.c.b16 %v320_v34, %v319_v33 }
  0x27   : > { %463 = vmatpush.bf16.msra.mxu0 %v2187_v44 }
  0x28   : > { %492 = vmatpush.bf16.msra.mxu1 %v2191_v45  ;;  %518 = vmatpush.bf16.msra.mxu2 %v2231_v8 }
  0x2b   : > { %464 = vmatpush.bf16.msra.mxu0 %v2175_v52 }
  0x2c   : > { %493 = vmatpush.bf16.msra.mxu1 %v2179_v53  ;;  %519 = vmatpush.bf16.msra.mxu2 %v2219_v12 }
  0x2e   : > { %465 = vmatmul.bf16.vlgmr.msra.gmra.mxu0 %v321_v54 }
  0x2f   : > { %494 = vmatmul.bf16.vlgmr.msra.gmra.mxu1 %v321_v54 }
  0x30   : > { %520 = vmatpush.bf16.msra.mxu2 %v2207_v17 }
  0x34   : > { %521 = vmatpush.bf16.msra.mxu2 %v2195_v22 }
  0x38   : > { %522 = vmatpush.bf16.msra.mxu2 %v2183_v27 }
  0x3b   : > { %523 = vmatmul.bf16.vlgmr.msra.gmra.mxu2 %v321_v54 }
  0x3e   : > { %470 = vmatmul.bf16.gmra.mxu0 %v322_v9 }
  0x3f   : > { %499 = vmatmul.bf16.gmra.mxu1 %v322_v9 }
  0x4b   : > { %528 = vmatmul.bf16.gmra.mxu2 %v322_v9 }
  0x4e   : > { %475 = vmatmul.bf16.gmra.mxu0 %v323_v28 }
  0x4f   : > { %504 = vmatmul.bf16.gmra.mxu1 %v323_v28 }
  0x5b   : > { %533 = vmatmul.bf16.gmra.mxu2 %v323_v28 }
  0x5e   : > { %480 = vmatmul.bf16.gmra.mxu0 %v324_v35 }
  0x5f   : > { %509 = vmatmul.bf16.gmra.mxu1 %v324_v35 }
  0x6b   : > { %538 = vmatmul.bf16.gmra.mxu2 %v324_v35 }
  0xab   : > { %v466_v39 = vpop.f32.mrf.mxu0 }
  0xac   : > { %v467_v40 = vadd.f32 %v466_v39, %v2847_v37  ;;  %v495_v41 = vpop.f32.mrf.mxu1  ;;  %v301_v39 = vperm.slane %v2844_v36, 2 }
  0xad   : > { %v496_v42 = vadd.f32 %v495_v41, %v2850_v38 }
  0xaf   : > { %v2854_v43 = vpack.c.bf16 %v496_v42, %v467_v40 }
  0xb1   : > { %890 = vrot.lane.b32.xlu2 %v2854_v43, %s2638_s12  ;;  %v562_v49 = vrot.slane %v2854_v43, 4  ;;  %v564_v59 = vunpack.c.l.b16 %v2854_v43 }
  0xb3   : > { %v468_v44 = vpop.f32.mrf.mxu0  ;;  %v567_v52 = vunpack.c.l.b16 %v562_v49 }
  0xb4   : > { %v469_v45 = vadd.f32 %v468_v44, %v2847_v37  ;;  %v497_v46 = vpop.f32.mrf.mxu1 }
  0xb5   : > { %v498_v47 = vadd.f32 %v497_v46, %v2850_v38 }
  0xb7   : > { %v2860_v48 = vpack.c.bf16 %v498_v47, %v469_v45 }
  0xb9   : > { %892 = vrot.lane.b32.xlu0 %v2860_v48, %s2638_s12  ;;  %v563_v50 = vrot.slane %v2860_v48, 4  ;;  %v565_v54 = vunpack.c.l.b16 %v2860_v48 }
  0xbb   : > { %v471_v51 = vpop.f32.mrf.mxu0  ;;  %v568_v53 = vunpack.c.l.b16 %v563_v50  ;;  %v2873_v62 = vpack.c.b16 %v565_v54, %v564_v59 }
  0xbc   : > { %v472_v55 = vadd.f32 %v471_v51, %v2847_v37  ;;  %v500_v56 = vpop.f32.mrf.mxu1 }
  0xbd   : > { %v501_v57 = vadd.f32 %v500_v56, %v2850_v38  ;;  %v569_v58 = vpack.c.b16 %v568_v53, %v567_v52 }
  0xbe   : > { %v524_v15 = vpop.f32.mrf.mxu2 }
  0xbf   : > { %v2870_v60 = vpack.c.bf16 %v501_v57, %v472_v55  ;;  %v575_v61 = vsel %vm570_vm0, %v569_v58, 0  ;;  %v525_v45 = vadd.f32 %v524_v15, %v301_v39 }
  0xc0   : > { %584 = vmatpush.bf16.xpose.msrb.mxu0 %v575_v61 }
  0xc1   : > { %921 = vrot.lane.b32.xlu1 %v2870_v60, %s2638_s12  ;;  %896 = vrot.lane.b32.xlu0 %v2873_v62, %s2638_s12  ;;  %v593_v4 = vrot.slane %v2870_v60, 4  ;;  %v595_v18 = vunpack.c.l.b16 %v2870_v60  ;;  %v545_v53 = vpack.c.bf16 %v525_v45, %v525_v45 }
  0xc3   : > { %v473_v63 = vpop.f32.mrf.mxu0  ;;  %v598_v7 = vunpack.c.l.b16 %v593_v4  ;;  %v777_v61 = vunpack.c.l.b16 %v545_v53 }
  0xc4   : > { %v474_v0 = vadd.f32 %v473_v63, %v2847_v37  ;;  %v502_v1 = vpop.f32.mrf.mxu1 }
  0xc5   : > { %v503_v2 = vadd.f32 %v502_v1, %v2850_v38 }
  0xc6   : > { %v526_v26 = vpop.f32.mrf.mxu2 }
  0xc7   : > { %v2881_v3 = vpack.c.bf16 %v503_v2, %v474_v0  ;;  %2268 = vmatmul.msk.bf16.vlgmr.msrb.gmra.mxu0 %vm570_vm0, %v2873_v62  ;;  %v527_v46 = vadd.f32 %v526_v26, %v301_v39 }
  0xc9   : > { %923 = vrot.lane.b32.xlu2 %v2881_v3, %s2638_s12  ;;  %v594_v5 = vrot.slane %v2881_v3, 4  ;;  %v596_v14 = vunpack.c.l.b16 %v2881_v3  ;;  %v547_v54 = vpack.c.bf16 %v527_v46, %v527_v46 }
  0xcb   : > { %v476_v6 = vpop.f32.mrf.mxu0  ;;  %v599_v8 = vunpack.c.l.b16 %v594_v5  ;;  %v2898_v22 = vpack.c.b16 %v596_v14, %v595_v18 }
  0xcc   : > { %v505_v9 = vpop.f32.mrf.mxu1  ;;  %v477_v11 = vadd.f32 %v476_v6, %v2847_v37 }
  0xcd   : > { %v600_v10 = vpack.c.b16 %v599_v8, %v598_v7  ;;  %v506_v12 = vadd.f32 %v505_v9, %v2850_v38 }
  0xce   : > { %v529_v40 = vpop.f32.mrf.mxu2 }
  0xcf   : > { %v605_v13 = vsel %vm570_vm0, %v600_v10, 0  ;;  %v2893_v16 = vpack.c.bf16 %v506_v12, %v477_v11  ;;  %v530_v55 = vadd.f32 %v529_v40, %v301_v39 }
  0xd0   : > { %614 = vmatpush.bf16.xpose.msra.mxu3 %v605_v13 }
  0xd1   : > { %v623_v24 = vrot.slane %v2893_v16, 4  ;;  %v625_v44 = vunpack.c.l.b16 %v2893_v16  ;;  %v549_v63 = vpack.c.bf16 %v530_v55, %v530_v55 }
  0xd3   : > { %v478_v17 = vpop.f32.mrf.mxu0  ;;  %v628_v28 = vunpack.c.l.b16 %v623_v24  ;;  %v805_v5 = vunpack.c.l.b16 %v549_v63 }
  0xd4   : > { %v479_v19 = vadd.f32 %v478_v17, %v2847_v37  ;;  %v507_v20 = vpop.f32.mrf.mxu1 }
  0xd5   : > { %v508_v21 = vadd.f32 %v507_v20, %v2850_v38 }
  0xd6   : > { %v531_v57 = vpop.f32.mrf.mxu2 }
  0xd7   : > { %v2900_v23 = vpack.c.bf16 %v508_v21, %v479_v19  ;;  %2269 = vmatmul.msk.bf16.vlgmr.msra.gmra.mxu3 %vm570_vm0, %v2898_v22  ;;  %v532_v58 = vadd.f32 %v531_v57, %v301_v39 }
  0xd9   : > { %v624_v25 = vrot.slane %v2900_v23, 4  ;;  %v626_v35 = vunpack.c.l.b16 %v2900_v23  ;;  %v551_v0 = vpack.c.bf16 %v532_v58, %v532_v58 }
  0xdb   : > { %v481_v27 = vpop.f32.mrf.mxu0  ;;  %v629_v29 = vunpack.c.l.b16 %v624_v25  ;;  %v2916_v51 = vpack.c.b16 %v626_v35, %v625_v44  ;;  %v806_v6 = vunpack.c.l.b16 %v551_v0 }
  0xdc   : > { %v510_v30 = vpop.f32.mrf.mxu1  ;;  %v482_v32 = vadd.f32 %v481_v27, %v2847_v37 }
  0xdd   : > { %v630_v31 = vpack.c.b16 %v629_v29, %v628_v28  ;;  %v511_v33 = vadd.f32 %v510_v30, %v2850_v38  ;;  %v2930_v10 = vpack.c.b16 %v806_v6, %v805_v5 }
  0xde   : > { %v534_v8 = vpop.f32.mrf.mxu2 }
  0xdf   : > { %v635_v34 = vsel %vm570_vm0, %v630_v31, 0  ;;  %v2911_v41 = vpack.c.bf16 %v511_v33, %v482_v32  ;;  %v535_v11 = vadd.f32 %v534_v8, %v301_v39 }
  0xe0   : > { %644 = vmatpush.bf16.xpose.msrb.mxu3 %v635_v34 }
  0xe1   : > { %v653_v36 = vrot.slane %v2911_v41, 4  ;;  %v655_v9 = vunpack.c.l.b16 %v2911_v41  ;;  %v553_v13 = vpack.c.bf16 %v535_v11, %v535_v11 }
  0xe3   : > { %v483_v42 = vpop.f32.mrf.mxu0  ;;  %v833_v17 = vunpack.c.l.b16 %v553_v13 }
  0xe4   : > { %v484_v47 = vadd.f32 %v483_v42, %v2847_v37  ;;  %v512_v49 = vpop.f32.mrf.mxu1  ;;  %v658_v37 = vunpack.c.l.b16 %v653_v36 }
  0xe5   : > { %v513_v50 = vadd.f32 %v512_v49, %v2850_v38  ;;  %v778_v38 = vunpack.c.l.b16 %v547_v54 }
  0xe6   : > { %v536_v14 = vpop.f32.mrf.mxu2 }
  0xe7   : > { %v2918_v52 = vpack.c.bf16 %v513_v50, %v484_v47  ;;  %2270 = vmatmul.msk.bf16.vlgmr.msrb.gmra.mxu3 %vm570_vm0, %v2916_v51  ;;  %v2925_v4 = vpack.c.b16 %v778_v38, %v777_v61  ;;  %v537_v15 = vadd.f32 %v536_v14, %v301_v39 }
  0xe9   : > { %v654_v56 = vrot.slane %v2918_v52, 4  ;;  %v656_v7 = vunpack.c.l.b16 %v2918_v52  ;;  %v555_v18 = vpack.c.bf16 %v537_v15, %v537_v15 }
  0xeb   : > { %v659_v59 = vunpack.c.l.b16 %v654_v56  ;;  %v2932_v12 = vpack.c.b16 %v656_v7, %v655_v9  ;;  %v834_v19 = vunpack.c.l.b16 %v555_v18 }
  0xed   : > { %v660_v1 = vpack.c.b16 %v659_v59, %v658_v37  ;;  %v2937_v20 = vpack.c.b16 %v834_v19, %v833_v17 }
  0xee   : > { %v539_v21 = vpop.f32.mrf.mxu2 }
  0xef   : > { %v665_v2 = vsel %vm570_vm0, %v660_v1, 0  ;;  %847 = vmatpush.bf16.msra.mxu0 %v2937_v20  ;;  %v540_v24 = vadd.f32 %v539_v21, %v301_v39 }
  0xf0   : > { %674 = vmatpush.bf16.xpose.msra.mxu3 %v665_v2 }
  0xf1   : > { %v557_v25 = vpack.c.bf16 %v540_v24, %v540_v24 }
  0xf3   : > { %v861_v28 = vunpack.c.l.b16 %v557_v25 }
  0xf6   : > { %v541_v26 = vpop.f32.mrf.mxu2 }
  0xf7   : > { %2271 = vmatmul.msk.bf16.vlgmr.msra.gmra.mxu3 %vm570_vm0, %v2932_v12  ;;  %v542_v27 = vadd.f32 %v541_v26, %v301_v39 }
  0xf8   : > { %791 = vmatpush.bf16.msrb.mxu3 %v2925_v4 }
  0xf9   : > { %v559_v29 = vpack.c.bf16 %v542_v27, %v542_v27 }
  0xfb   : > { %v862_v30 = vunpack.c.l.b16 %v559_v29 }
  0xfc   : > { %819 = vmatpush.bf16.msra.mxu3 %v2930_v10 }
  0xfd   : > { %v2940_v31 = vpack.c.b16 %v862_v30, %v861_v28 }
  0xff   : > { %875 = vmatpush.bf16.msrb.mxu1 %v2940_v31 }
 0x10b   : > { %v891_v32 = vpop.permute.xlu2 %890 }
 0x10c   : > { %v894_v33 = vrot.slane %v891_v32, 4 }
 0x10e   : > { %v898_v40 = vunpack.c.l.b16 %v894_v33 }
 0x123   : > { %v924_v9 = vpop.permute.xlu2 %923 }
 0x124   : > { %v926_v14 = vrot.slane %v924_v9, 4 }
 0x126   : > { %v930_v19 = vunpack.c.l.b16 %v926_v14 }
 0x12b   : > { %v893_v34 = vpop.permute.xlu0 %892 }
 0x12c   : > { %v895_v35 = vrot.slane %v893_v34, 4 }
 0x12e   : > { %v899_v42 = vunpack.c.l.b16 %v895_v35 }
 0x130   : > { %v900_v44 = vpack.c.b16 %v899_v42, %v898_v40 }
 0x132   : > { %v905_v45 = vsel %vm570_vm0, %v900_v44, 0 }
 0x133   : > { %914 = vmatpush.bf16.xpose.msra.mxu1 %v905_v45  ;;  %v2984_v63 = vpop.permute.xlu0 %896  ;;  %v922_v7 = vpop.permute.xlu1 %921 }
 0x134   : > { %v925_v11 = vrot.slane %v922_v7, 4 }
 0x136   : > { %v929_v15 = vunpack.c.l.b16 %v925_v11 }
 0x138   : > { %v931_v24 = vpack.c.b16 %v930_v19, %v929_v15 }
 0x13a   : > { %v936_v30 = vsel %vm570_vm0, %v931_v24, 0 }
 0x144   : > { %v586_v46 = vpop.f32.mrf.mxu0 }
 0x145   : > { %v682_v39 = vsel %vm681_vm1, %v586_v46, -inf }
 0x146   : > { %683 = vmax.xlane.f32.xlu0 %v682_v39 }
 0x14c   : > { %v588_v47 = vpop.f32.mrf.mxu0 }
 0x14d   : > { %v685_v49 = vsel %vm681_vm1, %v588_v47, -inf }
 0x14e   : > { %686 = vmax.xlane.f32.xlu0 %v685_v49 }
 0x15a   : > { %v616_v50 = vpop.f32.mrf.mxu3 }
 0x15b   : > { %v688_v36 = vsel %vm681_vm1, %v616_v50, -inf }
 0x15c   : > { %689 = vmax.xlane.f32.xlu2 %v688_v36 }
 0x162   : > { %v618_v53 = vpop.f32.mrf.mxu3 }
 0x163   : > { %v691_v54 = vsel %vm681_vm1, %v618_v53, -inf }
 0x164   : > { %692 = vmax.xlane.f32.xlu2 %v691_v54 }
 0x16a   : > { %v2948_v55 = vpop.f32.mrf.mxu3 }
 0x16b   : > { %v694_v56 = vsel %vm681_vm1, %v2948_v55, -inf }
 0x16c   : > { %695 = vmax.xlane.f32.xlu0 %v694_v56 }
 0x172   : > { %v2952_v57 = vpop.f32.mrf.mxu3 }
 0x173   : > { %v697_v58 = vsel %vm681_vm1, %v2952_v57, -inf }
 0x174   : > { %698 = vmax.xlane.f32.xlu1 %v697_v58 }
 0x17a   : > { %v2956_v37 = vpop.f32.mrf.mxu3 }
 0x17b   : > { %v700_v59 = vsel %vm681_vm1, %v2956_v37, -inf }
 0x17c   : > { %701 = vmax.xlane.f32.xlu1 %v700_v59  ;;  %952 = vrot.lane.b32.xlu2 %v2893_v16, %s2638_s12 }
 0x180   : > { %927 = vrot.lane.b32.xlu0 %v2898_v22, %s2638_s12 }
 0x182   : > { %v2964_v61 = vpop.f32.mrf.mxu3 }
 0x183   : > { %v703_v38 = vsel %vm681_vm1, %v2964_v61, -inf }
 0x184   : > { %704 = vmax.xlane.f32.xlu1 %v703_v38  ;;  %958 = vrot.lane.b32.xlu2 %v2916_v51, %s2638_s12 }
 0x188   : > { %985 = vrot.lane.b32.xlu0 %v2918_v52, %s2638_s12 }
 0x18c   : > { %989 = vrot.lane.b32.xlu2 %v2932_v12, %s2638_s12 }
 0x190   : > { %1210 = vrot.lane.b32.xlu0 %v2854_v43, %s2639_s13 }
 0x194   : > { %1107 = vrot.lane.b32.xlu2 %v2925_v4, %s2638_s12 }
 0x19c   : > { %1212 = vrot.lane.b32.xlu2 %v2860_v48, %s2639_s13 }
 0x19d   : > { %954 = vrot.lane.b32.xlu1 %v2900_v23, %s2638_s12 }
 0x1a5   : > { %983 = vrot.lane.b32.xlu1 %v2911_v41, %s2638_s12 }
 0x1b9   : > { %v684_v0 = vpop.xlane.xlu0 %683 }
 0x1ba   : > { %v706_v1 = vsub.f32 %v586_v46, %v684_v0 }
 0x1bc   : > { %v714_v2 = vmul.f32 1.442695, %v706_v1 }
 0x1be   : > { %2459 = vpow2.f32 %v714_v2 }
 0x1c1   : > { %v687_v5 = vpop.xlane.xlu0 %686 }
 0x1c2   : > { %v707_v6 = vsub.f32 %v588_v47, %v687_v5 }
 0x1c4   : > { %v716_v8 = vmul.f32 1.442695, %v707_v6  ;;  %v2986_v13 = vpop.eup %2459 }
 0x1c5   : > { %v762_v17 = vpack.c.bf16 %v2986_v13, %v2986_v13 }
 0x1c6   : > { %2461 = vpow2.f32 %v716_v8 }
 0x1c7   : > { %v772_v25 = vunpack.c.l.b16 %v762_v17 }
 0x1cc   : > { %v2990_v18 = vpop.eup %2461 }
 0x1cd   : > { %v763_v21 = vpack.c.bf16 %v2990_v18, %v2990_v18 }
 0x1cf   : > { %v773_v26 = vunpack.c.l.b16 %v763_v21  ;;  %v690_v27 = vpop.xlane.xlu2 %689 }
 0x1d0   : > { %v708_v28 = vsub.f32 %v616_v50, %v690_v27 }
 0x1d1   : > { %v774_v29 = vpack.c.b16 %v773_v26, %v772_v25 }
 0x1d2   : > { %v718_v32 = vmul.f32 1.442695, %v708_v28 }
 0x1d3   : > { %2272 = vmatmul.msk.bf16.vlgmr.msrb.gmra.mxu3 %vm681_vm1, %v774_v29 }
 0x1d4   : > { %945 = vmatpush.bf16.xpose.msrb.mxu3 %v936_v30  ;;  %2463 = vpow2.f32 %v718_v32 }
 0x1d7   : > { %v693_v33 = vpop.xlane.xlu2 %692 }
 0x1d8   : > { %v709_v34 = vsub.f32 %v618_v53, %v693_v33 }
 0x1da   : > { %v720_v35 = vmul.f32 1.442695, %v709_v34  ;;  %v2996_v40 = vpop.eup %2463 }
 0x1db   : > { %v764_v46 = vpack.c.bf16 %v2996_v40, %v2996_v40 }
 0x1dc   : > { %2465 = vpow2.f32 %v720_v35 }
 0x1dd   : > { %v800_v50 = vunpack.c.l.b16 %v764_v46 }
 0x1df   : > { %v953_v42 = vpop.permute.xlu2 %952  ;;  %v696_v44 = vpop.xlane.xlu0 %695 }
 0x1e0   : > { %v710_v45 = vsub.f32 %v2948_v55, %v696_v44  ;;  %v956_v46 = vrot.slane %v953_v42, 4 }
 0x1e2   : > { %v3001_v39 = vpop.eup %2465  ;;  %v722_v49 = vmul.f32 1.442695, %v710_v45 }
 0x1e3   : > { %v765_v47 = vpack.c.bf16 %v3001_v39, %v3001_v39 }
 0x1e4   : > { %2467 = vpow2.f32 %v722_v49 }
 0x1e5   : > { %v801_v36 = vunpack.c.l.b16 %v765_v47 }
 0x1e7   : > { %v802_v53 = vpack.c.b16 %v801_v36, %v800_v50  ;;  %v699_v54 = vpop.xlane.xlu1 %698  ;;  %v959_v56 = vpop.permute.xlu2 %958  ;;  %v960_v50 = vunpack.c.l.b16 %v956_v46 }
 0x1e8   : > { %v711_v58 = vsub.f32 %v2952_v57, %v699_v54 }
 0x1e9   : > { %2273 = vmatmul.msk.bf16.vlgmr.msra.gmra.mxu3 %vm681_vm1, %v802_v53 }
 0x1ea   : > { %v724_v55 = vmul.f32 1.442695, %v711_v58  ;;  %v3007_v59 = vpop.eup %2467 }
 0x1eb   : > { %v766_v2 = vpack.c.bf16 %v3007_v59, %v3007_v59 }
 0x1ec   : > { %2469 = vpow2.f32 %v724_v55 }
 0x1ed   : > { %v828_v8 = vunpack.c.l.b16 %v766_v2 }
 0x1ef   : > { %v702_v38 = vpop.xlane.xlu1 %701  ;;  %v990_v0 = vpop.permute.xlu2 %989 }
 0x1f0   : > { %v712_v1 = vsub.f32 %v2956_v37, %v702_v38 }
 0x1f2   : > { %v3012_v5 = vpop.eup %2469  ;;  %v928_v6 = vpop.permute.xlu0 %927  ;;  %v726_v57 = vmul.f32 1.442695, %v712_v1 }
 0x1f3   : > { %v767_v7 = vpack.c.bf16 %v3012_v5, %v3012_v5 }
 0x1f4   : > { %2471 = vpow2.f32 %v726_v57 }
 0x1f5   : > { %v829_v9 = vunpack.c.l.b16 %v767_v7 }
 0x1f7   : > { %v830_v11 = vpack.c.b16 %v829_v9, %v828_v8  ;;  %v705_v14 = vpop.xlane.xlu1 %704  ;;  %v1108_v15 = vpop.permute.xlu2 %1107 }
 0x1f8   : > { %v713_v17 = vsub.f32 %v2964_v61, %v705_v14  ;;  %1120 = vmatpush.bf16.msrb.mxu2 %v1108_v15 }
 0x1f9   : > { %2274 = vmatmul.msk.bf16.vlgmr.msra.gmra.mxu0 %vm681_vm1, %v830_v11  ;;  %2277 = vmatmul.msk.bf16.vlgmr.msrb.gmra.mxu3 %vm570_vm0, %v928_v6 }
 0x1fa   : > { %v728_v37 = vmul.f32 1.442695, %v713_v17  ;;  %v986_v19 = vpop.permute.xlu0 %985  ;;  %v3019_v21 = vpop.eup %2471 }
 0x1fb   : > { %v768_v25 = vpack.c.bf16 %v3019_v21, %v3019_v21  ;;  %v988_v54 = vrot.slane %v986_v19, 4 }
 0x1fc   : > { %2473 = vpow2.f32 %v728_v37 }
 0x1fd   : > { %v856_v30 = vunpack.c.l.b16 %v768_v25  ;;  %v992_v1 = vunpack.c.l.b16 %v988_v54 }
 0x1ff   : > { %v1213_v24 = vpop.permute.xlu2 %1212 }
 0x200   : > { %v1215_v26 = vrot.slane %v1213_v24, 4 }
 0x202   : > { %v3023_v27 = vpop.eup %2473  ;;  %v1211_v28 = vpop.permute.xlu0 %1210  ;;  %v1219_v33 = vunpack.c.l.b16 %v1215_v26 }
 0x203   : > { %v769_v61 = vpack.c.bf16 %v3023_v27, %v3023_v27  ;;  %v1214_v29 = vrot.slane %v1211_v28, 4 }
 0x205   : > { %v857_v32 = vunpack.c.l.b16 %v769_v61  ;;  %v1218_v34 = vunpack.c.l.b16 %v1214_v29 }
 0x207   : > { %v1220_v35 = vpack.c.b16 %v1219_v33, %v1218_v34  ;;  %v858_v44 = vpack.c.b16 %v857_v32, %v856_v30 }
 0x209   : > { %2275 = vmatmul.msk.bf16.vlgmr.msrb.gmra.mxu1 %vm681_vm1, %v858_v44  ;;  %v1225_v45 = vsel %vm570_vm0, %v1220_v35, 0 }
 0x20a   : > { %1234 = vmatpush.bf16.xpose.msra.mxu2 %v1225_v45 }
 0x20f   : > { %v955_v47 = vpop.permute.xlu1 %954 }
 0x210   : > { %v957_v49 = vrot.slane %v955_v47, 4 }
 0x212   : > { %v961_v36 = vunpack.c.l.b16 %v957_v49 }
 0x214   : > { %v962_v53 = vpack.c.b16 %v961_v36, %v960_v50 }
 0x216   : > { %v967_v58 = vsel %vm570_vm0, %v962_v53, 0 }
 0x217   : > { %v984_v55 = vpop.permute.xlu1 %983  ;;  %976 = vmatpush.bf16.xpose.msrb.mxu0 %v967_v58 }
 0x218   : > { %v987_v38 = vrot.slane %v984_v55, 4 }
 0x219   : > { %2276 = vmatmul.msk.bf16.vlgmr.msra.gmra.mxu1 %vm570_vm0, %v2984_v63 }
 0x21a   : > { %v991_v2 = vunpack.c.l.b16 %v987_v38 }
 0x21c   : > { %v993_v6 = vpack.c.b16 %v992_v1, %v991_v2 }
 0x21e   : > { %2278 = vmatmul.msk.bf16.vlgmr.msrb.gmra.mxu0 %vm570_vm0, %v959_v56  ;;  %v998_v42 = vsel %vm570_vm0, %v993_v6, 0 }
 0x21f   : > { %1007 = vmatpush.bf16.xpose.msrb.mxu1 %v998_v42 }
 0x229   : > { %2279 = vmatmul.msk.bf16.vlgmr.msrb.gmra.mxu1 %vm570_vm0, %v990_v0 }
 0x256   : > { %v3035_v7 = vpop.f32.mrf.mxu3 }
 0x25e   : > { %v3037_v57 = vpop.f32.mrf.mxu3 }
 0x26c   : > { %v3039_v8 = vpop.f32.mrf.mxu3 }
 0x274   : > { %v3041_v9 = vpop.f32.mrf.mxu3 }
 0x276   : > { %v3051_v0 = vpop.f32.mrf.mxu0 }
 0x27c   : > { %v3043_v11 = vpop.f32.mrf.mxu3 }
 0x27d   : > { %v1020_v63 = vsel %vm681_vm1, %v3043_v11, -inf }
 0x27e   : > { %1021 = vmax.xlane.f32.xlu2 %v1020_v63  ;;  %v3053_v15 = vpop.f32.mrf.mxu0 }
 0x284   : > { %v3047_v56 = vpop.f32.mrf.mxu3 }
 0x285   : > { %v1023_v14 = vsel %vm681_vm1, %v3047_v56, -inf }
 0x286   : > { %1024 = vmax.xlane.f32.xlu1 %v1023_v14  ;;  %v3055_v17 = vpop.f32.mrf.mxu1 }
 0x28e   : > { %v3062_v24 = vpop.f32.mrf.mxu1 }
 0x296   : > { %1157 = vrot.lane.b32.xlu2 %v2937_v20, %s2638_s12  ;;  %v3067_v28 = vpop.f32.mrf.mxu1 }
 0x297   : > { %v1014_v61 = vsel %vm681_vm1, %v3067_v28, -inf }
 0x29b   : > { %v978_v37 = vpop.f32.mrf.mxu0 }
 0x29c   : > { %v1026_v19 = vsel %vm681_vm1, %v978_v37, -inf }
 0x29d   : > { %1027 = vmax.xlane.f32.xlu0 %v1026_v19 }
 0x29e   : > { %1241 = vrot.lane.b32.xlu2 %v2870_v60, %s2639_s13  ;;  %v3087_v29 = vpop.f32.mrf.mxu1 }
 0x29f   : > { %v1017_v30 = vsel %vm681_vm1, %v3087_v29, -inf }
 0x2a3   : > { %v980_v25 = vpop.f32.mrf.mxu0 }
 0x2a4   : > { %v1029_v26 = vsel %vm681_vm1, %v980_v25, -inf }
 0x2a5   : > { %1030 = vmax.xlane.f32.xlu1 %v1029_v26 }
 0x2a6   : > { %1243 = vrot.lane.b32.xlu2 %v2881_v3, %s2639_s13  ;;  %v3093_v32 = vpop.f32.mrf.mxu1 }
 0x2a7   : > { %v1032_v36 = vsel %vm681_vm1, %v3093_v32, -inf }
 0x2ad   : > { %1015 = vmax.xlane.f32.xlu1 %v1014_v61 }
 0x2ae   : > { %1272 = vrot.lane.b32.xlu2 %v2893_v16, %s2639_s13  ;;  %v3097_v33 = vpop.f32.mrf.mxu1 }
 0x2b1   : > { %1216 = vrot.lane.b32.xlu0 %v2873_v62, %s2639_s13 }
 0x2b6   : > { %1274 = vrot.lane.b32.xlu2 %v2900_v23, %s2639_s13 }
 0x2be   : > { %1247 = vrot.lane.b32.xlu2 %v2898_v22, %s2639_s13 }
 0x2c6   : > { %1303 = vrot.lane.b32.xlu2 %v2911_v41, %s2639_s13  ;;  %1132 = vrot.lane.b32.xlu1 %v2930_v10, %s2638_s12 }
 0x2ce   : > { %1305 = vrot.lane.b32.xlu2 %v2918_v52, %s2639_s13 }
 0x2d6   : > { %1532 = vrot.lane.b32.xlu2 %v2860_v48, %s2640_s14  ;;  %v1035_v48 = vsel %vm681_vm1, %v3097_v33, -inf }
 0x2db   : > { %1018 = vmax.xlane.f32.xlu0 %v1017_v30 }
 0x2de   : > { %1452 = vrot.lane.b32.xlu2 %v2930_v10, %s2639_s13 }
 0x2e6   : > { %1536 = vrot.lane.b32.xlu2 %v2873_v62, %s2640_s14 }
 0x2ee   : > { %1592 = vrot.lane.b32.xlu2 %v2893_v16, %s2640_s14 }
 0x2ef   : > { %1182 = vrot.lane.b32.xlu0 %v2940_v31, %s2638_s12 }
 0x2f0   : > { %1036 = vmax.xlane.f32.xlu1 %v1035_v48 }
 0x2f1   : > { %v1022_v34 = vpop.xlane.xlu2 %1021 }
 0x2f2   : > { %v1040_v19 = vsub.f32 %v3043_v11, %v1022_v34 }
 0x2f4   : > { %v1050_v48 = vmul.f32 1.442695, %v1040_v19 }
 0x2f6   : > { %1594 = vrot.lane.b32.xlu2 %v2900_v23, %s2640_s14 }
 0x2f9   : > { %v1158_v35 = vpop.permute.xlu2 %1157  ;;  %v1025_v16 = vpop.xlane.xlu1 %1024 }
 0x2fa   : > { %1170 = vmatpush.bf16.msra.mxu0 %v1158_v35  ;;  %v1041_v42 = vsub.f32 %v3047_v56, %v1025_v16 }
 0x2fc   : > { %v1052_v26 = vmul.f32 1.442695, %v1041_v42 }
 0x2fe   : > { %1561 = vrot.lane.b32.xlu2 %v2870_v60, %s2640_s14 }
 0x301   : > { %v1242_v62 = vpop.permute.xlu2 %1241 }
 0x302   : > { %v1245_v11 = vrot.slane %v1242_v62, 4 }
 0x309   : > { %v1244_v44 = vpop.permute.xlu2 %1243  ;;  %1278 = vrot.lane.b32.xlu1 %v2916_v51, %s2639_s13 }
 0x30a   : > { %v1246_v56 = vrot.slane %v1244_v44, 4 }
 0x310   : > { %v1028_v45 = vpop.xlane.xlu0 %1027 }
 0x311   : > { %v1042_v46 = vsub.f32 %v978_v37, %v1028_v45  ;;  %v1273_v47 = vpop.permute.xlu2 %1272  ;;  %1427 = vrot.lane.b32.xlu1 %v2925_v4, %s2639_s13 }
 0x312   : > { %v1276_v50 = vrot.slane %v1273_v47, 4  ;;  %v1250_v47 = vunpack.c.l.b16 %v1246_v56 }
 0x313   : > { %v1054_v49 = vmul.f32 1.442695, %v1042_v46 }
 0x314   : > { %v1280_v55 = vunpack.c.l.b16 %v1276_v50 }
 0x315   : > { %2475 = vpow2.f32 %v1054_v49 }
 0x318   : > { %v1031_v23 = vpop.xlane.xlu1 %1030 }
 0x319   : > { %v1043_v60 = vsub.f32 %v980_v25, %v1031_v23  ;;  %v1275_v53 = vpop.permute.xlu2 %1274  ;;  %1033 = vmax.xlane.f32.xlu0 %v1032_v36  ;;  %1477 = vrot.lane.b32.xlu1 %v2937_v20, %s2639_s13  ;;  %v1249_v23 = vunpack.c.l.b16 %v1245_v11 }
 0x31a   : > { %v1277_v54 = vrot.slane %v1275_v53, 4 }
 0x31b   : > { %v1056_v58 = vmul.f32 1.442695, %v1043_v60  ;;  %v3117_v2 = vpop.eup %2475  ;;  %v1251_v60 = vpack.c.b16 %v1250_v47, %v1249_v23 }
 0x31c   : > { %v1281_v38 = vunpack.c.l.b16 %v1277_v54  ;;  %v1098_v14 = vpack.c.bf16 %v3117_v2, %v3117_v2 }
 0x31d   : > { %2477 = vpow2.f32 %v1056_v58  ;;  %v1256_v58 = vsel %vm570_vm0, %v1251_v60, 0 }
 0x31e   : > { %v1282_v1 = vpack.c.b16 %v1281_v38, %v1280_v55  ;;  %v1154_v61 = vunpack.c.l.b16 %v1098_v14  ;;  %2479 = vpow2.f32 %v1052_v26 }
 0x31f   : > { %2481 = vpow2.f32 %v1050_v48 }
 0x320   : > { %v1287_v6 = vsel %vm570_vm0, %v1282_v1, 0  ;;  %v1016_v34 = vpop.xlane.xlu1 %1015 }
 0x321   : > { %1296 = vmatpush.bf16.xpose.msrb.mxu0 %v1287_v6  ;;  %v1248_v63 = vpop.permute.xlu2 %1247 }
 0x323   : > { %v3123_v37 = vpop.eup %2477  ;;  %v1217_v1 = vpop.permute.xlu0 %1216 }
 0x324   : > { %v1099_v25 = vpack.c.bf16 %v3123_v37, %v3123_v37  ;;  %v3131_v16 = vpop.eup %2479 }
 0x325   : > { %v3133_v46 = vpop.eup %2481  ;;  %v1097_v50 = vpack.c.bf16 %v3131_v16, %v3131_v16 }
 0x326   : > { %v1155_v30 = vunpack.c.l.b16 %v1099_v25  ;;  %v1096_v36 = vpack.c.bf16 %v3133_v46, %v3133_v46 }
 0x327   : > { %v1130_v44 = vunpack.c.l.b16 %v1097_v50 }
 0x328   : > { %v1156_v35 = vpack.c.b16 %v1155_v30, %v1154_v61  ;;  %v1129_v53 = vunpack.c.l.b16 %v1096_v36 }
 0x329   : > { %v1304_v45 = vpop.permute.xlu2 %1303 }
 0x32a   : > { %2282 = vmatmul.msk.bf16.vlgmr.msra.gmra.mxu0 %vm681_vm1, %v1156_v35  ;;  %v1131_v55 = vpack.c.b16 %v1130_v44, %v1129_v53  ;;  %v1307_v61 = vrot.slane %v1304_v45, 4 }
 0x32c   : > { %v1311_v35 = vunpack.c.l.b16 %v1307_v61 }
 0x32d   : > { %1309 = vrot.lane.b32.xlu0 %v2932_v12, %s2639_s13 }
 0x331   : > { %v1306_v49 = vpop.permute.xlu2 %1305 }
 0x332   : > { %v1308_v26 = vrot.slane %v1306_v49, 4 }
 0x334   : > { %v1312_v48 = vunpack.c.l.b16 %v1308_v26 }
 0x335   : > { %1530 = vrot.lane.b32.xlu0 %v2854_v43, %s2640_s14  ;;  %v1038_v43 = vsub.f32 %v3067_v28, %v1016_v34 }
 0x336   : > { %v1313_v11 = vpack.c.b16 %v1312_v48, %v1311_v35 }
 0x337   : > { %v1046_v6 = vmul.f32 1.442695, %v1038_v43 }
 0x338   : > { %v1133_v54 = vpop.permute.xlu1 %1132  ;;  %v1318_v47 = vsel %vm570_vm0, %v1313_v11, 0 }
 0x339   : > { %v3141_v62 = vpop.permute.xlu2 %1532  ;;  %1145 = vmatpush.bf16.msra.mxu3 %v1133_v54  ;;  %2483 = vpow2.f32 %v1046_v6 }
 0x33c   : > { %2281 = vmatmul.msk.bf16.vlgmr.msra.gmra.mxu3 %vm681_vm1, %v1131_v55 }
 0x33d   : > { %1265 = vmatpush.bf16.xpose.msrb.mxu3 %v1256_v58  ;;  %1563 = vrot.lane.b32.xlu0 %v2881_v3, %s2640_s14 }
 0x33f   : > { %v3150_v25 = vpop.eup %2483 }
 0x340   : > { %v1094_v3 = vpack.c.bf16 %v3150_v25, %v3150_v25 }
 0x341   : > { %v1453_v38 = vpop.permute.xlu2 %1452 }
 0x345   : > { %1465 = vmatpush.bf16.msra.mxu3 %v1453_v38 }
 0x349   : > { %v3160_v49 = vpop.permute.xlu2 %1536 }
 0x34c   : > { %2285 = vmatmul.msk.bf16.vlgmr.msrb.gmra.mxu3 %vm570_vm0, %v1248_v63  ;;  %v1104_v63 = vunpack.c.l.b16 %v1094_v3 }
 0x34e   : > { %v1019_v42 = vpop.xlane.xlu0 %1018 }
 0x34f   : > { %v1039_v14 = vsub.f32 %v3087_v29, %v1019_v42 }
 0x351   : > { %v1048_v19 = vmul.f32 1.442695, %v1039_v14  ;;  %v1593_v45 = vpop.permute.xlu2 %1592 }
 0x352   : > { %v1596_v44 = vrot.slane %v1593_v45, 4 }
 0x353   : > { %2485 = vpow2.f32 %v1048_v19 }
 0x354   : > { %v1600_v55 = vunpack.c.l.b16 %v1596_v44 }
 0x359   : > { %v3154_v30 = vpop.eup %2485  ;;  %v1595_v36 = vpop.permute.xlu2 %1594 }
 0x35a   : > { %v1095_v28 = vpack.c.bf16 %v3154_v30, %v3154_v30  ;;  %v1597_v60 = vrot.slane %v1595_v36, 4 }
 0x35c   : > { %v1105_v56 = vunpack.c.l.b16 %v1095_v28  ;;  %v1601_v54 = vunpack.c.l.b16 %v1597_v60 }
 0x35e   : > { %v1106_v29 = vpack.c.b16 %v1105_v56, %v1104_v63  ;;  %v1602_v38 = vpack.c.b16 %v1601_v54, %v1600_v55 }
 0x360   : > { %2280 = vmatmul.msk.bf16.vlgmr.msrb.gmra.mxu2 %vm681_vm1, %v1106_v29 }
 0x361   : > { %v1183_v34 = vpop.permute.xlu0 %1182 }
 0x362   : > { %1195 = vmatpush.bf16.msra.mxu1 %v1183_v34 }
 0x363   : > { %v1037_v50 = vpop.xlane.xlu1 %1036 }
 0x364   : > { %v1045_v58 = vsub.f32 %v3097_v33, %v1037_v50 }
 0x366   : > { %1327 = vmatpush.bf16.xpose.msrb.mxu1 %v1318_v47  ;;  %v1060_v43 = vmul.f32 1.442695, %v1045_v58  ;;  %v1562_v47 = vpop.permute.xlu2 %1561 }
 0x367   : > { %v1565_v50 = vrot.slane %v1562_v47, 4 }
 0x368   : > { %2487 = vpow2.f32 %v1060_v43 }
 0x369   : > { %v1569_v44 = vunpack.c.l.b16 %v1565_v50 }
 0x36e   : > { %v3167_v26 = vpop.eup %2487 }
 0x36f   : > { %v1101_v3 = vpack.c.bf16 %v3167_v26, %v3167_v26 }
 0x370   : > { %2284 = vmatmul.msk.bf16.vlgmr.msra.gmra.mxu2 %vm570_vm0, %v1217_v1  ;;  %v1607_v1 = vsel %vm570_vm0, %v1602_v38, 0 }
 0x371   : > { %v1180_v48 = vunpack.c.l.b16 %v1101_v3 }
 0x37b   : > { %v1279_v23 = vpop.permute.xlu1 %1278 }
 0x37c   : > { %2286 = vmatmul.msk.bf16.vlgmr.msrb.gmra.mxu0 %vm570_vm0, %v1279_v23 }
 0x383   : > { %v1428_v53 = vpop.permute.xlu1 %1427 }
 0x384   : > { %1440 = vmatpush.bf16.msrb.mxu2 %v1428_v53 }
 0x38b   : > { %v1478_v6 = vpop.permute.xlu1 %1477 }
 0x38c   : > { %1490 = vmatpush.bf16.msra.mxu0 %v1478_v6  ;;  %v1034_v42 = vpop.xlane.xlu0 %1033 }
 0x38d   : > { %v1044_v14 = vsub.f32 %v3093_v32, %v1034_v42  ;;  %v1535_v32 = vrot.slane %v3141_v62, 4 }
 0x38f   : > { %v1058_v19 = vmul.f32 1.442695, %v1044_v14  ;;  %v1539_v29 = vunpack.c.l.b16 %v1535_v32 }
 0x390   : > { %1616 = vmatpush.bf16.xpose.msrb.mxu0 %v1607_v1 }
 0x391   : > { %2489 = vpow2.f32 %v1058_v19 }
 0x397   : > { %v3171_v33 = vpop.eup %2489 }
 0x398   : > { %v1100_v61 = vpack.c.bf16 %v3171_v33, %v3171_v33 }
 0x39a   : > { %v1179_v28 = vunpack.c.l.b16 %v1100_v61 }
 0x39c   : > { %v1181_v63 = vpack.c.b16 %v1180_v48, %v1179_v28 }
 0x39e   : > { %2283 = vmatmul.msk.bf16.vlgmr.msra.gmra.mxu1 %vm681_vm1, %v1181_v63 }
 0x39f   : > { %v1310_v35 = vpop.permute.xlu0 %1309 }
 0x3a7   : > { %v1531_v56 = vpop.permute.xlu0 %1530  ;;  %v3188_v14 = vpop.f32.mrf.mxu0 }
 0x3a8   : > { %v1534_v11 = vrot.slane %v1531_v56, 4 }
 0x3aa   : > { %v1538_v34 = vunpack.c.l.b16 %v1534_v11 }
 0x3ac   : > { %v1540_v45 = vpack.c.b16 %v1539_v29, %v1538_v34 }
 0x3ae   : > { %2287 = vmatmul.msk.bf16.vlgmr.msrb.gmra.mxu1 %vm570_vm0, %v1310_v35  ;;  %v1545_v23 = vsel %vm570_vm0, %v1540_v45, 0 }
 0x3af   : > { %1554 = vmatpush.bf16.xpose.msra.mxu2 %v1545_v23  ;;  %v1564_v36 = vpop.permute.xlu0 %1563  ;;  %v3192_v3 = vpop.f32.mrf.mxu0 }
 0x3b0   : > { %v1566_v60 = vrot.slane %v1564_v36, 4 }
 0x3b2   : > { %v1570_v53 = vunpack.c.l.b16 %v1566_v60 }
 0x3b4   : > { %v1571_v54 = vpack.c.b16 %v1570_v53, %v1569_v44 }
 0x3b6   : > { %v1576_v58 = vsel %vm570_vm0, %v1571_v54, 0 }
 0x3b7   : > { %1585 = vmatpush.bf16.xpose.msrb.mxu3 %v1576_v58 }
 0x3bf   : > { %v3180_v62 = vpop.f32.mrf.mxu3 }
 0x3c7   : > { %v3182_v55 = vpop.f32.mrf.mxu3 }
 0x3cf   : > { %v1267_v38 = vpop.f32.mrf.mxu3 }
 0x3d0   : > { %v1340_v43 = vsel %vm681_vm1, %v1267_v38, -inf }
 0x3d1   : > { %1341 = vmax.xlane.f32.xlu0 %v1340_v43 }
 0x3d7   : > { %v1269_v6 = vpop.f32.mrf.mxu3 }
 0x3d8   : > { %v1343_v42 = vsel %vm681_vm1, %v1269_v6, -inf }
 0x3d9   : > { %1344 = vmax.xlane.f32.xlu2 %v1343_v42 }
 0x3e3   : > { %v3186_v1 = vpop.f32.mrf.mxu2 }
 0x3eb   : > { %v3190_v19 = vpop.f32.mrf.mxu2 }
 0x3f3   : > { %v3194_v61 = vpop.f32.mrf.mxu2 }
 0x3f4   : > { %v1334_v11 = vsel %vm681_vm1, %v3194_v61, -inf }
 0x3f9   : > { %v1298_v48 = vpop.f32.mrf.mxu0 }
 0x3fa   : > { %v1346_v28 = vsel %vm681_vm1, %v1298_v48, -inf }
 0x3fb   : > { %1347 = vmax.xlane.f32.xlu0 %v1346_v28  ;;  %v1238_v63 = vpop.f32.mrf.mxu2 }
 0x3fc   : > { %v1337_v35 = vsel %vm681_vm1, %v1238_v63, -inf }
 0x3fd   : > { %1338 = vmax.xlane.f32.xlu1 %v1337_v35 }
 0x401   : > { %v1300_v32 = vpop.f32.mrf.mxu0 }
 0x402   : > { %v1349_v56 = vsel %vm681_vm1, %v1300_v32, -inf }
 0x403   : > { %1350 = vmax.xlane.f32.xlu2 %v1349_v56 }
 0x40b   : > { %1335 = vmax.xlane.f32.xlu2 %v1334_v11 }
 0x41b   : > { %v3201_v29 = vpop.f32.mrf.mxu1 }
 0x423   : > { %1502 = vrot.lane.b32.xlu2 %v2940_v31, %s2639_s13  ;;  %v3205_v34 = vpop.f32.mrf.mxu1 }
 0x42b   : > { %1567 = vrot.lane.b32.xlu2 %v2898_v22, %s2640_s14  ;;  %v3209_v47 = vpop.f32.mrf.mxu1 }
 0x42c   : > { %v1352_v45 = vsel %vm681_vm1, %v3209_v47, -inf }
 0x42d   : > { %1353 = vmax.xlane.f32.xlu0 %v1352_v45 }
 0x433   : > { %1623 = vrot.lane.b32.xlu2 %v2911_v41, %s2640_s14  ;;  %v3215_v50 = vpop.f32.mrf.mxu1 }
 0x434   : > { %v1355_v23 = vsel %vm681_vm1, %v3215_v50, -inf }
 0x435   : > { %1356 = vmax.xlane.f32.xlu1 %v1355_v23 }
 0x43b   : > { %1629 = vrot.lane.b32.xlu2 %v2932_v12, %s2640_s14 }
 0x441   : > { %1625 = vrot.lane.b32.xlu0 %v2918_v52, %s2640_s14 }
 0x443   : > { %1797 = vrot.lane.b32.xlu2 %v2937_v20, %s2640_s14 }
 0x444   : > { %v1342_v22 = vpop.xlane.xlu0 %1341 }
 0x445   : > { %v1360_v36 = vsub.f32 %v1267_v38, %v1342_v22 }
 0x447   : > { %v1370_v60 = vmul.f32 1.442695, %v1360_v36 }
 0x449   : > { %1822 = vrot.lane.b32.xlu0 %v2940_v31, %s2640_s14  ;;  %2491 = vpow2.f32 %v1370_v60 }
 0x44c   : > { %v1345_v41 = vpop.xlane.xlu2 %1344 }
 0x44d   : > { %v1361_v44 = vsub.f32 %v1269_v6, %v1345_v41 }
 0x44e   : > { %1598 = vrot.lane.b32.xlu1 %v2916_v51, %s2640_s14 }
 0x44f   : > { %v1372_v53 = vmul.f32 1.442695, %v1361_v44  ;;  %v2492_v12 = vpop.eup %2491 }
 0x450   : > { %v1416_v54 = vpack.c.bf16 %v2492_v12, %v2492_v12 }
 0x451   : > { %2493 = vpow2.f32 %v1372_v53 }
 0x452   : > { %v1449_v58 = vunpack.c.l.b16 %v1416_v54  ;;  %v1062_v54 = vsel %vm681_vm1, %v3150_v25, 0.0 }
 0x456   : > { %1747 = vrot.lane.b32.xlu1 %v2925_v4, %s2640_s14 }
 0x457   : > { %v3231_v52 = vpop.eup %2493 }
 0x458   : > { %v1417_v20 = vpack.c.bf16 %v3231_v52, %v3231_v52 }
 0x45a   : > { %v1450_v31 = vunpack.c.l.b16 %v1417_v20 }
 0x45c   : > { %v1451_v38 = vpack.c.b16 %v1450_v31, %v1449_v58 }
 0x45e   : > { %1772 = vrot.lane.b32.xlu1 %v2930_v10, %s2640_s14  ;;  %2289 = vmatmul.msk.bf16.vlgmr.msra.gmra.mxu3 %vm681_vm1, %v1451_v38 }
 0x46e   : > { %v1348_v51 = vpop.xlane.xlu0 %1347 }
 0x46f   : > { %v1362_v43 = vsub.f32 %v1298_v48, %v1348_v51 }
 0x470   : > { %v1339_v42 = vpop.xlane.xlu1 %1338 }
 0x471   : > { %v1374_v6 = vmul.f32 1.442695, %v1362_v43  ;;  %v1359_v4 = vsub.f32 %v1238_v63, %v1339_v42 }
 0x473   : > { %2495 = vpow2.f32 %v1374_v6  ;;  %v1368_v11 = vmul.f32 1.442695, %v1359_v4  ;;  %v1077_v4 = vsel %vm681_vm1, %v3123_v37, 0.0 }
 0x476   : > { %v1351_v28 = vpop.xlane.xlu2 %1350 }
 0x477   : > { %v1363_v35 = vsub.f32 %v1300_v32, %v1351_v28 }
 0x479   : > { %v1376_v56 = vmul.f32 1.442695, %v1363_v35  ;;  %v2496_v45 = vpop.eup %2495  ;;  %v1388_v35 = vsel %vm681_vm1, %v2492_v12, 0.0 }
 0x47a   : > { %v1418_v36 = vpack.c.bf16 %v2496_v45, %v2496_v45  ;;  %v1394_v25 = vsel %vm681_vm1, %v2496_v45, 0.0 }
 0x47b   : > { %2497 = vpow2.f32 %v1376_v56 }
 0x47c   : > { %2499 = vpow2.f32 %v1368_v11  ;;  %v1474_v41 = vunpack.c.l.b16 %v1418_v36  ;;  %v1071_v11 = vsel %vm681_vm1, %v3131_v16, 0.0 }
 0x47e   : > { %v1336_v23 = vpop.xlane.xlu2 %1335 }
 0x47f   : > { %v1358_v22 = vsub.f32 %v3194_v61, %v1336_v23 }
 0x481   : > { %v3239_v10 = vpop.eup %2497  ;;  %v1366_v60 = vmul.f32 1.442695, %v1358_v22 }
 0x482   : > { %v1419_v48 = vpack.c.bf16 %v3239_v10, %v3239_v10  ;;  %v2500_v63 = vpop.eup %2499 }
 0x483   : > { %2501 = vpow2.f32 %v1366_v60  ;;  %v1415_v20 = vpack.c.bf16 %v2500_v63, %v2500_v63  ;;  %v1385_v42 = vsel %vm681_vm1, %v2500_v63, 0.0 }
 0x484   : > { %v1475_v44 = vunpack.c.l.b16 %v1419_v48 }
 0x485   : > { %v1425_v38 = vunpack.c.l.b16 %v1415_v20 }
 0x486   : > { %v1476_v32 = vpack.c.b16 %v1475_v44, %v1474_v41  ;;  %v1503_v53 = vpop.permute.xlu2 %1502 }
 0x487   : > { %1515 = vmatpush.bf16.msra.mxu1 %v1503_v53 }
 0x488   : > { %1063 = vadd.xlane.f32.xlu1 %v1062_v54  ;;  %2290 = vmatmul.msk.bf16.vlgmr.msra.gmra.mxu0 %vm681_vm1, %v1476_v32 }
 0x489   : > { %v2502_v61 = vpop.eup %2501 }
 0x48a   : > { %v1414_v58 = vpack.c.bf16 %v2502_v61, %v2502_v61  ;;  %v1382_v31 = vsel %vm681_vm1, %v2502_v61, 0.0 }
 0x48b   : > { %1383 = vadd.xlane.f32.xlu0 %v1382_v31 }
 0x48c   : > { %v1424_v51 = vunpack.c.l.b16 %v1414_v58 }
 0x48e   : > { %v1426_v43 = vpack.c.b16 %v1425_v38, %v1424_v51  ;;  %v1568_v6 = vpop.permute.xlu2 %1567 }
 0x48f   : > { %2293 = vmatmul.msk.bf16.vlgmr.msrb.gmra.mxu3 %vm570_vm0, %v1568_v6 }
 0x490   : > { %2288 = vmatmul.msk.bf16.vlgmr.msrb.gmra.mxu2 %vm681_vm1, %v1426_v43  ;;  %1386 = vadd.xlane.f32.xlu1 %v1385_v42 }
 0x493   : > { %1395 = vadd.xlane.f32.xlu0 %v1394_v25 }
 0x496   : > { %v1624_v28 = vpop.permute.xlu2 %1623 }
 0x497   : > { %v1627_v41 = vrot.slane %v1624_v28, 4 }
 0x498   : > { %1078 = vadd.xlane.f32.xlu1 %v1077_v4 }
 0x499   : > { %v1631_v32 = vunpack.c.l.b16 %v1627_v41 }
 0x49b   : > { %1389 = vadd.xlane.f32.xlu0 %v1388_v35 }
 0x49e   : > { %v1630_v56 = vpop.permute.xlu2 %1629 }
 0x4a0   : > { %1072 = vadd.xlane.f32.xlu1 %v1071_v11  ;;  %2292 = vmatmul.msk.bf16.vlgmr.msra.gmra.mxu2 %vm570_vm0, %v3160_v49  ;;  %v1354_v23 = vpop.xlane.xlu0 %1353 }
 0x4a1   : > { %v1364_v45 = vsub.f32 %v3209_v47, %v1354_v23 }
 0x4a3   : > { %v1378_v22 = vmul.f32 1.442695, %v1364_v45 }
 0x4a5   : > { %2503 = vpow2.f32 %v1378_v22 }
 0x4a6   : > { %v1798_v36 = vpop.permute.xlu2 %1797 }
 0x4a7   : > { %1810 = vmatpush.bf16.msra.mxu0 %v1798_v36 }
 0x4a8   : > { %v1357_v60 = vpop.xlane.xlu1 %1356 }
 0x4a9   : > { %v1365_v37 = vsub.f32 %v3215_v50, %v1357_v60 }
 0x4ab   : > { %v1380_v12 = vmul.f32 1.442695, %v1365_v37  ;;  %v3260_v48 = vpop.eup %2503 }
 0x4ac   : > { %v1420_v16 = vpack.c.bf16 %v3260_v48, %v3260_v48 }
 0x4ad   : > { %2505 = vpow2.f32 %v1380_v12 }
 0x4ae   : > { %v1499_v53 = vunpack.c.l.b16 %v1420_v16 }
 0x4b3   : > { %v3264_v44 = vpop.eup %2505  ;;  %v1626_v49 = vpop.permute.xlu0 %1625 }
 0x4b4   : > { %v1421_v47 = vpack.c.bf16 %v3264_v44, %v3264_v44  ;;  %v1628_v63 = vrot.slane %v1626_v49, 4 }
 0x4b6   : > { %v1500_v54 = vunpack.c.l.b16 %v1421_v47  ;;  %v1632_v20 = vunpack.c.l.b16 %v1628_v63  ;;  %v1080_v47 = vsel %vm681_vm1, %v3171_v33, 0.0 }
 0x4b8   : > { %v1501_v50 = vpack.c.b16 %v1500_v54, %v1499_v53  ;;  %v1633_v61 = vpack.c.b16 %v1632_v20, %v1631_v32  ;;  %v733_v53 = vsel %vm681_vm1, %v2990_v18, 0.0 }
 0x4ba   : > { %2291 = vmatmul.msk.bf16.vlgmr.msra.gmra.mxu1 %vm681_vm1, %v1501_v50  ;;  %v1638_v58 = vsel %vm570_vm0, %v1633_v61, 0 }
 0x4bb   : > { %1647 = vmatpush.bf16.xpose.msrb.mxu1 %v1638_v58  ;;  %v1823_v31 = vpop.permute.xlu0 %1822 }
 0x4c0   : > { %v1599_v38 = vpop.permute.xlu1 %1598 }
 0x4c1   : > { %2294 = vmatmul.msk.bf16.vlgmr.msrb.gmra.mxu0 %vm570_vm0, %v1599_v38 }
 0x4c3   : > { %1835 = vmatpush.bf16.msra.mxu1 %v1823_v31 }
 0x4c8   : > { %v1748_v51 = vpop.permute.xlu1 %1747 }
 0x4c9   : > { %1760 = vmatpush.bf16.msrb.mxu2 %v1748_v51  ;;  %v1065_v51 = vsel %vm681_vm1, %v3154_v30, 0.0 }
 0x4ca   : > { %2295 = vmatmul.msk.bf16.vlgmr.msrb.gmra.mxu1 %vm570_vm0, %v1630_v56 }
 0x4d0   : > { %v1773_v43 = vpop.permute.xlu1 %1772 }
 0x4d1   : > { %1785 = vmatpush.bf16.msra.mxu3 %v1773_v43 }
 0x4e1   : > { %v3282_v49 = vpop.f32.mrf.mxu3 }
 0x4e9   : > { %v3288_v32 = vpop.f32.mrf.mxu3 }
 0x4fb   : > { %v3272_v25 = vpop.xlane.xlu1 %1063 }
 0x4fe   : > { %v1384_v6 = vpop.xlane.xlu0 %1383 }
 0x503   : > { %v1387_v11 = vpop.xlane.xlu1 %1386 }
 0x505   : > { %v1492_v4 = vpop.f32.mrf.mxu0 }
 0x506   : > { %v1396_v42 = vpop.xlane.xlu0 %1395 }
 0x507   : > { %2507 = vrcp.f32 %v1396_v42 }
 0x508   : > { %2509 = vrcp.f32 %v1384_v6  ;;  %v1074_v6 = vsel %vm681_vm1, %v3117_v2, 0.0  ;;  %v1083_v2 = vsel %vm681_vm1, %v3167_v26, 0.0  ;;  %v730_v26 = vsel %vm681_vm1, %v2986_v13, 0.0 }
 0x509   : > { %2511 = vrcp.f32 %v1387_v11  ;;  %v1068_v11 = vsel %vm681_vm1, %v3133_v46, 0.0 }
 0x50d   : > { %v2508_v28 = vpop.eup %2507  ;;  %v3286_v63 = vpop.f32.mrf.mxu0 }
 0x50e   : > { %v3274_v35 = vmul.f32 %v2508_v28, %v1492_v4  ;;  %v2510_v45 = vpop.eup %2509  ;;  %v1397_v4 = vsel %vm681_vm1, %v3239_v10, 0.0 }
 0x50f   : > { %v2512_v22 = vpop.eup %2511 }
 0x512   : > { %v1587_v50 = vpop.f32.mrf.mxu3 }
 0x513   : > { %v1442_v23 = vpop.f32.mrf.mxu2  ;;  %v1660_v58 = vsel %vm681_vm1, %v1587_v50, -inf }
 0x514   : > { %v1522_v60 = vmul.f32 %v2510_v45, %v1442_v23  ;;  %v1391_v23 = vsel %vm681_vm1, %v3231_v52, 0.0  ;;  %v1400_v45 = vsel %vm681_vm1, %v3260_v48, 0.0  ;;  %v742_v52 = vsel %vm681_vm1, %v3007_v59, 0.0 }
 0x515   : > { %v745_v48 = vsel %vm681_vm1, %v3012_v5, 0.0 }
 0x51a   : > { %v1589_v38 = vpop.f32.mrf.mxu3 }
 0x51b   : > { %v1444_v36 = vpop.f32.mrf.mxu2  ;;  %v1663_v18 = vsel %vm681_vm1, %v1589_v38, -inf }
 0x51c   : > { %v1523_v56 = vmul.f32 %v2512_v22, %v1444_v36  ;;  %v1403_v22 = vsel %vm681_vm1, %v3264_v44, 0.0  ;;  %v1079_v44 = vpop.xlane.xlu1 %1078  ;;  %v3333_v36 = vpop.xlane.xlu0 %1389 }
 0x51e   : > { %v2403_v37 = vpack.i.bf16 %v1523_v56, %v1522_v60 }
 0x523   : > { %v3276_v12 = vpop.f32.mrf.mxu2 }
 0x524   : > { %v1654_v42 = vsel %vm681_vm1, %v3276_v12, -inf }
 0x52b   : > { %v3278_v41 = vpop.f32.mrf.mxu2 }
 0x52c   : > { %v1657_v16 = vsel %vm681_vm1, %v3278_v41, -inf }
 0x52d   : > { %1658 = vmax.xlane.f32.xlu1 %v1657_v16  ;;  %v3335_v16 = vpop.xlane.xlu1 %1072 }
 0x535   : > { %1081 = vadd.xlane.f32.xlu1 %v1080_v47 }
 0x537   : > { %v3295_v33 = vpop.f32.mrf.mxu1 }
 0x53d   : > { %734 = vadd.xlane.f32.xlu1 %v733_v53 }
 0x53e   : > { %v1618_v54 = vpop.f32.mrf.mxu0 }
 0x53f   : > { %v1666_v20 = vsel %vm681_vm1, %v1618_v54, -inf  ;;  %v3300_v43 = vpop.f32.mrf.mxu1 }
 0x540   : > { %1667 = vmax.xlane.f32.xlu2 %v1666_v20 }
 0x546   : > { %v1620_v61 = vpop.f32.mrf.mxu0 }
 0x547   : > { %v1669_v31 = vsel %vm681_vm1, %v1620_v61, -inf  ;;  %v3306_v28 = vpop.f32.mrf.mxu1 }
 0x548   : > { %1661 = vmax.xlane.f32.xlu2 %v1660_v58  ;;  %1670 = vmax.xlane.f32.xlu0 %v1669_v31  ;;  %v1672_v30 = vsel %vm681_vm1, %v3306_v28, -inf }
 0x54f   : > { %v3320_v10 = vpop.f32.mrf.mxu1 }
 0x550   : > { %1066 = vadd.xlane.f32.xlu2 %v1065_v51  ;;  %1664 = vmax.xlane.f32.xlu0 %v1663_v18  ;;  %v1675_v46 = vsel %vm681_vm1, %v3320_v10, -inf }
 0x558   : > { %1075 = vadd.xlane.f32.xlu2 %v1074_v6  ;;  %1655 = vmax.xlane.f32.xlu0 %v1654_v42 }
 0x560   : > { %1398 = vadd.xlane.f32.xlu2 %v1397_v4  ;;  %1673 = vmax.xlane.f32.xlu0 %v1672_v30 }
 0x568   : > { %1069 = vadd.xlane.f32.xlu2 %v1068_v11  ;;  %1084 = vadd.xlane.f32.xlu0 %v1083_v2 }
 0x570   : > { %1392 = vadd.xlane.f32.xlu2 %v1391_v23  ;;  %1401 = vadd.xlane.f32.xlu0 %v1400_v45 }
 0x578   : > { %1404 = vadd.xlane.f32.xlu2 %v1403_v22  ;;  %1676 = vmax.xlane.f32.xlu0 %v1675_v46 }
 0x580   : > { %731 = vadd.xlane.f32.xlu2 %v730_v26  ;;  %743 = vadd.xlane.f32.xlu0 %v742_v52 }
 0x588   : > { %746 = vadd.xlane.f32.xlu2 %v745_v48 }
 0x594   : > { %2404 = vrot.lane.b32.xlu0 %v2403_v37, %s2639_s13 }
 0x5a0   : > { %v1659_v51 = vpop.xlane.xlu1 %1658 }
 0x5a1   : > { %v1679_v37 = vsub.f32 %v3278_v41, %v1659_v51 }
 0x5a3   : > { %v1688_v4 = vmul.f32 1.442695, %v1679_v37 }
 0x5b3   : > { %v1668_v60 = vpop.xlane.xlu2 %1667 }
 0x5b4   : > { %v1682_v56 = vsub.f32 %v1618_v54, %v1668_v60 }
 0x5b6   : > { %v1694_v47 = vmul.f32 1.442695, %v1682_v56 }
 0x5b8   : > { %2513 = vpow2.f32 %v1694_v47 }
 0x5bb   : > { %v1662_v13 = vpop.xlane.xlu2 %1661  ;;  %v1671_v53 = vpop.xlane.xlu0 %1670 }
 0x5bc   : > { %v1680_v20 = vsub.f32 %v1587_v50, %v1662_v13  ;;  %v1683_v59 = vsub.f32 %v1620_v61, %v1671_v53 }
 0x5be   : > { %v1696_v58 = vmul.f32 1.442695, %v1683_v59  ;;  %v1690_v31 = vmul.f32 1.442695, %v1680_v20  ;;  %v3338_v5 = vpop.eup %2513 }
 0x5bf   : > { %v1738_v50 = vpack.c.bf16 %v3338_v5, %v3338_v5 }
 0x5c0   : > { %2515 = vpow2.f32 %v1696_v58 }
 0x5c1   : > { %2517 = vrcp.f32 %v3272_v25  ;;  %v1794_v23 = vunpack.c.l.b16 %v1738_v50 }
 0x5c2   : > { %2519 = vpow2.f32 %v1690_v31 }
 0x5c3   : > { %v1067_v54 = vpop.xlane.xlu2 %1066  ;;  %v1665_v18 = vpop.xlane.xlu0 %1664 }
 0x5c4   : > { %2521 = vrcp.f32 %v1067_v54  ;;  %v1681_v6 = vsub.f32 %v1589_v38, %v1665_v18 }
 0x5c6   : > { %v1692_v61 = vmul.f32 1.442695, %v1681_v6  ;;  %v2516_v42 = vpop.eup %2515 }
 0x5c7   : > { %v2518_v30 = vpop.eup %2517  ;;  %v1739_v11 = vpack.c.bf16 %v2516_v42, %v2516_v42  ;;  %v1717_v25 = vsel %vm681_vm1, %v2516_v42, 0.0 }
 0x5c8   : > { %2523 = vpow2.f32 %v1692_v61  ;;  %v3344_v2 = vpop.eup %2519  ;;  %1718 = vadd.xlane.f32.xlu0 %v1717_v25  ;;  %v1202_v46 = vmul.f32 %v2518_v30, %v3186_v1  ;;  %v1082_v61 = vpop.xlane.xlu1 %1081 }
 0x5c9   : > { %2525 = vrcp.f32 %v1079_v44  ;;  %v1795_v45 = vunpack.c.l.b16 %v1739_v11  ;;  %v1736_v60 = vpack.c.bf16 %v3344_v2, %v3344_v2 }
 0x5ca   : > { %v2522_v41 = vpop.eup %2521  ;;  %2527 = vpow2.f32 %v1688_v4 }
 0x5cb   : > { %v1076_v38 = vpop.xlane.xlu2 %1075  ;;  %v1656_v22 = vpop.xlane.xlu0 %1655  ;;  %v1203_v26 = vmul.f32 %v2522_v41, %v3190_v19  ;;  %v1796_v52 = vpack.c.b16 %v1795_v45, %v1794_v23  ;;  %v736_v19 = vsel %vm681_vm1, %v2996_v40, 0.0  ;;  %v1769_v53 = vunpack.c.l.b16 %v1736_v60 }
 0x5cc   : > { %2529 = vrcp.f32 %v1076_v38  ;;  %v1678_v48 = vsub.f32 %v3276_v12, %v1656_v22 }
 0x5cd   : > { %v2398_v56 = vpack.i.bf16 %v1203_v26, %v1202_v46  ;;  %2298 = vmatmul.msk.bf16.vlgmr.msra.gmra.mxu0 %vm681_vm1, %v1796_v52 }
 0x5ce   : > { %v3351_v47 = vpop.eup %2523  ;;  %v1686_v44 = vmul.f32 1.442695, %v1678_v48 }
 0x5cf   : > { %v1737_v13 = vpack.c.bf16 %v3351_v47, %v3351_v47  ;;  %2399 = vrot.lane.b32.xlu1 %v2398_v56, %s2640_s14  ;;  %v2526_v1 = vpop.eup %2525 }
 0x5d0   : > { %2531 = vpow2.f32 %v1686_v44  ;;  %v3359_v12 = vpop.eup %2527  ;;  %737 = vadd.xlane.f32.xlu0 %v736_v19  ;;  %v1207_v54 = vmul.f32 %v2526_v1, %v3192_v3 }
 0x5d1   : > { %v1770_v20 = vunpack.c.l.b16 %v1737_v13  ;;  %v1735_v18 = vpack.c.bf16 %v3359_v12, %v3359_v12  ;;  %2533 = vrcp.f32 %v1082_v61 }
 0x5d2   : > { %v2530_v59 = vpop.eup %2529 }
 0x5d3   : > { %v1771_v58 = vpack.c.b16 %v1770_v20, %v1769_v53  ;;  %v3361_v31 = vpop.xlane.xlu2 %1398  ;;  %v1674_v51 = vpop.xlane.xlu0 %1673  ;;  %v1206_v37 = vmul.f32 %v2530_v59, %v3188_v14  ;;  %v1745_v42 = vunpack.c.l.b16 %v1735_v18 }
 0x5d4   : > { %v1684_v41 = vsub.f32 %v3306_v28, %v1674_v51 }
 0x5d5   : > { %2297 = vmatmul.msk.bf16.vlgmr.msra.gmra.mxu3 %vm681_vm1, %v1771_v58  ;;  %v2408_v40 = vpack.i.bf16 %v1207_v54, %v1206_v37  ;;  %v1711_v37 = vsel %vm681_vm1, %v3351_v47, 0.0 }
 0x5d6   : > { %v2532_v6 = vpop.eup %2531  ;;  %v1698_v26 = vmul.f32 1.442695, %v1684_v41 }
 0x5d7   : > { %v1734_v50 = vpack.c.bf16 %v2532_v6, %v2532_v6  ;;  %2409 = vrot.lane.b32.xlu2 %v2408_v40, %s2640_s14  ;;  %v2534_v3 = vpop.eup %2533  ;;  %v1702_v54 = vsel %vm681_vm1, %v2532_v6, 0.0  ;;  %v1705_v40 = vsel %vm681_vm1, %v3359_v12, 0.0  ;;  %v735_v6 = vpop.xlane.xlu1 %734 }
 0x5d8   : > { %v3376_v38 = vmul.f32 %v2534_v3, %v3201_v29 }
 0x5d9   : > { %v1744_v4 = vunpack.c.l.b16 %v1734_v50 }
 0x5db   : > { %v1746_v30 = vpack.c.b16 %v1745_v42, %v1744_v4  ;;  %v3369_v11 = vpop.xlane.xlu2 %1069  ;;  %v1085_v14 = vpop.xlane.xlu0 %1084 }
 0x5dc   : > { %2535 = vrcp.f32 %v1085_v14 }
 0x5dd   : > { %2296 = vmatmul.msk.bf16.vlgmr.msrb.gmra.mxu2 %vm681_vm1, %v1746_v30 }
 0x5e2   : > { %v2536_v25 = vpop.eup %2535 }
 0x5e3   : > { %v3373_v23 = vpop.xlane.xlu2 %1392  ;;  %v1402_v45 = vpop.xlane.xlu0 %1401  ;;  %v3379_v22 = vmul.f32 %v2536_v25, %v3205_v34 }
 0x5e4   : > { %2537 = vrcp.f32 %v1402_v45 }
 0x5e5   : > { %v2438_v46 = vpack.i.bf16 %v3379_v22, %v3376_v38  ;;  %2539 = vpow2.f32 %v1698_v26 }
 0x5ea   : > { %v2538_v56 = vpop.eup %2537 }
 0x5eb   : > { %v1405_v52 = vpop.xlane.xlu2 %1404  ;;  %v1677_v48 = vpop.xlane.xlu0 %1676  ;;  %v3385_v13 = vmul.f32 %v2538_v56, %v3295_v33 }
 0x5ec   : > { %2541 = vrcp.f32 %v1405_v52  ;;  %v1685_v28 = vsub.f32 %v3320_v10, %v1677_v48  ;;  %v2540_v44 = vpop.eup %2539  ;;  %v1714_v10 = vsel %vm681_vm1, %v3338_v5, 0.0  ;;  %v748_v5 = vsel %vm681_vm1, %v3019_v21, 0.0 }
 0x5ed   : > { %v1740_v1 = vpack.c.bf16 %v2540_v44, %v2540_v44  ;;  %v1720_v18 = vsel %vm681_vm1, %v2540_v44, 0.0 }
 0x5ee   : > { %v1700_v60 = vmul.f32 1.442695, %v1685_v28 }
 0x5ef   : > { %v1819_v58 = vunpack.c.l.b16 %v1740_v1 }
 0x5f0   : > { %2543 = vpow2.f32 %v1700_v60 }
 0x5f1   : > { %2545 = vrcp.f32 %v3361_v31 }
 0x5f2   : > { %v2542_v29 = vpop.eup %2541  ;;  %2547 = vrcp.f32 %v735_v6 }
 0x5f3   : > { %v3388_v34 = vmul.f32 %v2542_v29, %v3300_v43  ;;  %v1708_v43 = vsel %vm681_vm1, %v3344_v2, 0.0  ;;  %v732_v61 = vpop.xlane.xlu2 %731  ;;  %v3410_v42 = vpop.xlane.xlu0 %743 }
 0x5f4   : > { %2549 = vrcp.f32 %v732_v61 }
 0x5f5   : > { %v2448_v19 = vpack.i.bf16 %v3388_v34, %v3385_v13  ;;  %2551 = vrcp.f32 %v3369_v11 }
 0x5f6   : > { %v2544_v53 = vpop.eup %2543  ;;  %2553 = vrcp.f32 %v3335_v16 }
 0x5f7   : > { %v1741_v20 = vpack.c.bf16 %v2544_v53, %v2544_v53  ;;  %v1723_v59 = vsel %vm681_vm1, %v2544_v53, 0.0  ;;  %v2546_v2 = vpop.eup %2545 }
 0x5f8   : > { %1724 = vadd.xlane.f32.xlu0 %v1723_v59  ;;  %v1527_v47 = vmul.f32 %v2546_v2, %v3286_v63  ;;  %v2548_v21 = vpop.eup %2547 }
 0x5f9   : > { %v1820_v51 = vunpack.c.l.b16 %v1741_v20  ;;  %1715 = vadd.xlane.f32.xlu1 %v1714_v10  ;;  %v883_v12 = vmul.f32 %v2548_v21, %v3037_v57  ;;  %v739_v57 = vsel %vm681_vm1, %v3001_v39, 0.0 }
 0x5fa   : > { %v2413_v50 = vpack.i.bf16 %v1527_v47, %v3274_v35  ;;  %v2550_v4 = vpop.eup %2549 }
 0x5fb   : > { %v1821_v33 = vpack.c.b16 %v1820_v51, %v1819_v58  ;;  %v882_v31 = vmul.f32 %v2550_v4, %v3035_v7  ;;  %v2552_v7 = vpop.eup %2551  ;;  %v3426_v48 = vpop.xlane.xlu2 %746 }
 0x5fc   : > { %v2554_v28 = vpop.eup %2553  ;;  %v1204_v44 = vmul.f32 %v2552_v7, %v3180_v62 }
 0x5fd   : > { %2299 = vmatmul.msk.bf16.vlgmr.msra.gmra.mxu1 %vm681_vm1, %v1821_v33  ;;  %v1205_v29 = vmul.f32 %v2554_v28, %v3182_v55 }
 0x5ff   : > { %v2428_v1 = vpack.i.bf16 %v1205_v29, %v1204_v44  ;;  %v2364_v44 = vld [vmem:[%s3543_s3 + $0x20] sm:$0xff]  ;;  %v2363_v29 = vld [vmem:[%s3543_s3 + $0x18] sm:$0xff] }
 0x600   : > { %1709 = vadd.xlane.f32.xlu2 %v1708_v43 }
 0x601   : > { %1712 = vadd.xlane.f32.xlu1 %v1711_v37 }
 0x606   : > { %v2405_v30 = vpop.permute.xlu0 %2404 }
 0x607   : > { %v2407_v35 = vunpack.i.h.bf16 %v2405_v30  ;;  %v2406_v25 = vunpack.i.l.bf16 %v2405_v30 }
 0x608   : > { %1703 = vadd.xlane.f32.xlu2 %v1702_v54 }
 0x609   : > { %1721 = vadd.xlane.f32.xlu1 %v1720_v18 }
 0x610   : > { %749 = vadd.xlane.f32.xlu2 %v748_v5 }
 0x611   : > { %1706 = vadd.xlane.f32.xlu1 %v1705_v40 }
 0x62a   : > { %2414 = vrot.lane.b32.xlu1 %v2413_v50, %s2639_s13  ;;  %v2367_v50 = vld [vmem:[%s3543_s3 + $0x38] sm:$0xff] }
 0x62b   : > { %2368 = vmatpush.bf16.msrb.mxu3 %v2367_v50  ;;  %2044 = vmatpush.bf16.msra.mxu2 %v2367_v50 }
 0x631   : > { %v3430_v20 = vpop.permute.xlu2 %2409 }
 0x63b   : > { %v1719_v60 = vpop.xlane.xlu0 %1718 }
 0x63c   : > { %2555 = vrcp.f32 %v1719_v60  ;;  %v2366_v60 = vld [vmem:[%s3543_s3 + $0x30] sm:$0xff] }
 0x63d   : > { %2369 = vmatpush.bf16.msrb.mxu3 %v2366_v60  ;;  %2045 = vmatpush.bf16.msra.mxu2 %v2366_v60 }
 0x641   : > { %v2400_v14 = vpop.permute.xlu1 %2399 }
 0x642   : > { %v2402_v3 = vunpack.i.h.bf16 %v2400_v14  ;;  %v2401_v63 = vunpack.i.l.bf16 %v2400_v14  ;;  %v2556_v11 = vpop.eup %2555 }
 0x643   : > { %v3434_v39 = vpop.xlane.xlu0 %737 }
 0x644   : > { %v1947_v41 = vsel %vm570_vm0, %v883_v12, %v2402_v3  ;;  %v1946_v45 = vsel %vm570_vm0, %v882_v31, %v2401_v63 }
 0x645   : > { %v3417_v26 = vsel %vm1954_vm2, %v1946_v45, %v2406_v25  ;;  %v3420_v52 = vsel %vm1954_vm2, %v1947_v41, %v2407_v35 }
 0x64a   : > { %v1812_v56 = vpop.f32.mrf.mxu0 }
 0x652   : > { %v1814_v16 = vpop.f32.mrf.mxu0 }
 0x653   : > { %v1847_v62 = vmul.f32 %v2556_v11, %v1814_v16  ;;  %v2360_v16 = vld [vmem:[%s3543_s3] sm:$0xff]  ;;  %v751_v11 = vsel %vm681_vm1, %v3023_v27, 0.0 }
 0x654   : > { %740 = vadd.xlane.f32.xlu1 %v739_v57 }
 0x658   : > { %v1787_v43 = vpop.f32.mrf.mxu3 }
 0x660   : > { %v1762_v61 = vpop.f32.mrf.mxu2  ;;  %v1789_v21 = vpop.f32.mrf.mxu3 }
 0x668   : > { %v1764_v45 = vpop.f32.mrf.mxu2 }
 0x66b   : > { %v1725_v54 = vpop.xlane.xlu0 %1724 }
 0x66c   : > { %v1716_v53 = vpop.xlane.xlu1 %1715 }
 0x66d   : > { %2557 = vrcp.f32 %v1716_v53  ;;  %2429 = vrot.lane.b32.xlu1 %v2428_v1, %s2640_s14  ;;  %v2362_v1 = vld [vmem:[%s3543_s3 + $0x10] sm:$0xff]  ;;  %v2361_v53 = vld [vmem:[%s3543_s3 + $0x8] sm:$0xff] }
 0x66e   : > { %2559 = vrcp.f32 %v3373_v23 }
 0x66f   : > { %2561 = vrcp.f32 %v3333_v36 }
 0x673   : > { %v2558_v59 = vpop.eup %2557  ;;  %v1710_v58 = vpop.xlane.xlu2 %1709 }
 0x674   : > { %v1713_v10 = vpop.xlane.xlu1 %1712  ;;  %v1846_v55 = vmul.f32 %v2558_v59, %v1812_v56  ;;  %v2560_v33 = vpop.eup %2559  ;;  %2563 = vrcp.f32 %v1710_v58  ;;  %v2365_v56 = vld [vmem:[%s3543_s3 + $0x28] sm:$0xff]  ;;  %v2412_v58 = vunpack.i.h.bf16 %v3430_v20 }
 0x675   : > { %v2562_v37 = vpop.eup %2561  ;;  %2565 = vrcp.f32 %v1713_v10  ;;  %v1525_v18 = vmul.f32 %v2560_v33, %v3288_v32  ;;  %2370 = vmatpush.bf16.msrb.mxu3 %v2365_v56  ;;  %2046 = vmatpush.bf16.msra.mxu2 %v2365_v56 }
 0x676   : > { %v2418_v51 = vpack.i.bf16 %v1847_v62, %v1846_v55  ;;  %2567 = vrcp.f32 %v1725_v54  ;;  %v1524_v36 = vmul.f32 %v2562_v37, %v3282_v49 }
 0x678   : > { %2419 = vrot.lane.b32.xlu2 %v2418_v51, %s2638_s12  ;;  %v2433_v2 = vpack.i.bf16 %v1525_v18, %v1524_v36  ;;  %v2411_v51 = vunpack.i.l.bf16 %v3430_v20 }
 0x679   : > { %2371 = vmatpush.bf16.msrb.mxu3 %v2364_v44  ;;  %2047 = vmatpush.bf16.msra.mxu2 %v2364_v44 }
 0x67a   : > { %v1837_v23 = vpop.f32.mrf.mxu1  ;;  %v2564_v40 = vpop.eup %2563 }
 0x67b   : > { %v2566_v47 = vpop.eup %2565  ;;  %v1704_v6 = vpop.xlane.xlu2 %1703  ;;  %v1844_v30 = vmul.f32 %v2564_v40, %v1787_v43 }
 0x67c   : > { %v1722_v5 = vpop.xlane.xlu1 %1721  ;;  %v2568_v32 = vpop.eup %2567  ;;  %v1845_v12 = vmul.f32 %v2566_v47, %v1789_v21 }
 0x67d   : > { %2569 = vrcp.f32 %v1722_v5  ;;  %2372 = vmatpush.bf16.msrb.mxu3 %v2363_v29  ;;  %2048 = vmatpush.bf16.msra.mxu2 %v2363_v29 }
 0x67e   : > { %2571 = vrcp.f32 %v1704_v6  ;;  %v2443_v35 = vpack.i.bf16 %v1845_v12, %v1844_v30 }
 0x680   : > { %2434 = vrot.lane.b32.xlu2 %v2433_v2, %s2639_s13 }
 0x681   : > { %2373 = vmatpush.bf16.msrb.mxu3 %v2362_v1  ;;  %2049 = vmatpush.bf16.msra.mxu2 %v2362_v1 }
 0x682   : > { %v1839_v4 = vpop.f32.mrf.mxu1 }
 0x683   : > { %v2570_v49 = vpop.eup %2569  ;;  %v1849_v14 = vmul.f32 %v2568_v32, %v1839_v4  ;;  %v750_v59 = vpop.xlane.xlu2 %749 }
 0x684   : > { %v1848_v31 = vmul.f32 %v2570_v49, %v1837_v23  ;;  %v1707_v3 = vpop.xlane.xlu1 %1706  ;;  %v2572_v25 = vpop.eup %2571 }
 0x685   : > { %2573 = vrcp.f32 %v1707_v3  ;;  %v1842_v57 = vmul.f32 %v2572_v25, %v1762_v61  ;;  %2374 = vmatpush.bf16.msrb.mxu3 %v2361_v53  ;;  %2050 = vmatpush.bf16.msra.mxu2 %v2361_v53 }
 0x686   : > { %v2453_v63 = vpack.i.bf16 %v1849_v14, %v1848_v31  ;;  %2575 = vrcp.f32 %v3410_v42 }
 0x687   : > { %2577 = vrcp.f32 %v3426_v48 }
 0x688   : > { %2444 = vrot.lane.b32.xlu2 %v2443_v35, %s2638_s12  ;;  %2454 = vrot.lane.b32.xlu1 %v2453_v63, %s2638_s12  ;;  %2579 = vrcp.f32 %v3434_v39 }
 0x689   : > { %2375 = vmatpush.bf16.msrb.mxu3 %v2360_v16  ;;  %2051 = vmatpush.bf16.msra.mxu2 %v2360_v16 }
 0x68b   : > { %v2574_v41 = vpop.eup %2573 }
 0x68c   : > { %v1843_v7 = vmul.f32 %v2574_v41, %v1764_v45  ;;  %v2576_v62 = vpop.eup %2575 }
 0x68d   : > { %v2578_v55 = vpop.eup %2577  ;;  %v886_v43 = vmul.f32 %v2576_v62, %v3051_v0 }
 0x68e   : > { %v2423_v28 = vpack.i.bf16 %v1843_v7, %v1842_v57  ;;  %v887_v42 = vmul.f32 %v2578_v55, %v3053_v15  ;;  %v2580_v21 = vpop.eup %2579 }
 0x68f   : > { %v1950_v54 = vsel %vm570_vm0, %v886_v43, %v2411_v51  ;;  %v884_v39 = vmul.f32 %v2580_v21, %v3039_v8 }
 0x690   : > { %2424 = vrot.lane.b32.xlu0 %v2423_v28, %s2638_s12  ;;  %v1951_v37 = vsel %vm570_vm0, %v887_v42, %v2412_v58  ;;  %v2458_v58 = vld [vmem:[%s3544_s4] ss:$0 sm:$0xff] }
 0x69c   : > { %v2415_v10 = vpop.permute.xlu1 %2414 }
 0x69d   : > { %v2417_v33 = vunpack.i.h.bf16 %v2415_v10  ;;  %v2416_v27 = vunpack.i.l.bf16 %v2415_v10 }
 0x69f   : > { %v1960_v38 = vsel %vm1954_vm2, %v1951_v37, %v2417_v33  ;;  %v1959_v22 = vsel %vm1954_vm2, %v1950_v54, %v2416_v27  ;;  %v2587_v27 = vld [vmem:[%s2756_s19] sm:$0xff]  ;;  %v2588_v54 = vld [vmem:[%s2756_s19 + $0x8] sm:$0xff] }
 0x6ba   : > { %752 = vadd.xlane.f32.xlu0 %v751_v11 }
 0x6c7   : > { %v741_v0 = vpop.xlane.xlu1 %740 }
 0x6c8   : > { %2581 = vrcp.f32 %v741_v0 }
 0x6c9   : > { %2583 = vrcp.f32 %v750_v59 }
 0x6ce   : > { %2439 = vrot.lane.b32.xlu0 %v2438_v46, %s2640_s14  ;;  %v2582_v13 = vpop.eup %2581  ;;  %s3519_s14 = scalar_lea.vmem %s3545_s5, %s2334_s20 }
 0x6cf   : > { %v885_v32 = vmul.f32 %v2582_v13, %v3041_v9  ;;  %v2584_v41 = vpop.eup %2583 }
 0x6d0   : > { %v888_v60 = vmul.f32 %v2584_v41, %v3055_v17 }
 0x6d2   : > { %v2420_v48 = vpop.permute.xlu2 %2419 }
 0x6d3   : > { %v2422_v23 = vunpack.i.h.bf16 %v2420_v48  ;;  %v2421_v18 = vunpack.i.l.bf16 %v2420_v48 }
 0x6d5   : > { %v1969_v46 = vsel %vm1963_vm3, %v1960_v38, %v2422_v23  ;;  %v1968_v20 = vsel %vm1963_vm3, %v1959_v22, %v2421_v18 }
 0x6d6   : > { %v1974_v5 = vpack.c.bf16 %v1969_v46, %v1968_v20  ;;  %2449 = vrot.lane.b32.xlu0 %v2448_v19, %s2639_s13  ;;  %v2589_v46 = vld [vmem:[%s2756_s19 + $0x10] sm:$0xff] }
 0x6d8   : > { %2062 = vmatmul.bf16.vlgmr.msrb.gmra.mxu3 %v1974_v5  ;;  %v2590_v5 = vld [vmem:[%s2756_s19 + $0x20] sm:$0xff] }
 0x6da   : > { %v2435_v15 = vpop.permute.xlu2 %2434 }
 0x6db   : > { %v2436_v49 = vunpack.i.l.bf16 %v2435_v15 }
 0x6df   : > { %v2430_v6 = vpop.permute.xlu1 %2429 }
 0x6e0   : > { %v2432_v34 = vunpack.i.h.bf16 %v2430_v6  ;;  %v2431_v19 = vunpack.i.l.bf16 %v2430_v6  ;;  %v2592_v6 = vld [vmem:[%s2756_s19 + $0x28] sm:$0xff] }
 0x6e2   : > { %v2445_v4 = vpop.permute.xlu2 %2444  ;;  %v1949_v30 = vsel %vm570_vm0, %v885_v32, %v2432_v34  ;;  %v1948_v12 = vsel %vm570_vm0, %v884_v39, %v2431_v19  ;;  %v2593_v34 = vld [vmem:[%s2756_s19 + $0x30] sm:$0xff] }
 0x6e3   : > { %v2447_v14 = vunpack.i.h.bf16 %v2445_v4  ;;  %v1957_v31 = vsel %vm1954_vm2, %v1948_v12, %v2436_v49 }
 0x6fa   : > { %v2455_v28 = vpop.permute.xlu1 %2454 }
 0x6fb   : > { %v2457_v53 = vunpack.i.h.bf16 %v2455_v28  ;;  %v2456_v16 = vunpack.i.l.bf16 %v2455_v28 }
 0x702   : > { %v2425_v36 = vpop.permute.xlu0 %2424 }
 0x703   : > { %v2427_v40 = vunpack.i.h.bf16 %v2425_v36  ;;  %v2426_v2 = vunpack.i.l.bf16 %v2425_v36 }
 0x705   : > { %v1964_v47 = vsel %vm1963_vm3, %v3417_v26, %v2426_v2  ;;  %v1965_v50 = vsel %vm1963_vm3, %v3420_v52, %v2427_v40  ;;  %v2437_v26 = vunpack.i.h.bf16 %v2435_v15  ;;  %v2446_v52 = vunpack.i.l.bf16 %v2445_v4  ;;  %v2594_v4 = vld [vmem:[%s2756_s19 + $0x38] sm:$0xff] }
 0x706   : > { %v1972_v61 = vpack.c.bf16 %v1965_v50, %v1964_v47  ;;  %v2591_v47 = vld [vmem:[%s2756_s19 + $0x18] sm:$0xff] }
 0x707   : > { %v1958_v3 = vsel %vm1954_vm2, %v1949_v30, %v2437_v26  ;;  %v1966_v63 = vsel %vm1963_vm3, %v1957_v31, %v2446_v52 }
 0x708   : > { %2052 = vmatmul.bf16.vlgmr.msra.gmra.mxu2 %v1972_v61  ;;  %v1967_v35 = vsel %vm1963_vm3, %v1958_v3, %v2447_v14 }
 0x709   : > { %v1973_v8 = vpack.c.bf16 %v1967_v35, %v1966_v63 }
 0x718   : > { %2057 = vmatmul.bf16.gmra.mxu2 %v1973_v8 }
 0x72d   : > { %v753_v9 = vpop.xlane.xlu0 %752 }
 0x72e   : > { %2585 = vrcp.f32 %v753_v9 }
 0x734   : > { %v2586_v45 = vpop.eup %2585 }
 0x735   : > { %v889_v56 = vmul.f32 %v2586_v45, %v3062_v24 }
 0x740   : > { %v2440_v25 = vpop.permute.xlu0 %2439 }
 0x741   : > { %v2442_v57 = vunpack.i.h.bf16 %v2440_v25  ;;  %v2441_v7 = vunpack.i.l.bf16 %v2440_v25 }
 0x743   : > { %v1953_v11 = vsel %vm570_vm0, %v889_v56, %v2442_v57  ;;  %v1952_v59 = vsel %vm570_vm0, %v888_v60, %v2441_v7 }
 0x748   : > { %v2450_v44 = vpop.permute.xlu0 %2449 }
 0x749   : > { %v2452_v29 = vunpack.i.h.bf16 %v2450_v44  ;;  %v2451_v1 = vunpack.i.l.bf16 %v2450_v44 }
 0x74b   : > { %v1961_v62 = vsel %vm1954_vm2, %v1952_v59, %v2451_v1  ;;  %v1962_v10 = vsel %vm1954_vm2, %v1953_v11, %v2452_v29 }
 0x74c   : > { %v1970_v17 = vsel %vm1963_vm3, %v1961_v62, %v2456_v16  ;;  %v1971_v24 = vsel %vm1963_vm3, %v1962_v10, %v2457_v53 }
 0x74d   : > { %v1975_v55 = vpack.c.bf16 %v1971_v24, %v1970_v17 }
 0x74f   : > { %2067 = vmatmul.bf16.gmra.mxu3 %v1975_v55 }
 0x75b   : > { %v2063_v37 = vpop.f32.mrf.mxu3 }
 0x75c   : > { %v2064_v18 = vadd.f32 %v2458_v58, %v2063_v37 }
 0x75e   : > { %v2077_v0 = vadd.f32 %v2590_v5, %v2064_v18 }
 0x760   : > { %2085 = vst [vmem:[%s3519_s14 + $0x20] sm:$0xff] %v2077_v0 }
 0x763   : > { %v2065_v15 = vpop.f32.mrf.mxu3 }
 0x764   : > { %v2066_v36 = vadd.f32 %v2458_v58, %v2065_v15 }
 0x766   : > { %v2078_v61 = vadd.f32 %v2592_v6, %v2066_v36 }
 0x768   : > { %2086 = vst [vmem:[%s3519_s14 + $0x28] sm:$0xff] %v2078_v61 }
 0x78b   : > { %v2053_v51 = vpop.f32.mrf.mxu2 }
 0x78c   : > { %v2054_v33 = vadd.f32 %v2458_v58, %v2053_v51 }
 0x78e   : > { %v2073_v43 = vadd.f32 %v2587_v27, %v2054_v33 }
 0x790   : > { %2081 = vst [vmem:[%s3519_s14] sm:$0xff] %v2073_v43 }
 0x793   : > { %v2055_v42 = vpop.f32.mrf.mxu2 }
 0x794   : > { %v2056_v48 = vadd.f32 %v2458_v58, %v2055_v42 }
 0x796   : > { %v2074_v23 = vadd.f32 %v2588_v54, %v2056_v48 }
 0x798   : > { %2082 = vst [vmem:[%s3519_s14 + $0x8] sm:$0xff] %v2074_v23 }
 0x79b   : > { %v2058_v38 = vpop.f32.mrf.mxu2 }
 0x79c   : > { %v2059_v22 = vadd.f32 %v2458_v58, %v2058_v38 }
 0x79e   : > { %v2075_v20 = vadd.f32 %v2589_v46, %v2059_v22 }
 0x7a0   : > { %2083 = vst [vmem:[%s3519_s14 + $0x10] sm:$0xff] %v2075_v20 }
 0x7a3   : > { %v2060_v40 = vpop.f32.mrf.mxu2 }
 0x7a4   : > { %v2061_v2 = vadd.f32 %v2458_v58, %v2060_v40 }
 0x7a6   : > { %v2076_v50 = vadd.f32 %v2591_v47, %v2061_v2 }
 0x7a8   : > { %2084 = vst [vmem:[%s3519_s14 + $0x18] sm:$0xff] %v2076_v50 }
 0x7d2   : > { %v2068_v21 = vpop.f32.mrf.mxu3 }
 0x7d3   : > { %v2069_v13 = vadd.f32 %v2458_v58, %v2068_v21 }
 0x7d5   : > { %v2079_v19 = vadd.f32 %v2593_v34, %v2069_v13 }
 0x7d7   : > { %2087 = vst [vmem:[%s3519_s14 + $0x30] sm:$0xff] %v2079_v19 }
 0x7da   : > { %v2070_v39 = vpop.f32.mrf.mxu3 }
 0x7db   : > { %v2071_v32 = vadd.f32 %v2458_v58, %v2070_v39 }
 0x7dd   : > { %v2080_v30 = vadd.f32 %v2594_v4, %v2071_v32 }
 0x7df   : > { %2088 = vst [vmem:[%s3519_s14 + $0x38] sm:$0xff] %v2080_v30 }
 0x7e0 PF: > { %s16_s18 = sadd.s32 1, %s2635_s18  }
 0x7e1   : > { %p13_p7 = scmp.ge.s32.totalorder %s16_s18, 4  }
 0x7e3   :  { %15 = sbr.rel (!%p13_p7) target bundleno = 1 (0x1), region = 75 }
 0x7e8   :  { %2113 = vsyncpa [#allocation3], 1 }
 0x7e9   :  { %2115 = vsyncpa [#allocation3 + $0x1], 1 }

// kernel: rstb_forward.3
= control target key start
LH: loop header
LB: loop body
LE: loop exit
PB: predicated region body
PF: predicated region fallthrough
CT: control target
= control target key end

     0   :  { %s2663_s21 = smov 0   ;;  %s3607_s0 = inlined_call_operand.vmem [shape: f32[8,16,128], index: 0, kind: input, shape index: {}]   ;;  %s3608_s1 = inlined_call_operand.vmem [shape: bf16[4,16,16], index: 1, kind: input, shape index: {}]   ;;  %s3609_s2 = inlined_call_operand.vmem [shape: bf16[128,384], index: 2, kind: input, shape index: {}]   ;;  %s3610_s3 = inlined_call_operand.vmem [shape: f32[1,384], index: 3, kind: input, shape index: {}]   ;;  %s3611_s4 = inlined_call_operand.vmem [shape: bf16[128,128], index: 4, kind: input, shape index: {}]   ;;  %s3612_s5 = inlined_call_operand.vmem [shape: f32[1,128], index: 5, kind: input, shape index: {}]   ;;  %s3613_s6 = inlined_call_operand.vmem [shape: f32[8,16,128], index: 6, kind: output, shape index: {}]  }
   0x1 LB: > { %s2175_s22 = sadd.s32 4294967295, %s2623_s21   ;;  %p2179_p0 = scmp.ge.s32.totalorder %s2623_s21, 1  ;;  %s2623_s21 = sphi %s2663_s21, %s16_s21  }
   0x2   : > { %p214_p1 = scmp.lt.s32.totalorder %s2623_s21, 3 }
   0x4   : > { %p215_p2 = pnand %p2179_p0, %p214_p1 }
   0x6   : > { %218 = sbr.rel (%p215_p2) target bundleno = 2023 (0x7e7), region = 44 }
   0xb   : > { %v2272_v0 = vld [vmem:[%s3609_s2 + $0xa8] sm:$0xf]  ;;  %v2372_v1 = vld [vmem:[%s3609_s2 + $0xb0] sm:$0xf0]  ;;  %v2371_v2 = vld [vmem:[%s3609_s2 + $0xac] sm:$0xf] }
   0xc   : > { %v2273_v3 = vor.u32 %v2372_v1, %v2272_v0  ;;  %v2274_v4 = vld [vmem:[%s3609_s2 + $0xb4] sm:$0xf0]  ;;  %v2260_v5 = vld [vmem:[%s3609_s2 + $0x90] sm:$0xf]  ;;  %v2369_v6 = vld [vmem:[%s3609_s2 + $0x98] sm:$0xf0] }
   0xd   : > { %v2277_v7 = vor.u32 %v2371_v2, %v2274_v4  ;;  %v2368_v8 = vld [vmem:[%s3609_s2 + $0x94] sm:$0xf]  ;;  %v2262_v9 = vld [vmem:[%s3609_s2 + $0x9c] sm:$0xf0]  ;;  %v2261_v10 = vor.u32 %v2369_v6, %v2260_v5  ;;  %v2248_v12 = vld [vmem:[%s3609_s2 + $0x78] sm:$0xf] }
   0xe   : > { %469 = vmatpush.bf16.msra.mxu0 %v2273_v3  ;;  %v2265_v11 = vor.u32 %v2368_v8, %v2262_v9  ;;  %v2366_v13 = vld [vmem:[%s3609_s2 + $0x80] sm:$0xf0]  ;;  %v2365_v14 = vld [vmem:[%s3609_s2 + $0x7c] sm:$0xf]  ;;  %v2250_v15 = vld [vmem:[%s3609_s2 + $0x84] sm:$0xf0] }
   0xf   : > { %498 = vmatpush.bf16.msra.mxu1 %v2277_v7  ;;  %v2249_v16 = vor.u32 %v2366_v13, %v2248_v12  ;;  %v2253_v17 = vor.u32 %v2365_v14, %v2250_v15  ;;  %v2236_v18 = vld [vmem:[%s3609_s2 + $0x60] sm:$0xf]  ;;  %v2363_v19 = vld [vmem:[%s3609_s2 + $0x68] sm:$0xf0]  ;;  %v2362_v20 = vld [vmem:[%s3609_s2 + $0x64] sm:$0xf] }
  0x10   : > { %v2238_v21 = vld [vmem:[%s3609_s2 + $0x6c] sm:$0xf0]  ;;  %s2180_s9 = sshll.u32 %s2175_s22, 2  ;;  %v2237_v22 = vor.u32 %v2363_v19, %v2236_v18  ;;  %v2224_v24 = vld [vmem:[%s3609_s2 + $0x48] sm:$0xf]  ;;  %s2625_s18 = smov 96  }
  0x11   : > { %p247_p3 = scmp.lt.s32.totalorder %s2180_s9, 7  ;;  %v2241_v23 = vor.u32 %v2362_v20, %v2238_v21  ;;  %v2360_v25 = vld [vmem:[%s3609_s2 + $0x50] sm:$0xf0]  ;;  %v2359_v26 = vld [vmem:[%s3609_s2 + $0x4c] sm:$0xf]  ;;  %vm598_vm0 = vcmask 261120  }
  0x12   : > { %470 = vmatpush.bf16.msra.mxu0 %v2261_v10  ;;  %v2226_v27 = vld [vmem:[%s3609_s2 + $0x54] sm:$0xf0]  ;;  %v2225_v28 = vor.u32 %v2360_v25, %v2224_v24  ;;  %v2212_v30 = vld [vmem:[%s3609_s2 + $0x30] sm:$0xf]  ;;  %v2357_v31 = vld [vmem:[%s3609_s2 + $0x38] sm:$0xf0] }
  0x13   : > { %499 = vmatpush.bf16.msra.mxu1 %v2265_v11  ;;  %s3617_s9 = smov (!%p247_p3, %s2180_s9), 7  ;;  %v2229_v29 = vor.u32 %v2359_v26, %v2226_v27  ;;  %v2356_v32 = vld [vmem:[%s3609_s2 + $0x34] sm:$0xf]  ;;  %v2214_v33 = vld [vmem:[%s3609_s2 + $0x3c] sm:$0xf0]  ;;  %v2213_v34 = vor.u32 %v2357_v31, %v2212_v30  ;;  %vm709_vm1 = vcmask 130048  }
  0x14   : > { %s2348_s22 = sshll.u32 %s3617_s9, 4  ;;  %v2217_v37 = vor.u32 %v2356_v32, %v2214_v33  ;;  %v2200_v38 = vld [vmem:[%s3609_s2 + $0x18] sm:$0xf]  ;;  %v2354_v39 = vld [vmem:[%s3609_s2 + $0x20] sm:$0xf0]  ;;  %s2626_s30 = smov 64  }
  0x15   : > { %s2747_s26 = scalar_lea.vmem %s3607_s0, %s2348_s22  ;;  %v2353_v40 = vld [vmem:[%s3609_s2 + $0x1c] sm:$0xf]  ;;  %v2202_v41 = vld [vmem:[%s3609_s2 + $0x24] sm:$0xf0]  ;;  %v2201_v44 = vor.u32 %v2354_v39, %v2200_v38  ;;  %v2188_v46 = vld [vmem:[%s3609_s2] sm:$0xf]  ;;  %s3586_s8 = scalar_lea.vmem %s3613_s6, %s2348_s22 }
  0x16   : > { %471 = vmatpush.bf16.msra.mxu0 %v2249_v16  ;;  %v261_v35 = vld [vmem:[%s2747_s26] sm:$0xff]  ;;  %v262_v36 = vld [vmem:[%s2747_s26 + $0x8] sm:$0xff]  ;;  %v2205_v45 = vor.u32 %v2353_v40, %v2202_v41  ;;  %v2190_v49 = vld [vmem:[%s3609_s2 + $0xc] sm:$0xf0]  ;;  %s2627_s7 = smov 32   ;;  %vm1982_vm2 = vcmask 523264  }
  0x17   : > { %500 = vmatpush.bf16.msra.mxu1 %v2253_v17  ;;  %v269_v42 = vpack.c.bf16 %v261_v35, %v261_v35  ;;  %v270_v43 = vpack.c.bf16 %v262_v36, %v262_v36  ;;  %v2351_v47 = vld [vmem:[%s3609_s2 + $0x8] sm:$0xf0]  ;;  %v2350_v48 = vld [vmem:[%s3609_s2 + $0x4] sm:$0xf]  ;;  %v2280_v55 = vld [vmem:[%s3609_s2 + $0xb0] sm:$0xf] }
  0x18   : > { %v2189_v52 = vor.u32 %v2351_v47, %v2188_v46  ;;  %v2193_v53 = vor.u32 %v2350_v48, %v2190_v49  ;;  %v2373_v56 = vld [vmem:[%s3609_s2 + $0xb8] sm:$0xf0]  ;;  %v263_v58 = vld [vmem:[%s2747_s26 + $0x10] sm:$0xff]  ;;  %v2268_v60 = vld [vmem:[%s3609_s2 + $0x98] sm:$0xf]  ;;  %vm1991_vm3 = vcmask 785408  }
  0x19   : > { %v325_v50 = vunpack.c.l.b16 %v269_v42  ;;  %v326_v51 = vunpack.c.l.b16 %v270_v43  ;;  %v2281_v57 = vor.u32 %v2373_v56, %v2280_v55  ;;  %v264_v59 = vld [vmem:[%s2747_s26 + $0x18] sm:$0xff]  ;;  %v2370_v61 = vld [vmem:[%s3609_s2 + $0xa0] sm:$0xf0]  ;;  %v2256_v63 = vld [vmem:[%s3609_s2 + $0x80] sm:$0xf]  ;;  %v271_v1 = vpack.c.bf16 %v263_v58, %v263_v58 }
  0x1a   : > { %472 = vmatpush.bf16.msra.mxu0 %v2237_v22  ;;  %v2269_v62 = vor.u32 %v2370_v61, %v2268_v60  ;;  %v2367_v0 = vld [vmem:[%s3609_s2 + $0x88] sm:$0xf0]  ;;  %v272_v2 = vpack.c.bf16 %v264_v59, %v264_v59  ;;  %v2244_v4 = vld [vmem:[%s3609_s2 + $0x68] sm:$0xf]  ;;  %v2364_v5 = vld [vmem:[%s3609_s2 + $0x70] sm:$0xf0] }
  0x1b   : > { %501 = vmatpush.bf16.msra.mxu1 %v2241_v23  ;;  %v333_v54 = vpack.c.b16 %v326_v51, %v325_v50  ;;  %527 = vmatpush.bf16.msra.mxu2 %v2281_v57  ;;  %v2257_v3 = vor.u32 %v2367_v0, %v2256_v63  ;;  %v327_v6 = vunpack.c.l.b16 %v271_v1  ;;  %v2245_v8 = vor.u32 %v2364_v5, %v2244_v4  ;;  %v2232_v10 = vld [vmem:[%s3609_s2 + $0x50] sm:$0xf]  ;;  %v2361_v11 = vld [vmem:[%s3609_s2 + $0x58] sm:$0xf0]  ;;  %v265_v13 = vld [vmem:[%s2747_s26 + $0x20] sm:$0xff] }
  0x1c   : > { %v328_v7 = vunpack.c.l.b16 %v272_v2  ;;  %v2233_v12 = vor.u32 %v2361_v11, %v2232_v10  ;;  %v266_v14 = vld [vmem:[%s2747_s26 + $0x28] sm:$0xff]  ;;  %v2220_v15 = vld [vmem:[%s3609_s2 + $0x38] sm:$0xf]  ;;  %v2358_v16 = vld [vmem:[%s3609_s2 + $0x40] sm:$0xf0]  ;;  %v273_v20 = vpack.c.bf16 %v265_v13, %v265_v13 }
  0x1d   : > { %v2221_v17 = vor.u32 %v2358_v16, %v2220_v15  ;;  %v2208_v18 = vld [vmem:[%s3609_s2 + $0x20] sm:$0xf]  ;;  %v2355_v19 = vld [vmem:[%s3609_s2 + $0x28] sm:$0xf0]  ;;  %v274_v21 = vpack.c.bf16 %v266_v14, %v266_v14  ;;  %v2196_v23 = vld [vmem:[%s3609_s2 + $0x8] sm:$0xf] }
  0x1e   : > { %473 = vmatpush.bf16.msra.mxu0 %v2225_v28  ;;  %v334_v9 = vpack.c.b16 %v328_v7, %v327_v6  ;;  %v2209_v22 = vor.u32 %v2355_v19, %v2208_v18  ;;  %v2352_v24 = vld [vmem:[%s3609_s2 + $0x10] sm:$0xf0]  ;;  %v329_v25 = vunpack.c.l.b16 %v273_v20  ;;  %v268_v30 = vld [vmem:[%s2747_s26 + $0x38] sm:$0xff]  ;;  %v2838_v36 = vld [vmem:[%s3610_s3] sm:$0x7] }
  0x1f   : > { %502 = vmatpush.bf16.msra.mxu1 %v2229_v29  ;;  %528 = vmatpush.bf16.msra.mxu2 %v2269_v62  ;;  %v330_v26 = vunpack.c.l.b16 %v274_v21  ;;  %v2197_v27 = vor.u32 %v2352_v24, %v2196_v23  ;;  %v267_v29 = vld [vmem:[%s2747_s26 + $0x30] sm:$0xff]  ;;  %v276_v32 = vpack.c.bf16 %v268_v30, %v268_v30  ;;  %v2844_v38 = vperm.slane %v2838_v36, 1 }
  0x20   : > { %v275_v31 = vpack.c.bf16 %v267_v29, %v267_v29 }
  0x21   : > { %v335_v28 = vpack.c.b16 %v330_v26, %v329_v25 }
  0x22   : > { %474 = vmatpush.bf16.msra.mxu0 %v2213_v34  ;;  %v331_v33 = vunpack.c.l.b16 %v275_v31  ;;  %v332_v34 = vunpack.c.l.b16 %v276_v32 }
  0x23   : > { %503 = vmatpush.bf16.msra.mxu1 %v2217_v37  ;;  %529 = vmatpush.bf16.msra.mxu2 %v2257_v3  ;;  %v2841_v37 = vperm.slane %v2838_v36, 0 }
  0x24   : > { %v336_v35 = vpack.c.b16 %v332_v34, %v331_v33 }
  0x26   : > { %475 = vmatpush.bf16.msra.mxu0 %v2201_v44 }
  0x27   : > { %504 = vmatpush.bf16.msra.mxu1 %v2205_v45  ;;  %530 = vmatpush.bf16.msra.mxu2 %v2245_v8 }
  0x2a   : > { %476 = vmatpush.bf16.msra.mxu0 %v2189_v52 }
  0x2b   : > { %505 = vmatpush.bf16.msra.mxu1 %v2193_v53  ;;  %531 = vmatpush.bf16.msra.mxu2 %v2233_v12 }
  0x2d   : > { %477 = vmatmul.bf16.vlgmr.msra.gmra.mxu0 %v333_v54 }
  0x2e   : > { %506 = vmatmul.bf16.vlgmr.msra.gmra.mxu1 %v333_v54 }
  0x2f   : > { %532 = vmatpush.bf16.msra.mxu2 %v2221_v17 }
  0x33   : > { %533 = vmatpush.bf16.msra.mxu2 %v2209_v22 }
  0x37   : > { %534 = vmatpush.bf16.msra.mxu2 %v2197_v27 }
  0x3a   : > { %535 = vmatmul.bf16.vlgmr.msra.gmra.mxu2 %v333_v54 }
  0x3d   : > { %482 = vmatmul.bf16.gmra.mxu0 %v334_v9 }
  0x3e   : > { %511 = vmatmul.bf16.gmra.mxu1 %v334_v9 }
  0x4a   : > { %540 = vmatmul.bf16.gmra.mxu2 %v334_v9 }
  0x4d   : > { %487 = vmatmul.bf16.gmra.mxu0 %v335_v28 }
  0x4e   : > { %516 = vmatmul.bf16.gmra.mxu1 %v335_v28 }
  0x5a   : > { %545 = vmatmul.bf16.gmra.mxu2 %v335_v28 }
  0x5d   : > { %492 = vmatmul.bf16.gmra.mxu0 %v336_v35 }
  0x5e   : > { %521 = vmatmul.bf16.gmra.mxu1 %v336_v35 }
  0x6a   : > { %550 = vmatmul.bf16.gmra.mxu2 %v336_v35 }
  0xaa   : > { %v478_v39 = vpop.f32.mrf.mxu0 }
  0xab   : > { %v479_v40 = vadd.f32 %v478_v39, %v2841_v37  ;;  %v507_v41 = vpop.f32.mrf.mxu1  ;;  %v313_v39 = vperm.slane %v2838_v36, 2 }
  0xac   : > { %v508_v42 = vadd.f32 %v507_v41, %v2844_v38 }
  0xae   : > { %v2848_v43 = vpack.c.bf16 %v508_v42, %v479_v40 }
  0xb0   : > { %918 = vrot.lane.b32.xlu2 %v2848_v43, %s2625_s18  ;;  %v590_v49 = vrot.slane %v2848_v43, 4  ;;  %v592_v59 = vunpack.c.l.b16 %v2848_v43 }
  0xb2   : > { %v480_v44 = vpop.f32.mrf.mxu0  ;;  %v595_v52 = vunpack.c.l.b16 %v590_v49 }
  0xb3   : > { %v481_v45 = vadd.f32 %v480_v44, %v2841_v37  ;;  %v509_v46 = vpop.f32.mrf.mxu1 }
  0xb4   : > { %v510_v47 = vadd.f32 %v509_v46, %v2844_v38 }
  0xb6   : > { %v2854_v48 = vpack.c.bf16 %v510_v47, %v481_v45 }
  0xb8   : > { %920 = vrot.lane.b32.xlu0 %v2854_v48, %s2625_s18  ;;  %v591_v50 = vrot.slane %v2854_v48, 4  ;;  %v593_v54 = vunpack.c.l.b16 %v2854_v48 }
  0xba   : > { %v483_v51 = vpop.f32.mrf.mxu0  ;;  %v596_v53 = vunpack.c.l.b16 %v591_v50  ;;  %v2867_v62 = vpack.c.b16 %v593_v54, %v592_v59 }
  0xbb   : > { %v484_v55 = vadd.f32 %v483_v51, %v2841_v37  ;;  %v512_v56 = vpop.f32.mrf.mxu1 }
  0xbc   : > { %v513_v57 = vadd.f32 %v512_v56, %v2844_v38  ;;  %v597_v58 = vpack.c.b16 %v596_v53, %v595_v52 }
  0xbd   : > { %v536_v15 = vpop.f32.mrf.mxu2 }
  0xbe   : > { %v2864_v60 = vpack.c.bf16 %v513_v57, %v484_v55  ;;  %v603_v61 = vsel %vm598_vm0, %v597_v58, 0  ;;  %v537_v45 = vadd.f32 %v536_v15, %v313_v39 }
  0xbf   : > { %612 = vmatpush.bf16.xpose.msrb.mxu0 %v603_v61 }
  0xc0   : > { %949 = vrot.lane.b32.xlu1 %v2864_v60, %s2625_s18  ;;  %924 = vrot.lane.b32.xlu0 %v2867_v62, %s2625_s18  ;;  %v621_v4 = vrot.slane %v2864_v60, 4  ;;  %v623_v18 = vunpack.c.l.b16 %v2864_v60  ;;  %v557_v53 = vpack.c.bf16 %v537_v45, %v537_v45 }
  0xc2   : > { %v485_v63 = vpop.f32.mrf.mxu0  ;;  %v626_v7 = vunpack.c.l.b16 %v621_v4  ;;  %v805_v61 = vunpack.c.l.b16 %v557_v53 }
  0xc3   : > { %v486_v0 = vadd.f32 %v485_v63, %v2841_v37  ;;  %v514_v1 = vpop.f32.mrf.mxu1 }
  0xc4   : > { %v515_v2 = vadd.f32 %v514_v1, %v2844_v38 }
  0xc5   : > { %v538_v26 = vpop.f32.mrf.mxu2 }
  0xc6   : > { %v2875_v3 = vpack.c.bf16 %v515_v2, %v486_v0  ;;  %2282 = vmatmul.msk.bf16.vlgmr.msrb.gmra.mxu0 %vm598_vm0, %v2867_v62  ;;  %v539_v46 = vadd.f32 %v538_v26, %v313_v39 }
  0xc8   : > { %951 = vrot.lane.b32.xlu2 %v2875_v3, %s2625_s18  ;;  %v622_v5 = vrot.slane %v2875_v3, 4  ;;  %v624_v14 = vunpack.c.l.b16 %v2875_v3  ;;  %v559_v54 = vpack.c.bf16 %v539_v46, %v539_v46 }
  0xca   : > { %v488_v6 = vpop.f32.mrf.mxu0  ;;  %v627_v8 = vunpack.c.l.b16 %v622_v5  ;;  %v2892_v22 = vpack.c.b16 %v624_v14, %v623_v18 }
  0xcb   : > { %v517_v9 = vpop.f32.mrf.mxu1  ;;  %v489_v11 = vadd.f32 %v488_v6, %v2841_v37 }
  0xcc   : > { %v628_v10 = vpack.c.b16 %v627_v8, %v626_v7  ;;  %v518_v12 = vadd.f32 %v517_v9, %v2844_v38 }
  0xcd   : > { %v541_v40 = vpop.f32.mrf.mxu2 }
  0xce   : > { %v633_v13 = vsel %vm598_vm0, %v628_v10, 0  ;;  %v2887_v16 = vpack.c.bf16 %v518_v12, %v489_v11  ;;  %v542_v55 = vadd.f32 %v541_v40, %v313_v39 }
  0xcf   : > { %642 = vmatpush.bf16.xpose.msra.mxu3 %v633_v13 }
  0xd0   : > { %v651_v24 = vrot.slane %v2887_v16, 4  ;;  %v653_v44 = vunpack.c.l.b16 %v2887_v16  ;;  %v561_v63 = vpack.c.bf16 %v542_v55, %v542_v55 }
  0xd2   : > { %v490_v17 = vpop.f32.mrf.mxu0  ;;  %v656_v28 = vunpack.c.l.b16 %v651_v24  ;;  %v833_v5 = vunpack.c.l.b16 %v561_v63 }
  0xd3   : > { %v491_v19 = vadd.f32 %v490_v17, %v2841_v37  ;;  %v519_v20 = vpop.f32.mrf.mxu1 }
  0xd4   : > { %v520_v21 = vadd.f32 %v519_v20, %v2844_v38 }
  0xd5   : > { %v543_v57 = vpop.f32.mrf.mxu2 }
  0xd6   : > { %v2894_v23 = vpack.c.bf16 %v520_v21, %v491_v19  ;;  %2283 = vmatmul.msk.bf16.vlgmr.msra.gmra.mxu3 %vm598_vm0, %v2892_v22  ;;  %v544_v58 = vadd.f32 %v543_v57, %v313_v39 }
  0xd8   : > { %v652_v25 = vrot.slane %v2894_v23, 4  ;;  %v654_v35 = vunpack.c.l.b16 %v2894_v23  ;;  %v563_v0 = vpack.c.bf16 %v544_v58, %v544_v58 }
  0xda   : > { %v493_v27 = vpop.f32.mrf.mxu0  ;;  %v657_v29 = vunpack.c.l.b16 %v652_v25  ;;  %v2910_v51 = vpack.c.b16 %v654_v35, %v653_v44  ;;  %v834_v6 = vunpack.c.l.b16 %v563_v0  ;;  %v2399_v0 = vld [vmem:[%s3608_s1 + $0x10] sm:$0xff]  }
  0xdb   : > { %v522_v30 = vpop.f32.mrf.mxu1  ;;  %v494_v32 = vadd.f32 %v493_v27, %v2841_v37 }
  0xdc   : > { %v658_v31 = vpack.c.b16 %v657_v29, %v656_v28  ;;  %v523_v33 = vadd.f32 %v522_v30, %v2844_v38  ;;  %v2924_v10 = vpack.c.b16 %v834_v6, %v833_v5 }
  0xdd   : > { %v546_v8 = vpop.f32.mrf.mxu2 }
  0xde   : > { %v663_v34 = vsel %vm598_vm0, %v658_v31, 0  ;;  %v2905_v41 = vpack.c.bf16 %v523_v33, %v494_v32  ;;  %v547_v11 = vadd.f32 %v546_v8, %v313_v39  ;;  %v2976_v8 = vunpack.c.h.bf16 %v2399_v0 }
  0xdf   : > { %672 = vmatpush.bf16.xpose.msrb.mxu3 %v663_v34 }
  0xe0   : > { %v681_v36 = vrot.slane %v2905_v41, 4  ;;  %v683_v9 = vunpack.c.l.b16 %v2905_v41  ;;  %v565_v13 = vpack.c.bf16 %v547_v11, %v547_v11 }
  0xe2   : > { %v495_v42 = vpop.f32.mrf.mxu0  ;;  %v861_v17 = vunpack.c.l.b16 %v565_v13  ;;  %v2400_v13 = vld [vmem:[%s3608_s1 + $0x18] sm:$0xff]  }
  0xe3   : > { %v496_v47 = vadd.f32 %v495_v42, %v2841_v37  ;;  %v524_v49 = vpop.f32.mrf.mxu1  ;;  %v686_v37 = vunpack.c.l.b16 %v681_v36 }
  0xe4   : > { %v525_v50 = vadd.f32 %v524_v49, %v2844_v38  ;;  %v806_v38 = vunpack.c.l.b16 %v559_v54 }
  0xe5   : > { %v548_v14 = vpop.f32.mrf.mxu2 }
  0xe6   : > { %v2912_v52 = vpack.c.bf16 %v525_v50, %v496_v47  ;;  %2284 = vmatmul.msk.bf16.vlgmr.msrb.gmra.mxu3 %vm598_vm0, %v2910_v51  ;;  %v2919_v4 = vpack.c.b16 %v806_v38, %v805_v61  ;;  %v549_v15 = vadd.f32 %v548_v14, %v313_v39 }
  0xe8   : > { %v682_v56 = vrot.slane %v2912_v52, 4  ;;  %v684_v7 = vunpack.c.l.b16 %v2912_v52  ;;  %v567_v18 = vpack.c.bf16 %v549_v15, %v549_v15  ;;  %v2986_v15 = vunpack.c.l.bf16 %v2400_v13 }
  0xea   : > { %v687_v59 = vunpack.c.l.b16 %v682_v56  ;;  %v2926_v12 = vpack.c.b16 %v684_v7, %v683_v9  ;;  %v862_v19 = vunpack.c.l.b16 %v567_v18  ;;  %v2398_v56 = vld [vmem:[%s3608_s1 + $0x8] sm:$0xff]  }
  0xeb   : > { %v2952_v57 = vunpack.c.l.bf16 %v2398_v56  ;;  %v2959_v61 = vunpack.c.h.bf16 %v2398_v56 }
  0xec   : > { %v688_v1 = vpack.c.b16 %v687_v59, %v686_v37  ;;  %v2931_v20 = vpack.c.b16 %v862_v19, %v861_v17 }
  0xed   : > { %v551_v21 = vpop.f32.mrf.mxu2 }
  0xee   : > { %v693_v2 = vsel %vm598_vm0, %v688_v1, 0  ;;  %875 = vmatpush.bf16.msra.mxu0 %v2931_v20  ;;  %v552_v24 = vadd.f32 %v551_v21, %v313_v39  ;;  %v2995_v21 = vunpack.c.h.bf16 %v2400_v13 }
  0xef   : > { %702 = vmatpush.bf16.xpose.msra.mxu3 %v693_v2  ;;  %v2969_v2 = vunpack.c.l.bf16 %v2399_v0 }
  0xf0   : > { %v569_v25 = vpack.c.bf16 %v552_v24, %v552_v24 }
  0xf2   : > { %v889_v28 = vunpack.c.l.b16 %v569_v25 }
  0xf5   : > { %v553_v26 = vpop.f32.mrf.mxu2 }
  0xf6   : > { %2285 = vmatmul.msk.bf16.vlgmr.msra.gmra.mxu3 %vm598_vm0, %v2926_v12  ;;  %v554_v27 = vadd.f32 %v553_v26, %v313_v39  ;;  %v2383_v39 = vld [vmem:[%s3608_s1] sm:$0xff]  }
  0xf7   : > { %819 = vmatpush.bf16.msrb.mxu3 %v2919_v4  ;;  %v2941_v46 = vunpack.c.l.bf16 %v2383_v39  ;;  %v2945_v36 = vunpack.c.h.bf16 %v2383_v39 }
  0xf8   : > { %v571_v29 = vpack.c.bf16 %v554_v27, %v554_v27 }
  0xfa   : > { %v890_v30 = vunpack.c.l.b16 %v571_v29 }
  0xfb   : > { %847 = vmatpush.bf16.msra.mxu3 %v2924_v10 }
  0xfc   : > { %v2934_v31 = vpack.c.b16 %v890_v30, %v889_v28 }
  0xfe   : > { %903 = vmatpush.bf16.msrb.mxu1 %v2934_v31 }
 0x10a   : > { %v919_v32 = vpop.permute.xlu2 %918 }
 0x10b   : > { %v922_v33 = vrot.slane %v919_v32, 4 }
 0x10d   : > { %v926_v40 = vunpack.c.l.b16 %v922_v33 }
 0x12a   : > { %v921_v34 = vpop.permute.xlu0 %920 }
 0x12b   : > { %v923_v35 = vrot.slane %v921_v34, 4 }
 0x12d   : > { %v927_v42 = vunpack.c.l.b16 %v923_v35 }
 0x12f   : > { %v928_v44 = vpack.c.b16 %v927_v42, %v926_v40  ;;  %v952_v40 = vpop.permute.xlu2 %951 }
 0x131   : > { %v933_v45 = vsel %vm598_vm0, %v928_v44, 0 }
 0x132   : > { %942 = vmatpush.bf16.xpose.msra.mxu1 %v933_v45  ;;  %v3020_v27 = vpop.permute.xlu0 %924  ;;  %v950_v34 = vpop.permute.xlu1 %949  ;;  %v954_v45 = vrot.slane %v952_v40, 4 }
 0x133   : > { %v953_v42 = vrot.slane %v950_v34, 4 }
 0x135   : > { %v957_v39 = vunpack.c.l.b16 %v953_v42 }
 0x143   : > { %v614_v47 = vpop.f32.mrf.mxu0 }
 0x144   : > { %v615_v49 = vadd.f32 %v2941_v46, %v614_v47 }
 0x146   : > { %v710_v50 = vsel %vm709_vm1, %v615_v49, -inf }
 0x147   : > { %711 = vmax.xlane.f32.xlu0 %v710_v50 }
 0x14b   : > { %v616_v53 = vpop.f32.mrf.mxu0 }
 0x14c   : > { %v617_v54 = vadd.f32 %v2945_v36, %v616_v53  ;;  %v958_v53 = vunpack.c.l.b16 %v954_v45 }
 0x14e   : > { %v713_v55 = vsel %vm709_vm1, %v617_v54, -inf }
 0x14f   : > { %714 = vmax.xlane.f32.xlu0 %v713_v55  ;;  %v959_v55 = vpack.c.b16 %v958_v53, %v957_v39 }
 0x151   : > { %v964_v0 = vsel %vm598_vm0, %v959_v55, 0 }
 0x159   : > { %v644_v58 = vpop.f32.mrf.mxu3 }
 0x15a   : > { %v2955_v37 = vadd.f32 %v2952_v57, %v644_v58 }
 0x15c   : > { %v716_v59 = vsel %vm709_vm1, %v2955_v37, -inf }
 0x15d   : > { %717 = vmax.xlane.f32.xlu2 %v716_v59 }
 0x161   : > { %v646_v38 = vpop.f32.mrf.mxu3 }
 0x162   : > { %v2962_v63 = vadd.f32 %v2959_v61, %v646_v38 }
 0x164   : > { %v719_v1 = vsel %vm709_vm1, %v2962_v63, -inf }
 0x165   : > { %720 = vmax.xlane.f32.xlu2 %v719_v1 }
 0x169   : > { %v674_v5 = vpop.f32.mrf.mxu3 }
 0x16a   : > { %v2972_v6 = vadd.f32 %v2969_v2, %v674_v5 }
 0x16c   : > { %v722_v7 = vsel %vm709_vm1, %v2972_v6, -inf }
 0x16d   : > { %723 = vmax.xlane.f32.xlu0 %v722_v7 }
 0x171   : > { %v676_v9 = vpop.f32.mrf.mxu3 }
 0x172   : > { %v2979_v11 = vadd.f32 %v2976_v8, %v676_v9 }
 0x174   : > { %v725_v14 = vsel %vm709_vm1, %v2979_v11, -inf }
 0x175   : > { %726 = vmax.xlane.f32.xlu1 %v725_v14 }
 0x179   : > { %v704_v17 = vpop.f32.mrf.mxu3 }
 0x17a   : > { %v2989_v18 = vadd.f32 %v2986_v15, %v704_v17 }
 0x17c   : > { %v728_v19 = vsel %vm709_vm1, %v2989_v18, -inf }
 0x17d   : > { %729 = vmax.xlane.f32.xlu1 %v728_v19  ;;  %980 = vrot.lane.b32.xlu2 %v2887_v16, %s2625_s18 }
 0x181   : > { %v706_v24 = vpop.f32.mrf.mxu3  ;;  %955 = vrot.lane.b32.xlu0 %v2892_v22, %s2625_s18 }
 0x182   : > { %v3000_v25 = vadd.f32 %v2995_v21, %v706_v24 }
 0x184   : > { %v731_v26 = vsel %vm709_vm1, %v3000_v25, -inf }
 0x185   : > { %732 = vmax.xlane.f32.xlu1 %v731_v26  ;;  %986 = vrot.lane.b32.xlu2 %v2910_v51, %s2625_s18 }
 0x189   : > { %1013 = vrot.lane.b32.xlu0 %v2912_v52, %s2625_s18 }
 0x18d   : > { %1017 = vrot.lane.b32.xlu2 %v2926_v12, %s2625_s18 }
 0x191   : > { %1238 = vrot.lane.b32.xlu0 %v2848_v43, %s2626_s30 }
 0x195   : > { %1135 = vrot.lane.b32.xlu2 %v2919_v4, %s2625_s18 }
 0x19d   : > { %1240 = vrot.lane.b32.xlu2 %v2854_v48, %s2626_s30 }
 0x19e   : > { %982 = vrot.lane.b32.xlu1 %v2894_v23, %s2625_s18 }
 0x1a6   : > { %1011 = vrot.lane.b32.xlu1 %v2905_v41, %s2625_s18 }
 0x1ba   : > { %v712_v28 = vpop.xlane.xlu0 %711 }
 0x1bb   : > { %v734_v29 = vsub.f32 %v615_v49, %v712_v28 }
 0x1bd   : > { %v742_v30 = vmul.f32 1.442695, %v734_v29 }
 0x1bf   : > { %2481 = vpow2.f32 %v742_v30 }
 0x1c2   : > { %v715_v32 = vpop.xlane.xlu0 %714 }
 0x1c3   : > { %v735_v33 = vsub.f32 %v617_v54, %v715_v32 }
 0x1c5   : > { %v744_v35 = vmul.f32 1.442695, %v735_v33  ;;  %v3022_v44 = vpop.eup %2481 }
 0x1c6   : > { %v790_v47 = vpack.c.bf16 %v3022_v44, %v3022_v44 }
 0x1c7   : > { %2483 = vpow2.f32 %v744_v35 }
 0x1c8   : > { %v800_v54 = vunpack.c.l.b16 %v790_v47 }
 0x1cd   : > { %v3026_v50 = vpop.eup %2483 }
 0x1ce   : > { %v791_v49 = vpack.c.bf16 %v3026_v50, %v3026_v50 }
 0x1d0   : > { %v801_v56 = vunpack.c.l.b16 %v791_v49  ;;  %v718_v58 = vpop.xlane.xlu2 %717 }
 0x1d1   : > { %v736_v59 = vsub.f32 %v2955_v37, %v718_v58 }
 0x1d2   : > { %v802_v38 = vpack.c.b16 %v801_v56, %v800_v54 }
 0x1d3   : > { %v746_v1 = vmul.f32 1.442695, %v736_v59 }
 0x1d4   : > { %2286 = vmatmul.msk.bf16.vlgmr.msrb.gmra.mxu3 %vm709_vm1, %v802_v38 }
 0x1d5   : > { %973 = vmatpush.bf16.xpose.msrb.mxu3 %v964_v0  ;;  %2485 = vpow2.f32 %v746_v1 }
 0x1d8   : > { %v721_v5 = vpop.xlane.xlu2 %720 }
 0x1d9   : > { %v737_v7 = vsub.f32 %v2962_v63, %v721_v5 }
 0x1db   : > { %v748_v9 = vmul.f32 1.442695, %v737_v7  ;;  %v3034_v13 = vpop.eup %2485 }
 0x1dc   : > { %v792_v37 = vpack.c.bf16 %v3034_v13, %v3034_v13 }
 0x1dd   : > { %2487 = vpow2.f32 %v748_v9 }
 0x1de   : > { %v828_v29 = vunpack.c.l.b16 %v792_v37 }
 0x1e0   : > { %v981_v14 = vpop.permute.xlu2 %980  ;;  %v724_v17 = vpop.xlane.xlu0 %723 }
 0x1e1   : > { %v738_v19 = vsub.f32 %v2972_v6, %v724_v17 }
 0x1e3   : > { %v3039_v24 = vpop.eup %2487  ;;  %v750_v28 = vmul.f32 1.442695, %v738_v19 }
 0x1e4   : > { %v793_v26 = vpack.c.bf16 %v3039_v24, %v3039_v24 }
 0x1e5   : > { %2489 = vpow2.f32 %v750_v28 }
 0x1e6   : > { %v829_v30 = vunpack.c.l.b16 %v793_v26 }
 0x1e8   : > { %v830_v63 = vpack.c.b16 %v829_v30, %v828_v29  ;;  %v727_v32 = vpop.xlane.xlu1 %726  ;;  %v987_v33 = vpop.permute.xlu2 %986 }
 0x1e9   : > { %v739_v34 = vsub.f32 %v2979_v11, %v727_v32 }
 0x1ea   : > { %2287 = vmatmul.msk.bf16.vlgmr.msra.gmra.mxu3 %vm709_vm1, %v830_v63 }
 0x1eb   : > { %v752_v6 = vmul.f32 1.442695, %v739_v34  ;;  %v3045_v35 = vpop.eup %2489 }
 0x1ec   : > { %v794_v39 = vpack.c.bf16 %v3045_v35, %v3045_v35 }
 0x1ed   : > { %2491 = vpow2.f32 %v752_v6  ;;  %v984_v6 = vrot.slane %v981_v14, 4 }
 0x1ee   : > { %v856_v55 = vunpack.c.l.b16 %v794_v39 }
 0x1ef   : > { %v988_v39 = vunpack.c.l.b16 %v984_v6 }
 0x1f0   : > { %v730_v40 = vpop.xlane.xlu1 %729  ;;  %v1018_v42 = vpop.permute.xlu2 %1017 }
 0x1f1   : > { %v740_v45 = vsub.f32 %v2989_v18, %v730_v40 }
 0x1f3   : > { %v3050_v47 = vpop.eup %2491  ;;  %v956_v53 = vpop.permute.xlu0 %955  ;;  %v754_v11 = vmul.f32 1.442695, %v740_v45 }
 0x1f4   : > { %v795_v49 = vpack.c.bf16 %v3050_v47, %v3050_v47 }
 0x1f5   : > { %2493 = vpow2.f32 %v754_v11 }
 0x1f6   : > { %v857_v54 = vunpack.c.l.b16 %v795_v49 }
 0x1f8   : > { %v858_v56 = vpack.c.b16 %v857_v54, %v856_v55  ;;  %v733_v58 = vpop.xlane.xlu1 %732  ;;  %v1136_v59 = vpop.permute.xlu2 %1135 }
 0x1f9   : > { %v741_v38 = vsub.f32 %v3000_v25, %v733_v58  ;;  %1148 = vmatpush.bf16.msrb.mxu2 %v1136_v59 }
 0x1fa   : > { %2288 = vmatmul.msk.bf16.vlgmr.msra.gmra.mxu0 %vm709_vm1, %v858_v56  ;;  %2291 = vmatmul.msk.bf16.vlgmr.msrb.gmra.mxu3 %vm598_vm0, %v956_v53 }
 0x1fb   : > { %v756_v18 = vmul.f32 1.442695, %v741_v38  ;;  %v1014_v0 = vpop.permute.xlu0 %1013  ;;  %v3057_v1 = vpop.eup %2493 }
 0x1fc   : > { %v796_v7 = vpack.c.bf16 %v3057_v1, %v3057_v1  ;;  %v1016_v11 = vrot.slane %v1014_v0, 4 }
 0x1fd   : > { %2495 = vpow2.f32 %v756_v18 }
 0x1fe   : > { %v884_v26 = vunpack.c.l.b16 %v796_v7  ;;  %v1020_v58 = vunpack.c.l.b16 %v1016_v11 }
 0x200   : > { %v1241_v5 = vpop.permute.xlu2 %1240 }
 0x201   : > { %v1243_v9 = vrot.slane %v1241_v5, 4 }
 0x203   : > { %v3061_v17 = vpop.eup %2495  ;;  %v1239_v19 = vpop.permute.xlu0 %1238  ;;  %v1247_v29 = vunpack.c.l.b16 %v1243_v9 }
 0x204   : > { %v797_v25 = vpack.c.bf16 %v3061_v17, %v3061_v17  ;;  %v1242_v37 = vrot.slane %v1239_v19, 4 }
 0x206   : > { %v885_v28 = vunpack.c.l.b16 %v797_v25  ;;  %v1246_v30 = vunpack.c.l.b16 %v1242_v37 }
 0x208   : > { %v1248_v63 = vpack.c.b16 %v1247_v29, %v1246_v30  ;;  %v886_v32 = vpack.c.b16 %v885_v28, %v884_v26 }
 0x20a   : > { %2289 = vmatmul.msk.bf16.vlgmr.msrb.gmra.mxu1 %vm709_vm1, %v886_v32  ;;  %v1253_v34 = vsel %vm598_vm0, %v1248_v63, 0 }
 0x20b   : > { %1262 = vmatpush.bf16.xpose.msra.mxu2 %v1253_v34 }
 0x210   : > { %v983_v40 = vpop.permute.xlu1 %982 }
 0x211   : > { %v985_v45 = vrot.slane %v983_v40, 4 }
 0x213   : > { %v989_v53 = vunpack.c.l.b16 %v985_v45 }
 0x215   : > { %v990_v49 = vpack.c.b16 %v989_v53, %v988_v39 }
 0x217   : > { %v995_v55 = vsel %vm598_vm0, %v990_v49, 0 }
 0x218   : > { %v1012_v54 = vpop.permute.xlu1 %1011  ;;  %1004 = vmatpush.bf16.xpose.msrb.mxu0 %v995_v55 }
 0x219   : > { %v1015_v56 = vrot.slane %v1012_v54, 4 }
 0x21a   : > { %2290 = vmatmul.msk.bf16.vlgmr.msra.gmra.mxu1 %vm598_vm0, %v3020_v27 }
 0x21b   : > { %v1019_v59 = vunpack.c.l.b16 %v1015_v56 }
 0x21d   : > { %v1021_v38 = vpack.c.b16 %v1020_v58, %v1019_v59 }
 0x21f   : > { %2292 = vmatmul.msk.bf16.vlgmr.msrb.gmra.mxu0 %vm598_vm0, %v987_v33  ;;  %v1026_v14 = vsel %vm598_vm0, %v1021_v38, 0 }
 0x220   : > { %1035 = vmatpush.bf16.xpose.msrb.mxu1 %v1026_v14 }
 0x22a   : > { %2293 = vmatmul.msk.bf16.vlgmr.msrb.gmra.mxu1 %vm598_vm0, %v1018_v42 }
 0x257   : > { %v3073_v18 = vpop.f32.mrf.mxu3 }
 0x25f   : > { %v3075_v0 = vpop.f32.mrf.mxu3 }
 0x26d   : > { %v3077_v5 = vpop.f32.mrf.mxu3 }
 0x275   : > { %v3079_v7 = vpop.f32.mrf.mxu3 }
 0x277   : > { %v3091_v37 = vpop.f32.mrf.mxu0 }
 0x27d   : > { %v975_v9 = vpop.f32.mrf.mxu3 }
 0x27e   : > { %v3082_v27 = vadd.f32 %v2952_v57, %v975_v9 }
 0x27f   : > { %v3093_v26 = vpop.f32.mrf.mxu0 }
 0x280   : > { %v1048_v33 = vsel %vm709_vm1, %v3082_v27, -inf }
 0x281   : > { %1049 = vmax.xlane.f32.xlu2 %v1048_v33 }
 0x285   : > { %v977_v19 = vpop.f32.mrf.mxu3 }
 0x286   : > { %v3087_v25 = vadd.f32 %v2959_v61, %v977_v19 }
 0x287   : > { %v3095_v28 = vpop.f32.mrf.mxu1 }
 0x288   : > { %v1051_v42 = vsel %vm709_vm1, %v3087_v25, -inf }
 0x289   : > { %1052 = vmax.xlane.f32.xlu1 %v1051_v42 }
 0x28f   : > { %v3100_v63 = vpop.f32.mrf.mxu1 }
 0x290   : > { %3614 = vst [vmem:[#allocation2_spill] sm:$0xff] %v3100_v63 }
 0x297   : > { %v944_v45 = vpop.f32.mrf.mxu1 }
 0x298   : > { %v3110_v39 = vadd.f32 %v2941_v46, %v944_v45 }
 0x299   : > { %1185 = vrot.lane.b32.xlu2 %v2931_v20, %s2625_s18 }
 0x29a   : > { %v1042_v53 = vsel %vm709_vm1, %v3110_v39, -inf }
 0x29c   : > { %v1006_v29 = vpop.f32.mrf.mxu0 }
 0x29d   : > { %v1007_v30 = vadd.f32 %v2969_v2, %v1006_v29 }
 0x29f   : > { %v1054_v32 = vsel %vm709_vm1, %v1007_v30, -inf  ;;  %v946_v49 = vpop.f32.mrf.mxu1 }
 0x2a0   : > { %1055 = vmax.xlane.f32.xlu0 %v1054_v32  ;;  %v3129_v11 = vadd.f32 %v2945_v36, %v946_v49 }
 0x2a1   : > { %1269 = vrot.lane.b32.xlu2 %v2864_v60, %s2626_s30 }
 0x2a2   : > { %v1045_v55 = vsel %vm709_vm1, %v3129_v11, -inf }
 0x2a4   : > { %v1008_v34 = vpop.f32.mrf.mxu0 }
 0x2a5   : > { %v1009_v6 = vadd.f32 %v2976_v8, %v1008_v34 }
 0x2a7   : > { %v1057_v40 = vsel %vm709_vm1, %v1009_v6, -inf  ;;  %v1037_v54 = vpop.f32.mrf.mxu1 }
 0x2a8   : > { %1058 = vmax.xlane.f32.xlu1 %v1057_v40  ;;  %v3157_v42 = vadd.f32 %v2986_v15, %v1037_v54 }
 0x2a9   : > { %1271 = vrot.lane.b32.xlu2 %v2875_v3, %s2626_s30 }
 0x2af   : > { %v1039_v56 = vpop.f32.mrf.mxu1 }
 0x2b0   : > { %1043 = vmax.xlane.f32.xlu1 %v1042_v53  ;;  %v3140_v58 = vadd.f32 %v2995_v21, %v1039_v56 }
 0x2b1   : > { %1300 = vrot.lane.b32.xlu2 %v2887_v16, %s2626_s30 }
 0x2b4   : > { %1244 = vrot.lane.b32.xlu0 %v2867_v62, %s2626_s30 }
 0x2b9   : > { %1302 = vrot.lane.b32.xlu2 %v2894_v23, %s2626_s30 }
 0x2c1   : > { %1275 = vrot.lane.b32.xlu2 %v2892_v22, %s2626_s30 }
 0x2c9   : > { %1160 = vrot.lane.b32.xlu1 %v2924_v10, %s2625_s18  ;;  %1331 = vrot.lane.b32.xlu2 %v2905_v41, %s2626_s30 }
 0x2d1   : > { %1333 = vrot.lane.b32.xlu2 %v2912_v52, %s2626_s30 }
 0x2d9   : > { %1560 = vrot.lane.b32.xlu2 %v2854_v48, %s2627_s7  ;;  %v1063_v48 = vsel %vm709_vm1, %v3140_v58, -inf }
 0x2de   : > { %1046 = vmax.xlane.f32.xlu0 %v1045_v55 }
 0x2e1   : > { %1480 = vrot.lane.b32.xlu2 %v2924_v10, %s2626_s30 }
 0x2e9   : > { %1564 = vrot.lane.b32.xlu2 %v2867_v62, %s2627_s7 }
 0x2f1   : > { %1620 = vrot.lane.b32.xlu2 %v2887_v16, %s2627_s7 }
 0x2f2   : > { %1210 = vrot.lane.b32.xlu0 %v2934_v31, %s2625_s18 }
 0x2f3   : > { %1064 = vmax.xlane.f32.xlu1 %v1063_v48 }
 0x2f4   : > { %v1050_v59 = vpop.xlane.xlu2 %1049 }
 0x2f9   : > { %1622 = vrot.lane.b32.xlu2 %v2894_v23, %s2627_s7 }
 0x2fc   : > { %v1186_v38 = vpop.permute.xlu2 %1185  ;;  %v1053_v16 = vpop.xlane.xlu1 %1052 }
 0x2fd   : > { %1198 = vmatpush.bf16.msra.mxu0 %v1186_v38  ;;  %v1069_v48 = vsub.f32 %v3087_v25, %v1053_v16 }
 0x301   : > { %1589 = vrot.lane.b32.xlu2 %v2864_v60, %s2627_s7  ;;  %v1060_v60 = vsel %vm709_vm1, %v3157_v42, -inf }
 0x304   : > { %v1270_v62 = vpop.permute.xlu2 %1269 }
 0x30c   : > { %v1272_v14 = vpop.permute.xlu2 %1271  ;;  %1306 = vrot.lane.b32.xlu1 %v2910_v51, %s2626_s30 }
 0x30d   : > { %v1274_v25 = vrot.slane %v1272_v14, 4 }
 0x313   : > { %v1056_v9 = vpop.xlane.xlu0 %1055 }
 0x314   : > { %v1070_v33 = vsub.f32 %v1007_v30, %v1056_v9  ;;  %v1301_v19 = vpop.permute.xlu2 %1300  ;;  %1455 = vrot.lane.b32.xlu1 %v2919_v4, %s2626_s30 }
 0x315   : > { %v1304_v29 = vrot.slane %v1301_v19, 4 }
 0x316   : > { %v1082_v23 = vmul.f32 1.442695, %v1070_v33  ;;  %v1068_v33 = vsub.f32 %v3082_v27, %v1050_v59  ;;  %v1273_v27 = vrot.slane %v1270_v62, 4 }
 0x317   : > { %v1308_v53 = vunpack.c.l.b16 %v1304_v29 }
 0x318   : > { %2497 = vpow2.f32 %v1082_v23  ;;  %v1080_v23 = vmul.f32 1.442695, %v1069_v48 }
 0x31b   : > { %v1059_v32 = vpop.xlane.xlu1 %1058 }
 0x31c   : > { %v1071_v34 = vsub.f32 %v1009_v6, %v1059_v32  ;;  %v1303_v40 = vpop.permute.xlu2 %1302  ;;  %1505 = vrot.lane.b32.xlu1 %v2931_v20, %s2626_s30  ;;  %1061 = vmax.xlane.f32.xlu0 %v1060_v60  ;;  %v1078_v60 = vmul.f32 1.442695, %v1068_v33 }
 0x31d   : > { %v1305_v30 = vrot.slane %v1303_v40, 4 }
 0x31e   : > { %v1084_v45 = vmul.f32 1.442695, %v1071_v34  ;;  %v3163_v54 = vpop.eup %2497 }
 0x31f   : > { %v1309_v49 = vunpack.c.l.b16 %v1305_v30  ;;  %v1126_v6 = vpack.c.bf16 %v3163_v54, %v3163_v54 }
 0x320   : > { %2499 = vpow2.f32 %v1084_v45  ;;  %v1278_v45 = vunpack.c.l.b16 %v1274_v25 }
 0x321   : > { %v1310_v55 = vpack.c.b16 %v1309_v49, %v1308_v53  ;;  %v1182_v29 = vunpack.c.l.b16 %v1126_v6  ;;  %2501 = vpow2.f32 %v1080_v23 }
 0x322   : > { %2503 = vpow2.f32 %v1078_v60 }
 0x323   : > { %v1315_v56 = vsel %vm598_vm0, %v1310_v55, 0  ;;  %v1044_v59 = vpop.xlane.xlu1 %1043  ;;  %v1277_v55 = vunpack.c.l.b16 %v1273_v27 }
 0x324   : > { %1324 = vmatpush.bf16.xpose.msrb.mxu0 %v1315_v56  ;;  %v1276_v38 = vpop.permute.xlu2 %1275 }
 0x325   : > { %v1279_v48 = vpack.c.b16 %v1278_v45, %v1277_v55 }
 0x326   : > { %v3169_v9 = vpop.eup %2499 }
 0x327   : > { %v1127_v19 = vpack.c.bf16 %v3169_v9, %v3169_v9  ;;  %v3177_v16 = vpop.eup %2501 }
 0x328   : > { %v3179_v30 = vpop.eup %2503  ;;  %v1125_v49 = vpack.c.bf16 %v3177_v16, %v3177_v16 }
 0x329   : > { %v1183_v32 = vunpack.c.l.b16 %v1127_v19  ;;  %v1124_v56 = vpack.c.bf16 %v3179_v30, %v3179_v30  ;;  %v1284_v19 = vsel %vm598_vm0, %v1279_v48, 0 }
 0x32a   : > { %v1158_v14 = vunpack.c.l.b16 %v1125_v49 }
 0x32b   : > { %v1184_v34 = vpack.c.b16 %v1183_v32, %v1182_v29  ;;  %v1157_v6 = vunpack.c.l.b16 %v1124_v56  ;;  %v1245_v32 = vpop.permute.xlu0 %1244 }
 0x32c   : > { %v1332_v40 = vpop.permute.xlu2 %1331 }
 0x32d   : > { %2296 = vmatmul.msk.bf16.vlgmr.msra.gmra.mxu0 %vm709_vm1, %v1184_v34  ;;  %v1159_v23 = vpack.c.b16 %v1158_v14, %v1157_v6  ;;  %v1335_v55 = vrot.slane %v1332_v40, 4 }
 0x330   : > { %1337 = vrot.lane.b32.xlu0 %v2926_v12, %s2626_s30 }
 0x334   : > { %v1334_v53 = vpop.permute.xlu2 %1333 }
 0x335   : > { %v1336_v49 = vrot.slane %v1334_v53, 4 }
 0x337   : > { %v1340_v48 = vunpack.c.l.b16 %v1336_v49 }
 0x338   : > { %1558 = vrot.lane.b32.xlu0 %v2848_v43, %s2627_s7  ;;  %v1066_v43 = vsub.f32 %v3110_v39, %v1044_v59  ;;  %v1339_v59 = vunpack.c.l.b16 %v1335_v55 }
 0x33a   : > { %v1074_v60 = vmul.f32 1.442695, %v1066_v43  ;;  %v1341_v6 = vpack.c.b16 %v1340_v48, %v1339_v59 }
 0x33b   : > { %v1161_v33 = vpop.permute.xlu1 %1160 }
 0x33c   : > { %1173 = vmatpush.bf16.msra.mxu3 %v1161_v33  ;;  %v3187_v62 = vpop.permute.xlu2 %1560  ;;  %2505 = vpow2.f32 %v1074_v60  ;;  %v1346_v53 = vsel %vm598_vm0, %v1341_v6, 0 }
 0x33f   : > { %2295 = vmatmul.msk.bf16.vlgmr.msra.gmra.mxu3 %vm709_vm1, %v1159_v23 }
 0x340   : > { %1293 = vmatpush.bf16.xpose.msrb.mxu3 %v1284_v19  ;;  %1591 = vrot.lane.b32.xlu0 %v2875_v3, %s2627_s7 }
 0x342   : > { %v3196_v45 = vpop.eup %2505 }
 0x343   : > { %v1122_v3 = vpack.c.bf16 %v3196_v45, %v3196_v45 }
 0x344   : > { %v1481_v29 = vpop.permute.xlu2 %1480 }
 0x348   : > { %1493 = vmatpush.bf16.msra.mxu3 %v1481_v29 }
 0x34c   : > { %v3206_v19 = vpop.permute.xlu2 %1564 }
 0x34f   : > { %2299 = vmatmul.msk.bf16.vlgmr.msrb.gmra.mxu3 %vm598_vm0, %v1276_v38  ;;  %v1132_v38 = vunpack.c.l.b16 %v1122_v3 }
 0x351   : > { %v1047_v34 = vpop.xlane.xlu0 %1046 }
 0x352   : > { %v1067_v25 = vsub.f32 %v3129_v11, %v1047_v34 }
 0x354   : > { %v1076_v27 = vmul.f32 1.442695, %v1067_v25  ;;  %v1621_v40 = vpop.permute.xlu2 %1620 }
 0x355   : > { %v1624_v34 = vrot.slane %v1621_v40, 4 }
 0x356   : > { %2507 = vpow2.f32 %v1076_v27 }
 0x357   : > { %v1628_v3 = vunpack.c.l.b16 %v1624_v34 }
 0x35c   : > { %v3200_v56 = vpop.eup %2507  ;;  %v1623_v43 = vpop.permute.xlu2 %1622 }
 0x35d   : > { %v1123_v39 = vpack.c.bf16 %v3200_v56, %v3200_v56  ;;  %v1625_v60 = vrot.slane %v1623_v43, 4 }
 0x35f   : > { %v1133_v14 = vunpack.c.l.b16 %v1123_v39  ;;  %v1629_v27 = vunpack.c.l.b16 %v1625_v60 }
 0x361   : > { %v1134_v11 = vpack.c.b16 %v1133_v14, %v1132_v38  ;;  %v1630_v55 = vpack.c.b16 %v1629_v27, %v1628_v3 }
 0x363   : > { %2294 = vmatmul.msk.bf16.vlgmr.msrb.gmra.mxu2 %vm709_vm1, %v1134_v11 }
 0x364   : > { %v1211_v33 = vpop.permute.xlu0 %1210  ;;  %v1590_v27 = vpop.permute.xlu2 %1589 }
 0x365   : > { %1223 = vmatpush.bf16.msra.mxu1 %v1211_v33  ;;  %v1593_v3 = vrot.slane %v1590_v27, 4 }
 0x366   : > { %v1065_v23 = vpop.xlane.xlu1 %1064 }
 0x367   : > { %v1073_v49 = vsub.f32 %v3140_v58, %v1065_v23 }
 0x369   : > { %1355 = vmatpush.bf16.xpose.msrb.mxu1 %v1346_v53  ;;  %v1088_v48 = vmul.f32 1.442695, %v1073_v49 }
 0x36b   : > { %2509 = vpow2.f32 %v1088_v48 }
 0x371   : > { %v3213_v6 = vpop.eup %2509 }
 0x372   : > { %v1129_v11 = vpack.c.bf16 %v3213_v6, %v3213_v6 }
 0x373   : > { %2298 = vmatmul.msk.bf16.vlgmr.msra.gmra.mxu2 %vm598_vm0, %v1245_v32  ;;  %v1635_v32 = vsel %vm598_vm0, %v1630_v55, 0 }
 0x374   : > { %v1208_v53 = vunpack.c.l.b16 %v1129_v11 }
 0x37e   : > { %v1307_v29 = vpop.permute.xlu1 %1306 }
 0x37f   : > { %2300 = vmatmul.msk.bf16.vlgmr.msrb.gmra.mxu0 %vm598_vm0, %v1307_v29 }
 0x386   : > { %v1456_v25 = vpop.permute.xlu1 %1455 }
 0x387   : > { %1468 = vmatpush.bf16.msrb.mxu2 %v1456_v25 }
 0x38e   : > { %v1506_v39 = vpop.permute.xlu1 %1505 }
 0x38f   : > { %1518 = vmatpush.bf16.msra.mxu0 %v1506_v39  ;;  %v1062_v38 = vpop.xlane.xlu0 %1061 }
 0x390   : > { %v1072_v59 = vsub.f32 %v3157_v42, %v1062_v38  ;;  %v1563_v42 = vrot.slane %v3187_v62, 4  ;;  %v1597_v38 = vunpack.c.l.b16 %v1593_v3 }
 0x392   : > { %v1086_v14 = vmul.f32 1.442695, %v1072_v59  ;;  %v1567_v34 = vunpack.c.l.b16 %v1563_v42 }
 0x393   : > { %1644 = vmatpush.bf16.xpose.msrb.mxu0 %v1635_v32 }
 0x394   : > { %2511 = vpow2.f32 %v1086_v14 }
 0x39a   : > { %v3217_v58 = vpop.eup %2511 }
 0x39b   : > { %v1128_v33 = vpack.c.bf16 %v3217_v58, %v3217_v58 }
 0x39d   : > { %v1207_v40 = vunpack.c.l.b16 %v1128_v33 }
 0x39f   : > { %v1209_v23 = vpack.c.b16 %v1208_v53, %v1207_v40 }
 0x3a1   : > { %2297 = vmatmul.msk.bf16.vlgmr.msra.gmra.mxu1 %vm709_vm1, %v1209_v23 }
 0x3a2   : > { %v1338_v29 = vpop.permute.xlu0 %1337 }
 0x3aa   : > { %v1559_v43 = vpop.permute.xlu0 %1558 }
 0x3ab   : > { %v1562_v60 = vrot.slane %v1559_v43, 4 }
 0x3ad   : > { %v1566_v25 = vunpack.c.l.b16 %v1562_v60  ;;  %v3236_v60 = vpop.f32.mrf.mxu0 }
 0x3af   : > { %v1568_v49 = vpack.c.b16 %v1567_v34, %v1566_v25 }
 0x3b1   : > { %2301 = vmatmul.msk.bf16.vlgmr.msrb.gmra.mxu1 %vm598_vm0, %v1338_v29  ;;  %v1573_v55 = vsel %vm598_vm0, %v1568_v49, 0 }
 0x3b2   : > { %1582 = vmatpush.bf16.xpose.msra.mxu2 %v1573_v55  ;;  %v1592_v48 = vpop.permute.xlu0 %1591 }
 0x3b3   : > { %v1594_v39 = vrot.slane %v1592_v48, 4 }
 0x3b5   : > { %v1598_v32 = vunpack.c.l.b16 %v1594_v39  ;;  %v3240_v25 = vpop.f32.mrf.mxu0 }
 0x3b7   : > { %v1599_v59 = vpack.c.b16 %v1598_v32, %v1597_v38 }
 0x3b9   : > { %v1604_v14 = vsel %vm598_vm0, %v1599_v59, 0 }
 0x3ba   : > { %1613 = vmatpush.bf16.xpose.msrb.mxu3 %v1604_v14 }
 0x3c2   : > { %v3226_v62 = vpop.f32.mrf.mxu3 }
 0x3ca   : > { %v3228_v11 = vpop.f32.mrf.mxu3 }
 0x3d2   : > { %v1295_v33 = vpop.f32.mrf.mxu3 }
 0x3d3   : > { %v1296_v53 = vadd.f32 %v2952_v57, %v1295_v33 }
 0x3d5   : > { %v1368_v40 = vsel %vm709_vm1, %v1296_v53, -inf }
 0x3d6   : > { %1369 = vmax.xlane.f32.xlu0 %v1368_v40 }
 0x3da   : > { %v1297_v23 = vpop.f32.mrf.mxu3 }
 0x3db   : > { %v1298_v29 = vadd.f32 %v2959_v61, %v1297_v23 }
 0x3dd   : > { %v1371_v42 = vsel %vm709_vm1, %v1298_v29, -inf }
 0x3de   : > { %1372 = vmax.xlane.f32.xlu2 %v1371_v42 }
 0x3e6   : > { %v3234_v43 = vpop.f32.mrf.mxu2 }
 0x3ee   : > { %v3238_v34 = vpop.f32.mrf.mxu2 }
 0x3f6   : > { %v1264_v27 = vpop.f32.mrf.mxu2 }
 0x3f7   : > { %v1265_v33 = vadd.f32 %v2941_v46, %v1264_v27 }
 0x3f9   : > { %v1362_v40 = vsel %vm709_vm1, %v1265_v33, -inf }
 0x3fc   : > { %v1326_v49 = vpop.f32.mrf.mxu0 }
 0x3fd   : > { %v1327_v3 = vadd.f32 %v2969_v2, %v1326_v49 }
 0x3fe   : > { %v1266_v55 = vpop.f32.mrf.mxu2 }
 0x3ff   : > { %v1267_v48 = vadd.f32 %v2945_v36, %v1266_v55  ;;  %v1374_v39 = vsel %vm709_vm1, %v1327_v3, -inf }
 0x400   : > { %1375 = vmax.xlane.f32.xlu0 %v1374_v39 }
 0x401   : > { %v1365_v38 = vsel %vm709_vm1, %v1267_v48, -inf }
 0x402   : > { %1366 = vmax.xlane.f32.xlu1 %v1365_v38 }
 0x404   : > { %v1328_v32 = vpop.f32.mrf.mxu0 }
 0x405   : > { %v1329_v59 = vadd.f32 %v2976_v8, %v1328_v32 }
 0x407   : > { %v1377_v14 = vsel %vm709_vm1, %v1329_v59, -inf }
 0x408   : > { %1378 = vmax.xlane.f32.xlu2 %v1377_v14 }
 0x410   : > { %1363 = vmax.xlane.f32.xlu2 %v1362_v40 }
 0x41e   : > { %v3250_v23 = vpop.f32.mrf.mxu1 }
 0x426   : > { %v3252_v42 = vpop.f32.mrf.mxu1 }
 0x428   : > { %1530 = vrot.lane.b32.xlu2 %v2934_v31, %s2626_s30 }
 0x42e   : > { %v1357_v49 = vpop.f32.mrf.mxu1 }
 0x42f   : > { %v3257_v55 = vadd.f32 %v2986_v15, %v1357_v49 }
 0x430   : > { %1595 = vrot.lane.b32.xlu2 %v2892_v22, %s2627_s7 }
 0x431   : > { %v1380_v27 = vsel %vm709_vm1, %v3257_v55, -inf }
 0x432   : > { %1381 = vmax.xlane.f32.xlu0 %v1380_v27 }
 0x436   : > { %v1359_v39 = vpop.f32.mrf.mxu1 }
 0x437   : > { %v3264_v38 = vadd.f32 %v2995_v21, %v1359_v39 }
 0x438   : > { %1651 = vrot.lane.b32.xlu2 %v2905_v41, %s2627_s7 }
 0x439   : > { %v1383_v32 = vsel %vm709_vm1, %v3264_v38, -inf }
 0x43a   : > { %1384 = vmax.xlane.f32.xlu1 %v1383_v32 }
 0x440   : > { %1657 = vrot.lane.b32.xlu2 %v2926_v12, %s2627_s7 }
 0x446   : > { %1653 = vrot.lane.b32.xlu0 %v2912_v52, %s2627_s7 }
 0x448   : > { %1825 = vrot.lane.b32.xlu2 %v2931_v20, %s2627_s7 }
 0x449   : > { %v1370_v22 = vpop.xlane.xlu0 %1369 }
 0x44a   : > { %v1388_v14 = vsub.f32 %v1296_v53, %v1370_v22 }
 0x44c   : > { %v1398_v40 = vmul.f32 1.442695, %v1388_v14 }
 0x44e   : > { %1850 = vrot.lane.b32.xlu0 %v2934_v31, %s2627_s7  ;;  %2513 = vpow2.f32 %v1398_v40 }
 0x451   : > { %v1373_v41 = vpop.xlane.xlu2 %1372 }
 0x452   : > { %v1389_v49 = vsub.f32 %v1298_v29, %v1373_v41 }
 0x453   : > { %1626 = vrot.lane.b32.xlu1 %v2910_v51, %s2627_s7 }
 0x454   : > { %v1400_v27 = vmul.f32 1.442695, %v1389_v49  ;;  %v2514_v12 = vpop.eup %2513 }
 0x455   : > { %v1444_v39 = vpack.c.bf16 %v2514_v12, %v2514_v12 }
 0x456   : > { %2515 = vpow2.f32 %v1400_v27 }
 0x457   : > { %v1477_v53 = vunpack.c.l.b16 %v1444_v39 }
 0x45b   : > { %1775 = vrot.lane.b32.xlu1 %v2919_v4, %s2627_s7 }
 0x45c   : > { %v3282_v52 = vpop.eup %2515 }
 0x45d   : > { %v1445_v20 = vpack.c.bf16 %v3282_v52, %v3282_v52 }
 0x45f   : > { %v1478_v31 = vunpack.c.l.b16 %v1445_v20 }
 0x461   : > { %v1479_v32 = vpack.c.b16 %v1478_v31, %v1477_v53 }
 0x463   : > { %1800 = vrot.lane.b32.xlu1 %v2924_v10, %s2627_s7  ;;  %2303 = vmatmul.msk.bf16.vlgmr.msra.gmra.mxu3 %vm709_vm1, %v1479_v32 }
 0x473   : > { %v1376_v51 = vpop.xlane.xlu0 %1375 }
 0x474   : > { %v1390_v29 = vsub.f32 %v1327_v3, %v1376_v51 }
 0x475   : > { %v1367_v14 = vpop.xlane.xlu1 %1366 }
 0x476   : > { %v1402_v22 = vmul.f32 1.442695, %v1390_v29  ;;  %v1387_v4 = vsub.f32 %v1267_v48, %v1367_v14 }
 0x478   : > { %2517 = vpow2.f32 %v1402_v22  ;;  %v1396_v27 = vmul.f32 1.442695, %v1387_v4  ;;  %v1090_v22 = vsel %vm709_vm1, %v3196_v45, 0.0 }
 0x47b   : > { %v1379_v40 = vpop.xlane.xlu2 %1378 }
 0x47c   : > { %v1391_v41 = vsub.f32 %v1329_v59, %v1379_v40 }
 0x47e   : > { %v1404_v49 = vmul.f32 1.442695, %v1391_v41  ;;  %v2518_v63 = vpop.eup %2517 }
 0x47f   : > { %v1446_v53 = vpack.c.bf16 %v2518_v63, %v2518_v63  ;;  %v1422_v45 = vsel %vm709_vm1, %v2518_v63, 0.0 }
 0x480   : > { %2519 = vpow2.f32 %v1404_v49 }
 0x481   : > { %2521 = vpow2.f32 %v1396_v27  ;;  %v1502_v32 = vunpack.c.l.b16 %v1446_v53 }
 0x483   : > { %v1364_v39 = vpop.xlane.xlu2 %1363 }
 0x484   : > { %v1386_v20 = vsub.f32 %v1265_v33, %v1364_v39 }
 0x486   : > { %v3289_v31 = vpop.eup %2519  ;;  %v1394_v10 = vmul.f32 1.442695, %v1386_v20 }
 0x487   : > { %v1447_v3 = vpack.c.bf16 %v3289_v31, %v3289_v31  ;;  %v2522_v29 = vpop.eup %2521 }
 0x488   : > { %2523 = vpow2.f32 %v1394_v10  ;;  %v1443_v14 = vpack.c.bf16 %v2522_v29, %v2522_v29  ;;  %v1413_v20 = vsel %vm709_vm1, %v2522_v29, 0.0  ;;  %v1105_v10 = vsel %vm709_vm1, %v3169_v9, 0.0 }
 0x489   : > { %v1503_v51 = vunpack.c.l.b16 %v1447_v3  ;;  %v1416_v3 = vsel %vm709_vm1, %v2514_v12, 0.0 }
 0x48a   : > { %v1453_v41 = vunpack.c.l.b16 %v1443_v14 }
 0x48b   : > { %v1504_v48 = vpack.c.b16 %v1503_v51, %v1502_v32  ;;  %v1531_v59 = vpop.permute.xlu2 %1530  ;;  %v1099_v51 = vsel %vm709_vm1, %v3177_v16, 0.0 }
 0x48c   : > { %1543 = vmatpush.bf16.msra.mxu1 %v1531_v59 }
 0x48d   : > { %1091 = vadd.xlane.f32.xlu1 %v1090_v22  ;;  %2304 = vmatmul.msk.bf16.vlgmr.msra.gmra.mxu0 %vm709_vm1, %v1504_v48 }
 0x48e   : > { %v2524_v33 = vpop.eup %2523 }
 0x48f   : > { %v1442_v40 = vpack.c.bf16 %v2524_v33, %v2524_v33  ;;  %v1410_v4 = vsel %vm709_vm1, %v2524_v33, 0.0 }
 0x490   : > { %1411 = vadd.xlane.f32.xlu0 %v1410_v4 }
 0x491   : > { %v1452_v49 = vunpack.c.l.b16 %v1442_v40 }
 0x493   : > { %v1454_v27 = vpack.c.b16 %v1453_v41, %v1452_v49  ;;  %v1596_v39 = vpop.permute.xlu2 %1595 }
 0x494   : > { %2307 = vmatmul.msk.bf16.vlgmr.msrb.gmra.mxu3 %vm598_vm0, %v1596_v39 }
 0x495   : > { %2302 = vmatmul.msk.bf16.vlgmr.msrb.gmra.mxu2 %vm709_vm1, %v1454_v27  ;;  %1414 = vadd.xlane.f32.xlu1 %v1413_v20 }
 0x498   : > { %1423 = vadd.xlane.f32.xlu0 %v1422_v45 }
 0x49b   : > { %v1652_v53 = vpop.permute.xlu2 %1651 }
 0x49c   : > { %v1655_v33 = vrot.slane %v1652_v53, 4 }
 0x49d   : > { %1106 = vadd.xlane.f32.xlu1 %v1105_v10 }
 0x49e   : > { %v1659_v41 = vunpack.c.l.b16 %v1655_v33 }
 0x4a0   : > { %1417 = vadd.xlane.f32.xlu0 %v1416_v3 }
 0x4a3   : > { %v1658_v32 = vpop.permute.xlu2 %1657 }
 0x4a5   : > { %1100 = vadd.xlane.f32.xlu1 %v1099_v51  ;;  %2306 = vmatmul.msk.bf16.vlgmr.msra.gmra.mxu2 %vm598_vm0, %v3206_v19  ;;  %v1382_v29 = vpop.xlane.xlu0 %1381 }
 0x4a6   : > { %v1392_v63 = vsub.f32 %v3257_v55, %v1382_v29 }
 0x4a8   : > { %v1406_v48 = vmul.f32 1.442695, %v1392_v63 }
 0x4aa   : > { %2525 = vpow2.f32 %v1406_v48 }
 0x4ab   : > { %v1826_v59 = vpop.permute.xlu2 %1825 }
 0x4ac   : > { %1838 = vmatpush.bf16.msra.mxu0 %v1826_v59 }
 0x4ad   : > { %v1385_v22 = vpop.xlane.xlu1 %1384 }
 0x4ae   : > { %v1393_v9 = vsub.f32 %v3264_v38, %v1385_v22 }
 0x4b0   : > { %v1408_v12 = vmul.f32 1.442695, %v1393_v9  ;;  %v3310_v14 = vpop.eup %2525 }
 0x4b1   : > { %v1448_v16 = vpack.c.bf16 %v3310_v14, %v3310_v14 }
 0x4b2   : > { %2527 = vpow2.f32 %v1408_v12 }
 0x4b3   : > { %v1527_v49 = vunpack.c.l.b16 %v1448_v16 }
 0x4b8   : > { %v3314_v40 = vpop.eup %2527  ;;  %v1654_v19 = vpop.permute.xlu0 %1653 }
 0x4b9   : > { %v1449_v55 = vpack.c.bf16 %v3314_v40, %v3314_v40  ;;  %v1656_v4 = vrot.slane %v1654_v19, 4 }
 0x4bb   : > { %v1528_v27 = vunpack.c.l.b16 %v1449_v55  ;;  %v1660_v39 = vunpack.c.l.b16 %v1656_v4 }
 0x4bd   : > { %v1529_v38 = vpack.c.b16 %v1528_v27, %v1527_v49  ;;  %v1661_v20 = vpack.c.b16 %v1660_v39, %v1659_v41 }
 0x4bf   : > { %2305 = vmatmul.msk.bf16.vlgmr.msra.gmra.mxu1 %vm709_vm1, %v1529_v38  ;;  %v1666_v45 = vsel %vm598_vm0, %v1661_v20, 0 }
 0x4c0   : > { %1675 = vmatpush.bf16.xpose.msrb.mxu1 %v1666_v45  ;;  %v1851_v53 = vpop.permute.xlu0 %1850 }
 0x4c5   : > { %v1627_v10 = vpop.permute.xlu1 %1626 }
 0x4c6   : > { %2308 = vmatmul.msk.bf16.vlgmr.msrb.gmra.mxu0 %vm598_vm0, %v1627_v10 }
 0x4c8   : > { %1863 = vmatpush.bf16.msra.mxu1 %v1851_v53  ;;  %v1108_v53 = vsel %vm709_vm1, %v3217_v58, 0.0 }
 0x4cd   : > { %v1776_v3 = vpop.permute.xlu1 %1775 }
 0x4ce   : > { %1788 = vmatpush.bf16.msrb.mxu2 %v1776_v3 }
 0x4cf   : > { %2309 = vmatmul.msk.bf16.vlgmr.msrb.gmra.mxu1 %vm598_vm0, %v1658_v32 }
 0x4d5   : > { %v1801_v51 = vpop.permute.xlu1 %1800 }
 0x4d6   : > { %1813 = vmatpush.bf16.msra.mxu3 %v1801_v51  ;;  %v761_v51 = vsel %vm709_vm1, %v3026_v50, 0.0 }
 0x4e6   : > { %v3335_v38 = vpop.f32.mrf.mxu3 }
 0x4ee   : > { %v3343_v10 = vpop.f32.mrf.mxu3 }
 0x500   : > { %v3322_v48 = vpop.xlane.xlu1 %1091 }
 0x503   : > { %v1412_v29 = vpop.xlane.xlu0 %1411 }
 0x508   : > { %v1415_v12 = vpop.xlane.xlu1 %1414 }
 0x50a   : > { %v1520_v22 = vpop.f32.mrf.mxu0 }
 0x50b   : > { %v1424_v63 = vpop.xlane.xlu0 %1423 }
 0x50c   : > { %2529 = vrcp.f32 %v1424_v63 }
 0x50d   : > { %2531 = vrcp.f32 %v1412_v29 }
 0x50e   : > { %2533 = vrcp.f32 %v1415_v12 }
 0x512   : > { %v2530_v59 = vpop.eup %2529  ;;  %v3339_v45 = vpop.f32.mrf.mxu0 }
 0x513   : > { %v3324_v9 = vmul.f32 %v2530_v59, %v1520_v22  ;;  %v2532_v16 = vpop.eup %2531 }
 0x514   : > { %v2534_v19 = vpop.eup %2533 }
 0x517   : > { %v1615_v29 = vpop.f32.mrf.mxu3 }
 0x518   : > { %v1470_v33 = vpop.f32.mrf.mxu2  ;;  %v1616_v59 = vadd.f32 %v2952_v57, %v1615_v29  ;;  %v3400_v29 = vpop.xlane.xlu0 %1417 }
 0x519   : > { %v3326_v4 = vmul.f32 %v2532_v16, %v1470_v33 }
 0x51a   : > { %v1688_v33 = vsel %vm709_vm1, %v1616_v59, -inf }
 0x520   : > { %v1472_v55 = vpop.f32.mrf.mxu2 }
 0x521   : > { %v3328_v32 = vmul.f32 %v2534_v19, %v1472_v55  ;;  %v1617_v19 = vpop.f32.mrf.mxu3  ;;  %v1093_v55 = vsel %vm709_vm1, %v3200_v56, 0.0  ;;  %v1425_v56 = vsel %vm709_vm1, %v3289_v31, 0.0 }
 0x523   : > { %v2425_v41 = vpack.i.bf16 %v3328_v32, %v3326_v4 }
 0x528   : > { %v1584_v49 = vpop.f32.mrf.mxu2 }
 0x530   : > { %v1586_v27 = vpop.f32.mrf.mxu2 }
 0x531   : > { %v3333_v39 = vadd.f32 %v2945_v36, %v1586_v27  ;;  %v1102_v27 = vsel %vm709_vm1, %v3163_v54, 0.0  ;;  %v1111_v54 = vsel %vm709_vm1, %v3213_v6, 0.0 }
 0x533   : > { %v1685_v20 = vsel %vm709_vm1, %v3333_v39, -inf }
 0x534   : > { %1686 = vmax.xlane.f32.xlu1 %v1685_v20 }
 0x53c   : > { %1109 = vadd.xlane.f32.xlu1 %v1108_v53  ;;  %v3350_v22 = vpop.f32.mrf.mxu1 }
 0x543   : > { %v1646_v3 = vpop.f32.mrf.mxu0 }
 0x544   : > { %v1647_v36 = vadd.f32 %v2969_v2, %v1646_v3  ;;  %762 = vadd.xlane.f32.xlu1 %v761_v51  ;;  %v1618_v2 = vadd.f32 %v2959_v61, %v1617_v19  ;;  %v3356_v50 = vpop.f32.mrf.mxu1 }
 0x546   : > { %v1694_v63 = vsel %vm709_vm1, %v1647_v36, -inf  ;;  %v1691_v57 = vsel %vm709_vm1, %v1618_v2, -inf }
 0x547   : > { %1695 = vmax.xlane.f32.xlu2 %v1694_v63 }
 0x54b   : > { %v1648_v12 = vpop.f32.mrf.mxu0 }
 0x54c   : > { %v1649_v58 = vadd.f32 %v2976_v8, %v1648_v12  ;;  %v3362_v8 = vadd.f32 %v2941_v46, %v1584_v49  ;;  %v1677_v53 = vpop.f32.mrf.mxu1  ;;  %v1096_v46 = vsel %vm709_vm1, %v3179_v30, 0.0  ;;  %v1428_v49 = vsel %vm709_vm1, %v3310_v14, 0.0 }
 0x54d   : > { %v3369_v61 = vadd.f32 %v2986_v15, %v1677_v53  ;;  %v1419_v15 = vsel %vm709_vm1, %v3282_v52, 0.0  ;;  %v1431_v30 = vsel %vm709_vm1, %v3314_v40, 0.0  ;;  %v758_v52 = vsel %vm709_vm1, %v3022_v44, 0.0  ;;  %v1107_v40 = vpop.xlane.xlu1 %1106 }
 0x54e   : > { %v1697_v16 = vsel %vm709_vm1, %v1649_v58, -inf  ;;  %v1682_v20 = vsel %vm709_vm1, %v3362_v8, -inf  ;;  %v770_v14 = vsel %vm709_vm1, %v3045_v35, 0.0 }
 0x54f   : > { %1689 = vmax.xlane.f32.xlu2 %v1688_v33  ;;  %1698 = vmax.xlane.f32.xlu0 %v1697_v16  ;;  %v1700_v3 = vsel %vm709_vm1, %v3369_v61, -inf }
 0x554   : > { %v1679_v31 = vpop.f32.mrf.mxu1 }
 0x555   : > { %v3384_v51 = vadd.f32 %v2995_v21, %v1679_v31  ;;  %v773_v21 = vsel %vm709_vm1, %v3050_v47, 0.0  ;;  %v3402_v44 = vpop.xlane.xlu1 %1100 }
 0x557   : > { %1094 = vadd.xlane.f32.xlu2 %v1093_v55  ;;  %1692 = vmax.xlane.f32.xlu0 %v1691_v57  ;;  %v1703_v6 = vsel %vm709_vm1, %v3384_v51, -inf }
 0x55f   : > { %1103 = vadd.xlane.f32.xlu2 %v1102_v27  ;;  %1683 = vmax.xlane.f32.xlu0 %v1682_v20 }
 0x567   : > { %1426 = vadd.xlane.f32.xlu2 %v1425_v56  ;;  %1701 = vmax.xlane.f32.xlu0 %v1700_v3 }
 0x56f   : > { %1097 = vadd.xlane.f32.xlu2 %v1096_v46  ;;  %1112 = vadd.xlane.f32.xlu0 %v1111_v54 }
 0x577   : > { %1420 = vadd.xlane.f32.xlu2 %v1419_v15  ;;  %1429 = vadd.xlane.f32.xlu0 %v1428_v49 }
 0x57f   : > { %1432 = vadd.xlane.f32.xlu2 %v1431_v30  ;;  %1704 = vmax.xlane.f32.xlu0 %v1703_v6 }
 0x587   : > { %759 = vadd.xlane.f32.xlu2 %v758_v52  ;;  %771 = vadd.xlane.f32.xlu0 %v770_v14 }
 0x58f   : > { %774 = vadd.xlane.f32.xlu2 %v773_v21 }
 0x59b   : > { %2426 = vrot.lane.b32.xlu0 %v2425_v41, %s2626_s30 }
 0x5a7   : > { %v1687_v27 = vpop.xlane.xlu1 %1686 }
 0x5a8   : > { %v1707_v32 = vsub.f32 %v3333_v39, %v1687_v27 }
 0x5aa   : > { %v1716_v56 = vmul.f32 1.442695, %v1707_v32 }
 0x5ba   : > { %v1696_v63 = vpop.xlane.xlu2 %1695 }
 0x5bb   : > { %v1710_v12 = vsub.f32 %v1647_v36, %v1696_v63 }
 0x5bd   : > { %v1722_v33 = vmul.f32 1.442695, %v1710_v12 }
 0x5bf   : > { %2535 = vpow2.f32 %v1722_v33 }
 0x5c2   : > { %v1690_v35 = vpop.xlane.xlu2 %1689  ;;  %v1699_v16 = vpop.xlane.xlu0 %1698 }
 0x5c3   : > { %v1708_v19 = vsub.f32 %v1616_v59, %v1690_v35  ;;  %v1711_v55 = vsub.f32 %v1649_v58, %v1699_v16 }
 0x5c5   : > { %v1724_v47 = vmul.f32 1.442695, %v1711_v55  ;;  %v1718_v57 = vmul.f32 1.442695, %v1708_v19  ;;  %v3405_v4 = vpop.eup %2535 }
 0x5c6   : > { %v1766_v59 = vpack.c.bf16 %v3405_v4, %v3405_v4 }
 0x5c7   : > { %2537 = vpow2.f32 %v1724_v47 }
 0x5c8   : > { %2539 = vrcp.f32 %v3322_v48  ;;  %v1822_v15 = vunpack.c.l.b16 %v1766_v59  ;;  %v1110_v59 = vpop.xlane.xlu1 %1109 }
 0x5c9   : > { %2541 = vpow2.f32 %v1718_v57 }
 0x5ca   : > { %v1095_v41 = vpop.xlane.xlu2 %1094  ;;  %v1693_v36 = vpop.xlane.xlu0 %1692 }
 0x5cb   : > { %2543 = vrcp.f32 %v1095_v41  ;;  %v1709_v20 = vsub.f32 %v1618_v2, %v1693_v36 }
 0x5cd   : > { %v1720_v58 = vmul.f32 1.442695, %v1709_v20  ;;  %v2538_v53 = vpop.eup %2537 }
 0x5ce   : > { %v2540_v3 = vpop.eup %2539  ;;  %v1767_v46 = vpack.c.bf16 %v2538_v53, %v2538_v53  ;;  %v1745_v48 = vsel %vm709_vm1, %v2538_v53, 0.0 }
 0x5cf   : > { %2545 = vpow2.f32 %v1720_v58  ;;  %v3411_v54 = vpop.eup %2541  ;;  %1746 = vadd.xlane.f32.xlu0 %v1745_v48  ;;  %v1230_v30 = vmul.f32 %v2540_v3, %v3234_v43 }
 0x5d0   : > { %2547 = vrcp.f32 %v1107_v40  ;;  %v1823_v49 = vunpack.c.l.b16 %v1767_v46  ;;  %v1764_v21 = vpack.c.bf16 %v3411_v54, %v3411_v54 }
 0x5d1   : > { %v2544_v39 = vpop.eup %2543  ;;  %2549 = vpow2.f32 %v1716_v56 }
 0x5d2   : > { %v1104_v2 = vpop.xlane.xlu2 %1103  ;;  %v1684_v31 = vpop.xlane.xlu0 %1683  ;;  %v1231_v6 = vmul.f32 %v2544_v39, %v3238_v34  ;;  %v1824_v52 = vpack.c.b16 %v1823_v49, %v1822_v15  ;;  %v764_v34 = vsel %vm709_vm1, %v3034_v13, 0.0  ;;  %v1797_v35 = vunpack.c.l.b16 %v1764_v21 }
 0x5d3   : > { %2551 = vrcp.f32 %v1104_v2  ;;  %v1706_v14 = vsub.f32 %v3362_v8, %v1684_v31 }
 0x5d4   : > { %v2420_v63 = vpack.i.bf16 %v1231_v6, %v1230_v30  ;;  %2312 = vmatmul.msk.bf16.vlgmr.msra.gmra.mxu0 %vm709_vm1, %v1824_v52 }
 0x5d5   : > { %v3418_v12 = vpop.eup %2545  ;;  %v1714_v40 = vmul.f32 1.442695, %v1706_v14 }
 0x5d6   : > { %v1765_v33 = vpack.c.bf16 %v3418_v12, %v3418_v12  ;;  %2421 = vrot.lane.b32.xlu1 %v2420_v63, %s2627_s7  ;;  %v2548_v43 = vpop.eup %2547 }
 0x5d7   : > { %2553 = vpow2.f32 %v1714_v40  ;;  %v3426_v8 = vpop.eup %2549  ;;  %765 = vadd.xlane.f32.xlu0 %v764_v34  ;;  %v1235_v32 = vmul.f32 %v2548_v43, %v3240_v25 }
 0x5d8   : > { %v1798_v16 = vunpack.c.l.b16 %v1765_v33  ;;  %v1763_v41 = vpack.c.bf16 %v3426_v8, %v3426_v8  ;;  %2555 = vrcp.f32 %v1110_v59 }
 0x5d9   : > { %v2552_v19 = vpop.eup %2551 }
 0x5da   : > { %v1799_v55 = vpack.c.b16 %v1798_v16, %v1797_v35  ;;  %v3428_v47 = vpop.xlane.xlu2 %1426  ;;  %v1702_v57 = vpop.xlane.xlu0 %1701  ;;  %v1234_v27 = vmul.f32 %v2552_v19, %v3236_v60  ;;  %v1773_v58 = vunpack.c.l.b16 %v1763_v41  ;;  %v1733_v41 = vsel %vm709_vm1, %v3426_v8, 0.0 }
 0x5db   : > { %v1712_v48 = vsub.f32 %v3369_v61, %v1702_v57  ;;  %v1739_v57 = vsel %vm709_vm1, %v3418_v12, 0.0 }
 0x5dc   : > { %2311 = vmatmul.msk.bf16.vlgmr.msra.gmra.mxu3 %vm709_vm1, %v1799_v55  ;;  %v2430_v13 = vpack.i.bf16 %v1235_v32, %v1234_v27 }
 0x5dd   : > { %v2554_v36 = vpop.eup %2553  ;;  %v1726_v30 = vmul.f32 1.442695, %v1712_v48 }
 0x5de   : > { %v1762_v20 = vpack.c.bf16 %v2554_v36, %v2554_v36  ;;  %2431 = vrot.lane.b32.xlu2 %v2430_v13, %s2627_s7  ;;  %v2556_v25 = vpop.eup %2555  ;;  %v1730_v27 = vsel %vm709_vm1, %v2554_v36, 0.0  ;;  %v763_v36 = vpop.xlane.xlu1 %762 }
 0x5df   : > { %v3443_v49 = vmul.f32 %v2556_v25, %v3250_v23 }
 0x5e0   : > { %v1772_v53 = vunpack.c.l.b16 %v1762_v20 }
 0x5e2   : > { %v1774_v56 = vpack.c.b16 %v1773_v58, %v1772_v53  ;;  %v3436_v3 = vpop.xlane.xlu2 %1097  ;;  %v1113_v60 = vpop.xlane.xlu0 %1112 }
 0x5e3   : > { %2557 = vrcp.f32 %v1113_v60 }
 0x5e4   : > { %2310 = vmatmul.msk.bf16.vlgmr.msrb.gmra.mxu2 %vm709_vm1, %v1774_v56 }
 0x5e9   : > { %v2558_v46 = vpop.eup %2557 }
 0x5ea   : > { %v3440_v39 = vpop.xlane.xlu2 %1420  ;;  %v1430_v15 = vpop.xlane.xlu0 %1429  ;;  %v3446_v2 = vmul.f32 %v2558_v46, %v3252_v42 }
 0x5eb   : > { %2559 = vrcp.f32 %v1430_v15 }
 0x5ec   : > { %v2460_v31 = vpack.i.bf16 %v3446_v2, %v3443_v49  ;;  %2561 = vpow2.f32 %v1726_v30 }
 0x5f1   : > { %v2560_v21 = vpop.eup %2559 }
 0x5f2   : > { %v1433_v6 = vpop.xlane.xlu2 %1432  ;;  %v1705_v52 = vpop.xlane.xlu0 %1704  ;;  %v3452_v40 = vmul.f32 %v2560_v21, %v3350_v22 }
 0x5f3   : > { %2563 = vrcp.f32 %v1433_v6  ;;  %v1713_v61 = vsub.f32 %v3384_v51, %v1705_v52  ;;  %v2562_v63 = vpop.eup %2561  ;;  %v1742_v51 = vsel %vm709_vm1, %v3405_v4, 0.0  ;;  %v776_v4 = vsel %vm709_vm1, %v3057_v1, 0.0 }
 0x5f4   : > { %v1768_v33 = vpack.c.bf16 %v2562_v63, %v2562_v63  ;;  %v1748_v32 = vsel %vm709_vm1, %v2562_v63, 0.0 }
 0x5f5   : > { %v1728_v14 = vmul.f32 1.442695, %v1713_v61 }
 0x5f6   : > { %v1847_v19 = vunpack.c.l.b16 %v1768_v33 }
 0x5f7   : > { %2565 = vpow2.f32 %v1728_v14 }
 0x5f8   : > { %2567 = vrcp.f32 %v3428_v47 }
 0x5f9   : > { %v2564_v23 = vpop.eup %2563  ;;  %2569 = vrcp.f32 %v763_v36 }
 0x5fa   : > { %v3455_v42 = vmul.f32 %v2564_v23, %v3356_v50  ;;  %v1736_v50 = vsel %vm709_vm1, %v3411_v54, 0.0  ;;  %v760_v20 = vpop.xlane.xlu2 %759  ;;  %v3477_v59 = vpop.xlane.xlu0 %771 }
 0x5fb   : > { %2571 = vrcp.f32 %v760_v20 }
 0x5fc   : > { %v2470_v43 = vpack.i.bf16 %v3455_v42, %v3452_v40  ;;  %2573 = vrcp.f32 %v3436_v3 }
 0x5fd   : > { %v2566_v34 = vpop.eup %2565  ;;  %2575 = vrcp.f32 %v3402_v44 }
 0x5fe   : > { %v1769_v35 = vpack.c.bf16 %v2566_v34, %v2566_v34  ;;  %v1751_v16 = vsel %vm709_vm1, %v2566_v34, 0.0  ;;  %v2568_v54 = vpop.eup %2567 }
 0x5ff   : > { %1752 = vadd.xlane.f32.xlu0 %v1751_v16  ;;  %v1555_v12 = vmul.f32 %v2568_v54, %v3339_v45  ;;  %v2570_v1 = vpop.eup %2569 }
 0x600   : > { %v1848_v55 = vunpack.c.l.b16 %v1769_v35  ;;  %1743 = vadd.xlane.f32.xlu1 %v1742_v51  ;;  %v911_v8 = vmul.f32 %v2570_v1, %v3075_v0  ;;  %v767_v0 = vsel %vm709_vm1, %v3039_v24, 0.0 }
 0x601   : > { %v2435_v13 = vpack.i.bf16 %v1555_v12, %v3324_v9  ;;  %v2572_v58 = vpop.eup %2571  ;;  %v2381_v12 = vld [vmem:[%s3611_s4 + $0x38] sm:$0xff] }
 0x602   : > { %v1849_v22 = vpack.c.b16 %v1848_v55, %v1847_v19  ;;  %v910_v47 = vmul.f32 %v2572_v58, %v3073_v18  ;;  %v2574_v18 = vpop.eup %2573  ;;  %v3493_v6 = vpop.xlane.xlu2 %774  ;;  %2401 = vmatpush.bf16.msrb.mxu3 %v2381_v12  ;;  %2072 = vmatpush.bf16.msra.mxu2 %v2381_v12 }
 0x603   : > { %v2576_v52 = vpop.eup %2575  ;;  %v1232_v21 = vmul.f32 %v2574_v18, %v3226_v62 }
 0x604   : > { %2313 = vmatmul.msk.bf16.vlgmr.msra.gmra.mxu1 %vm709_vm1, %v1849_v22  ;;  %v1233_v63 = vmul.f32 %v2576_v52, %v3228_v11  ;;  %v2380_v52 = vld [vmem:[%s3611_s4 + $0x30] sm:$0xff] }
 0x606   : > { %v2450_v23 = vpack.i.bf16 %v1233_v63, %v1232_v21  ;;  %2402 = vmatpush.bf16.msrb.mxu3 %v2380_v52  ;;  %2073 = vmatpush.bf16.msra.mxu2 %v2380_v52  ;;  %v2377_v21 = vld [vmem:[%s3611_s4 + $0x18] sm:$0xff]  ;;  %v2376_v63 = vld [vmem:[%s3611_s4 + $0x10] sm:$0xff]  ;;  %v3615_v52 = vld [vmem:[#allocation2_spill] sm:$0xff] }
 0x607   : > { %1737 = vadd.xlane.f32.xlu2 %v1736_v50 }
 0x608   : > { %1740 = vadd.xlane.f32.xlu1 %v1739_v57 }
 0x60d   : > { %v2427_v53 = vpop.permute.xlu0 %2426 }
 0x60e   : > { %v2429_v9 = vunpack.i.h.bf16 %v2427_v53  ;;  %v2428_v25 = vunpack.i.l.bf16 %v2427_v53 }
 0x60f   : > { %1731 = vadd.xlane.f32.xlu2 %v1730_v27 }
 0x610   : > { %1749 = vadd.xlane.f32.xlu1 %v1748_v32 }
 0x617   : > { %777 = vadd.xlane.f32.xlu2 %v776_v4 }
 0x618   : > { %1734 = vadd.xlane.f32.xlu1 %v1733_v41 }
 0x631   : > { %2436 = vrot.lane.b32.xlu1 %v2435_v13, %s2626_s30 }
 0x638   : > { %v3497_v34 = vpop.permute.xlu2 %2431 }
 0x642   : > { %v1747_v61 = vpop.xlane.xlu0 %1746 }
 0x643   : > { %2577 = vrcp.f32 %v1747_v61  ;;  %v2379_v61 = vld [vmem:[%s3611_s4 + $0x28] sm:$0xff] }
 0x644   : > { %2403 = vmatpush.bf16.msrb.mxu3 %v2379_v61  ;;  %2074 = vmatpush.bf16.msra.mxu2 %v2379_v61 }
 0x648   : > { %v2422_v56 = vpop.permute.xlu1 %2421 }
 0x649   : > { %v2424_v60 = vunpack.i.h.bf16 %v2422_v56  ;;  %v2423_v45 = vunpack.i.l.bf16 %v2422_v56  ;;  %v2578_v3 = vpop.eup %2577 }
 0x64a   : > { %v3501_v24 = vpop.xlane.xlu0 %765 }
 0x64b   : > { %v1975_v46 = vsel %vm598_vm0, %v911_v8, %v2424_v60  ;;  %v1974_v48 = vsel %vm598_vm0, %v910_v47, %v2423_v45 }
 0x64c   : > { %v3484_v15 = vsel %vm1982_vm2, %v1974_v48, %v2428_v25  ;;  %v3487_v30 = vsel %vm1982_vm2, %v1975_v46, %v2429_v9 }
 0x651   : > { %v1840_v14 = vpop.f32.mrf.mxu0 }
 0x659   : > { %v1842_v44 = vpop.f32.mrf.mxu0 }
 0x65a   : > { %v1875_v62 = vmul.f32 %v2578_v3, %v1842_v44  ;;  %v779_v44 = vsel %vm709_vm1, %v3061_v17, 0.0 }
 0x65b   : > { %768 = vadd.xlane.f32.xlu1 %v767_v0 }
 0x65f   : > { %v1815_v22 = vpop.f32.mrf.mxu3 }
 0x667   : > { %v1790_v36 = vpop.f32.mrf.mxu2  ;;  %v1817_v20 = vpop.f32.mrf.mxu3 }
 0x66f   : > { %v1792_v46 = vpop.f32.mrf.mxu2 }
 0x672   : > { %v1753_v57 = vpop.xlane.xlu0 %1752 }
 0x673   : > { %v1744_v33 = vpop.xlane.xlu1 %1743 }
 0x674   : > { %2579 = vrcp.f32 %v1744_v33  ;;  %2451 = vrot.lane.b32.xlu1 %v2450_v23, %s2627_s7  ;;  %v2375_v23 = vld [vmem:[%s3611_s4 + $0x8] sm:$0xff]  ;;  %v2374_v33 = vld [vmem:[%s3611_s4] sm:$0xff] }
 0x675   : > { %2581 = vrcp.f32 %v3440_v39 }
 0x676   : > { %2583 = vrcp.f32 %v3400_v29 }
 0x67a   : > { %v2580_v35 = vpop.eup %2579  ;;  %v1738_v51 = vpop.xlane.xlu2 %1737 }
 0x67b   : > { %v1741_v16 = vpop.xlane.xlu1 %1740  ;;  %v1874_v11 = vmul.f32 %v2580_v35, %v1840_v14  ;;  %v2582_v55 = vpop.eup %2581  ;;  %2585 = vrcp.f32 %v1738_v51  ;;  %v2378_v14 = vld [vmem:[%s3611_s4 + $0x20] sm:$0xff]  ;;  %v2433_v51 = vunpack.i.l.bf16 %v3497_v34 }
 0x67c   : > { %v2584_v50 = vpop.eup %2583  ;;  %2587 = vrcp.f32 %v1741_v16  ;;  %v1553_v27 = vmul.f32 %v2582_v55, %v3343_v10  ;;  %2404 = vmatpush.bf16.msrb.mxu3 %v2378_v14  ;;  %2075 = vmatpush.bf16.msra.mxu2 %v2378_v14 }
 0x67d   : > { %v2440_v19 = vpack.i.bf16 %v1875_v62, %v1874_v11  ;;  %2589 = vrcp.f32 %v1753_v57  ;;  %v1552_v29 = vmul.f32 %v2584_v50, %v3335_v38  ;;  %v2434_v11 = vunpack.i.h.bf16 %v3497_v34 }
 0x67f   : > { %2441 = vrot.lane.b32.xlu2 %v2440_v19, %s2625_s18  ;;  %v2455_v41 = vpack.i.bf16 %v1553_v27, %v1552_v29 }
 0x680   : > { %2405 = vmatpush.bf16.msrb.mxu3 %v2377_v21  ;;  %2076 = vmatpush.bf16.msra.mxu2 %v2377_v21 }
 0x681   : > { %v1865_v39 = vpop.f32.mrf.mxu1  ;;  %v2586_v4 = vpop.eup %2585 }
 0x682   : > { %v2588_v54 = vpop.eup %2587  ;;  %v1732_v13 = vpop.xlane.xlu2 %1731  ;;  %v1872_v58 = vmul.f32 %v2586_v4, %v1815_v22 }
 0x683   : > { %v1750_v32 = vpop.xlane.xlu1 %1749  ;;  %v2590_v10 = vpop.eup %2589  ;;  %v1873_v53 = vmul.f32 %v2588_v54, %v1817_v20 }
 0x684   : > { %2591 = vrcp.f32 %v1750_v32  ;;  %2406 = vmatpush.bf16.msrb.mxu3 %v2376_v63  ;;  %2077 = vmatpush.bf16.msra.mxu2 %v2376_v63 }
 0x685   : > { %2593 = vrcp.f32 %v1732_v13  ;;  %v2465_v45 = vpack.i.bf16 %v1873_v53, %v1872_v58 }
 0x687   : > { %2456 = vrot.lane.b32.xlu2 %v2455_v41, %s2626_s30 }
 0x688   : > { %2407 = vmatpush.bf16.msrb.mxu3 %v2375_v23  ;;  %2078 = vmatpush.bf16.msra.mxu2 %v2375_v23 }
 0x689   : > { %v1867_v1 = vpop.f32.mrf.mxu1 }
 0x68a   : > { %v2592_v38 = vpop.eup %2591  ;;  %v1877_v8 = vmul.f32 %v2590_v10, %v1867_v1  ;;  %v778_v3 = vpop.xlane.xlu2 %777 }
 0x68b   : > { %v1876_v56 = vmul.f32 %v2592_v38, %v1865_v39  ;;  %v1735_v47 = vpop.xlane.xlu1 %1734  ;;  %v2594_v9 = vpop.eup %2593 }
 0x68c   : > { %2595 = vrcp.f32 %v1735_v47  ;;  %v1870_v48 = vmul.f32 %v2594_v9, %v1790_v36  ;;  %2408 = vmatpush.bf16.msrb.mxu3 %v2374_v33  ;;  %2079 = vmatpush.bf16.msra.mxu2 %v2374_v33 }
 0x68d   : > { %v2475_v60 = vpack.i.bf16 %v1877_v8, %v1876_v56  ;;  %2597 = vrcp.f32 %v3477_v59 }
 0x68e   : > { %2599 = vrcp.f32 %v3493_v6 }
 0x68f   : > { %2466 = vrot.lane.b32.xlu2 %v2465_v45, %s2625_s18  ;;  %2476 = vrot.lane.b32.xlu1 %v2475_v60, %s2625_s18  ;;  %2601 = vrcp.f32 %v3501_v24 }
 0x692   : > { %v2596_v25 = vpop.eup %2595 }
 0x693   : > { %v1871_v0 = vmul.f32 %v2596_v25, %v1792_v46  ;;  %v2598_v35 = vpop.eup %2597 }
 0x694   : > { %v2600_v16 = vpop.eup %2599  ;;  %v914_v55 = vmul.f32 %v2598_v35, %v3091_v37 }
 0x695   : > { %v2445_v18 = vpack.i.bf16 %v1871_v0, %v1870_v48  ;;  %v915_v59 = vmul.f32 %v2600_v16, %v3093_v26  ;;  %v2602_v36 = vpop.eup %2601 }
 0x696   : > { %v1978_v50 = vsel %vm598_vm0, %v914_v55, %v2433_v51  ;;  %v912_v24 = vmul.f32 %v2602_v36, %v3077_v5  ;;  %v2480_v51 = vld [vmem:[%s3612_s5] ss:$0 sm:$0xff] }
 0x697   : > { %2446 = vrot.lane.b32.xlu0 %v2445_v18, %s2625_s18  ;;  %v1979_v22 = vsel %vm598_vm0, %v915_v59, %v2434_v11  ;;  %v2609_v55 = vld [vmem:[%s2747_s26] sm:$0xff] }
 0x6a3   : > { %v2437_v62 = vpop.permute.xlu1 %2436 }
 0x6a4   : > { %v2439_v19 = vunpack.i.h.bf16 %v2437_v62  ;;  %v2438_v17 = vunpack.i.l.bf16 %v2437_v62 }
 0x6a6   : > { %v1988_v49 = vsel %vm1982_vm2, %v1979_v22, %v2439_v19  ;;  %v1987_v2 = vsel %vm1982_vm2, %v1978_v50, %v2438_v17 }
 0x6c1   : > { %780 = vadd.xlane.f32.xlu0 %v779_v44 }
 0x6ce   : > { %v769_v37 = vpop.xlane.xlu1 %768 }
 0x6cf   : > { %2603 = vrcp.f32 %v769_v37  ;;  %v2612_v37 = vld [vmem:[%s2747_s26 + $0x20] sm:$0xff] }
 0x6d0   : > { %2605 = vrcp.f32 %v778_v3 }
 0x6d5   : > { %2461 = vrot.lane.b32.xlu0 %v2460_v31, %s2627_s7  ;;  %v2604_v40 = vpop.eup %2603 }
 0x6d6   : > { %v913_v20 = vmul.f32 %v2604_v40, %v3079_v7  ;;  %v2606_v9 = vpop.eup %2605 }
 0x6d7   : > { %v916_v18 = vmul.f32 %v2606_v9, %v3095_v28 }
 0x6d9   : > { %v2442_v6 = vpop.permute.xlu2 %2441 }
 0x6da   : > { %v2444_v57 = vunpack.i.h.bf16 %v2442_v6  ;;  %v2443_v39 = vunpack.i.l.bf16 %v2442_v6 }
 0x6dc   : > { %v1997_v31 = vsel %vm1991_vm3, %v1988_v49, %v2444_v57  ;;  %v1996_v34 = vsel %vm1991_vm3, %v1987_v2, %v2443_v39  ;;  %v2610_v57 = vld [vmem:[%s2747_s26 + $0x8] sm:$0xff] }
 0x6dd   : > { %v2002_v27 = vpack.c.bf16 %v1997_v31, %v1996_v34  ;;  %2471 = vrot.lane.b32.xlu0 %v2470_v43, %s2626_s30  ;;  %v2611_v34 = vld [vmem:[%s2747_s26 + $0x10] sm:$0xff] }
 0x6df   : > { %2090 = vmatmul.bf16.vlgmr.msrb.gmra.mxu3 %v2002_v27 }
 0x6e1   : > { %v2457_v26 = vpop.permute.xlu2 %2456 }
 0x6e2   : > { %v2458_v53 = vunpack.i.l.bf16 %v2457_v26 }
 0x6e6   : > { %v2452_v12 = vpop.permute.xlu1 %2451 }
 0x6e7   : > { %v2454_v42 = vunpack.i.h.bf16 %v2452_v12  ;;  %v2453_v43 = vunpack.i.l.bf16 %v2452_v12 }
 0x6e9   : > { %v2467_v10 = vpop.permute.xlu2 %2466  ;;  %v1977_v1 = vsel %vm598_vm0, %v913_v20, %v2454_v42  ;;  %v1976_v58 = vsel %vm598_vm0, %v912_v24, %v2453_v43  ;;  %v2615_v43 = vld [vmem:[%s2747_s26 + $0x30] sm:$0xff] }
 0x6ea   : > { %v2469_v38 = vunpack.i.h.bf16 %v2467_v10  ;;  %v1985_v8 = vsel %vm1982_vm2, %v1976_v58, %v2458_v53 }
 0x701   : > { %v2477_v0 = vpop.permute.xlu1 %2476 }
 0x702   : > { %v2479_v23 = vunpack.i.h.bf16 %v2477_v0  ;;  %v2478_v33 = vunpack.i.l.bf16 %v2477_v0 }
 0x709   : > { %v2447_v32 = vpop.permute.xlu0 %2446 }
 0x70a   : > { %v2449_v29 = vunpack.i.h.bf16 %v2447_v32  ;;  %v2448_v4 = vunpack.i.l.bf16 %v2447_v32 }
 0x70c   : > { %v1992_v41 = vsel %vm1991_vm3, %v3484_v15, %v2448_v4  ;;  %v1993_v54 = vsel %vm1991_vm3, %v3487_v30, %v2449_v29  ;;  %v2459_v15 = vunpack.i.h.bf16 %v2457_v26  ;;  %v2468_v30 = vunpack.i.l.bf16 %v2467_v10 }
 0x70d   : > { %v2000_v13 = vpack.c.bf16 %v1993_v54, %v1992_v41  ;;  %v2613_v54 = vld [vmem:[%s2747_s26 + $0x18] sm:$0xff] }
 0x70e   : > { %v1986_v56 = vsel %vm1982_vm2, %v1977_v1, %v2459_v15  ;;  %v1994_v47 = vsel %vm1991_vm3, %v1985_v8, %v2468_v30  ;;  %v2616_v1 = vld [vmem:[%s2747_s26 + $0x38] sm:$0xff] }
 0x70f   : > { %2080 = vmatmul.bf16.vlgmr.msra.gmra.mxu2 %v2000_v13  ;;  %v1995_v60 = vsel %vm1991_vm3, %v1986_v56, %v2469_v38  ;;  %v2614_v13 = vld [vmem:[%s2747_s26 + $0x28] sm:$0xff] }
 0x710   : > { %v2001_v5 = vpack.c.bf16 %v1995_v60, %v1994_v47 }
 0x71f   : > { %2085 = vmatmul.bf16.gmra.mxu2 %v2001_v5 }
 0x734   : > { %v781_v7 = vpop.xlane.xlu0 %780 }
 0x735   : > { %2607 = vrcp.f32 %v781_v7 }
 0x73b   : > { %v2608_v25 = vpop.eup %2607 }
 0x73c   : > { %v917_v61 = vmul.f32 %v2608_v25, %v3615_v52 }
 0x747   : > { %v2462_v45 = vpop.permute.xlu0 %2461 }
 0x748   : > { %v2464_v46 = vunpack.i.h.bf16 %v2462_v45  ;;  %v2463_v48 = vunpack.i.l.bf16 %v2462_v45 }
 0x74a   : > { %v1981_v44 = vsel %vm598_vm0, %v917_v61, %v2464_v46  ;;  %v1980_v3 = vsel %vm598_vm0, %v916_v18, %v2463_v48 }
 0x74f   : > { %v2472_v14 = vpop.permute.xlu0 %2471 }
 0x750   : > { %v2474_v21 = vunpack.i.h.bf16 %v2472_v14  ;;  %v2473_v63 = vunpack.i.l.bf16 %v2472_v14 }
 0x752   : > { %v1989_v35 = vsel %vm1982_vm2, %v1980_v3, %v2473_v63  ;;  %v1990_v62 = vsel %vm1982_vm2, %v1981_v44, %v2474_v21 }
 0x753   : > { %v1998_v28 = vsel %vm1991_vm3, %v1989_v35, %v2478_v33  ;;  %v1999_v16 = vsel %vm1991_vm3, %v1990_v62, %v2479_v23 }
 0x754   : > { %v2003_v11 = vpack.c.bf16 %v1999_v16, %v1998_v28 }
 0x756   : > { %2095 = vmatmul.bf16.gmra.mxu3 %v2003_v11 }
 0x762   : > { %v2091_v50 = vpop.f32.mrf.mxu3 }
 0x763   : > { %v2092_v49 = vadd.f32 %v2480_v51, %v2091_v50 }
 0x765   : > { %v2105_v26 = vadd.f32 %v2612_v37, %v2092_v49 }
 0x767   : > { %2113 = vst [vmem:[%s3586_s8 + $0x20] sm:$0xff] %v2105_v26 }
 0x76a   : > { %v2093_v32 = vpop.f32.mrf.mxu3 }
 0x76b   : > { %v2094_v29 = vadd.f32 %v2480_v51, %v2093_v32 }
 0x76d   : > { %v2106_v36 = vadd.f32 %v2614_v13, %v2094_v29 }
 0x76f   : > { %2114 = vst [vmem:[%s3586_s8 + $0x28] sm:$0xff] %v2106_v36 }
 0x792   : > { %v2081_v19 = vpop.f32.mrf.mxu2 }
 0x793   : > { %v2082_v17 = vadd.f32 %v2480_v51, %v2081_v19 }
 0x795   : > { %v2101_v59 = vadd.f32 %v2609_v55, %v2082_v17 }
 0x797   : > { %2109 = vst [vmem:[%s3586_s8] sm:$0xff] %v2101_v59 }
 0x79a   : > { %v2083_v6 = vpop.f32.mrf.mxu2 }
 0x79b   : > { %v2084_v22 = vadd.f32 %v2480_v51, %v2083_v6 }
 0x79d   : > { %v2102_v39 = vadd.f32 %v2610_v57, %v2084_v22 }
 0x79f   : > { %2110 = vst [vmem:[%s3586_s8 + $0x8] sm:$0xff] %v2102_v39 }
 0x7a2   : > { %v2086_v2 = vpop.f32.mrf.mxu2 }
 0x7a3   : > { %v2087_v31 = vadd.f32 %v2480_v51, %v2086_v2 }
 0x7a5   : > { %v2103_v27 = vadd.f32 %v2611_v34, %v2087_v31 }
 0x7a7   : > { %2111 = vst [vmem:[%s3586_s8 + $0x10] sm:$0xff] %v2103_v27 }
 0x7aa   : > { %v2088_v4 = vpop.f32.mrf.mxu2 }
 0x7ab   : > { %v2089_v41 = vadd.f32 %v2480_v51, %v2088_v4 }
 0x7ad   : > { %v2104_v12 = vadd.f32 %v2613_v54, %v2089_v41 }
 0x7af   : > { %2112 = vst [vmem:[%s3586_s8 + $0x18] sm:$0xff] %v2104_v12 }
 0x7d9   : > { %v2096_v40 = vpop.f32.mrf.mxu3 }
 0x7da   : > { %v2097_v42 = vadd.f32 %v2480_v51, %v2096_v40 }
 0x7dc   : > { %v2107_v24 = vadd.f32 %v2615_v43, %v2097_v42 }
 0x7de   : > { %2115 = vst [vmem:[%s3586_s8 + $0x30] sm:$0xff] %v2107_v24 }
 0x7e1   : > { %v2098_v20 = vpop.f32.mrf.mxu3 }
 0x7e2   : > { %v2099_v10 = vadd.f32 %v2480_v51, %v2098_v20 }
 0x7e4   : > { %v2108_v58 = vadd.f32 %v2616_v1, %v2099_v10 }
 0x7e6   : > { %2116 = vst [vmem:[%s3586_s8 + $0x38] sm:$0xff] %v2108_v58 }
 0x7e7 PF: > { %s16_s21 = sadd.s32 1, %s2623_s21  }
 0x7e8   : > { %p13_p4 = scmp.ge.s32.totalorder %s16_s21, 4  }
 0x7ea   :  { %15 = sbr.rel (!%p13_p4) target bundleno = 1 (0x1), region = 74 }

</bundles_post_ra>
